<compile_context>
chip_gen: v7x
topology: tpu7x:2x2x1
jax: 0.10.0
libtpu: 0.0.40
codegen_flags: <defaults>
</compile_context>

<pallas_src>
import math
import numpy as np
import jax
import jax.numpy as jnp
from jax.experimental import pallas as pl
from jax.experimental.pallas import tpu as pltpu

EPS = 1e-05
_N_TAPS = 9        # 3x3 spherical kernel taps


# ---------------------------------------------------------------------------
# Pallas kernel: one long-K MXU matmul per point chunk, + bias
# ---------------------------------------------------------------------------
def _fused_sphereconv_kernel(wx_ref, s_ref, b_ref, o_ref):
    """One grid step = one lane-dense chunk of ico points, all batches/channels at once.

    wx_ref : (B*Cout, 9*HW)   bf16  (resident: conv weights pre-contracted with the input)
    s_ref  : (9*HW, chunk)    bf16  (chunk of the flattened bilinear sampling matrix)
    b_ref  : (B*Cout, 1)      f32   (resident bias, tiled over batch)
    o_ref  : (B*Cout, chunk)  f32   (lane-dense output block)
    """
    o_ref[...] = (jnp.dot(wx_ref[...], s_ref[...],
                          preferred_element_type=jnp.float32)
                  + b_ref[...])


def _pick_chunk(n_points):
    """Lane-dense point-axis chunk: multiple of 128, in [128, 512], and >= 2 grid steps
    whenever n_points allows (keeps both v7x TensorCores busy)."""
    n_units = -(-n_points // 128)          # point axis in 128-lane units
    half = -(-n_units // 2)                # ~half the axis -> at least 2 steps
    return 128 * max(1, min(4, half))


def sphereconv_icopoint(wx, s_flat, bias_tile, *, chunk):
    """wx (B*Cout, 9*HW) bf16, s_flat (9*HW, Npad) bf16, bias_tile (B*Cout, 1) f32
    -> (B*Cout, Npad) f32."""
    BC, K = wx.shape
    K2, n_pad = s_flat.shape
    assert K == K2 and n_pad % chunk == 0
    grid = (n_pad // chunk,)

    flops = 2 * BC * K * n_pad
    bytes_accessed = (wx.size * 2 + s_flat.size * 2
                      + bias_tile.size * 4 + BC * n_pad * 4)

    # VMEM: double-buffered S chunk dominates; raise the scoped limit only if needed
    # (default scoped limit is 16 MiB on v5e / 32 MiB on v6e-v7x; leave headroom).
    vmem_est = 2 * (K * chunk * 2 + BC * chunk * 4) + BC * K * 2 + BC * 4
    vmem_limit = int(vmem_est * 1.5) if vmem_est > 12 * 1024 * 1024 else None

    return pl.pallas_call(
        _fused_sphereconv_kernel,
        out_shape=jax.ShapeDtypeStruct((BC, n_pad), jnp.float32),
        grid_spec=pltpu.PrefetchScalarGridSpec(
            num_scalar_prefetch=0,
            grid=grid,
            in_specs=[
                pl.BlockSpec((BC, K), lambda g: (0, 0)),      # WX: resident
                pl.BlockSpec((K, chunk), lambda g: (0, g)),   # S: chunked over points
                pl.BlockSpec((BC, 1), lambda g: (0, 0)),      # bias: resident
            ],
            out_specs=pl.BlockSpec((BC, chunk), lambda g: (0, g)),
        ),
        compiler_params=pltpu.CompilerParams(
            dimension_semantics=("parallel",),
            vmem_limit_bytes=vmem_limit),
        cost_estimate=pl.CostEstimate(flops=flops, transcendentals=0,
                                      bytes_accessed=bytes_accessed),
    )(wx, s_flat, bias_tile)


# ---------------------------------------------------------------------------
# Trace-time (numpy) construction of the static bilinear sampling operator
# ---------------------------------------------------------------------------
def _build_sampling_grid(n_points, H, W):
    """Deterministic (lat, lon) ico-point set + 3x3 tangent neighborhoods -> pixel coords."""
    # TODO(synk): exact DGGRID FULLER4D cell-center geometry needs the external `dggrid`
    # library; a deterministic Fibonacci spherical lattice (grouped into 10 quads) is used.
    n = np.arange(n_points, dtype=np.float64)
    golden = (1.0 + 5.0 ** 0.5) / 2.0
    lat = np.arcsin(np.clip(1.0 - 2.0 * (n + 0.5) / n_points, -1.0, 1.0))   # [-pi/2, pi/2]
    lon = (2.0 * np.pi * n / golden) % (2.0 * np.pi)                         # [0, 2pi)

    d = np.pi / H                                    # one equirect pixel in radians
    ki = np.array([-1.0, 0.0, 1.0])
    dlat = ki[None, :, None] * d                                             # (1, 3, 1)
    coslat = np.maximum(np.cos(lat), 1e-3)
    dlon = ki[None, None, :] * d / coslat[:, None, None]                     # (N, 1, 3)

    lat_s = np.clip(lat[:, None, None] + dlat, -np.pi / 2, np.pi / 2)        # (N, 3, 1)
    lon_s = (lon[:, None, None] + dlon) % (2.0 * np.pi)                      # (N, 1, 3)
    lat_s, lon_s = np.broadcast_arrays(lat_s, lon_s)                         # (N, 3, 3) each

    yy = (lat_s + np.pi / 2) / np.pi * (H - 1)       # [0, H-1]
    xx = lon_s / (2.0 * np.pi) * W                   # [0, W), wraps in longitude
    return yy, xx


def _build_sampling_matrix(n_points, H, W, n_pad):
    """Dense bilinear sampling operator S[tap, h*W + w, n] (4 nonzeros per column).
    Columns n >= n_points are zero padding."""
    yy, xx = _build_sampling_grid(n_points, H, W)            # (N, 3, 3)
    yy = yy.reshape(n_points, _N_TAPS).T                     # (9, N), tap = ki*3 + kj
    xx = xx.reshape(n_points, _N_TAPS).T

    y0 = np.floor(yy)
    x0 = np.floor(xx)
    wy1 = yy - y0
    wx1 = xx - x0
    wy0 = 1.0 - wy1
    wx0 = 1.0 - wx1
    y0i = np.clip(y0, 0, H - 1).astype(np.int64)
    y1i = np.clip(y0 + 1.0, 0, H - 1).astype(np.int64)
    x0i = x0.astype(np.int64) % W
    x1i = (x0.astype(np.int64) + 1) % W                      # longitude wrap-around

    tap_idx = np.broadcast_to(np.arange(_N_TAPS)[:, None], (_N_TAPS, n_points))
    pnt_idx = np.broadcast_to(np.arange(n_points)[None, :], (_N_TAPS, n_points))

    s = np.zeros((_N_TAPS, H * W, n_pad), dtype=np.float32)
    for yi, xi, wgt in ((y0i, x0i, wy0 * wx0), (y0i, x1i, wy0 * wx1),
                        (y1i, x0i, wy1 * wx0), (y1i, x1i, wy1 * wx1)):
        np.add.at(s, (tap_idx, yi * W + xi, pnt_idx), wgt.astype(np.float32))
    return s


# ---------------------------------------------------------------------------
# encoder_v3 forward
# ---------------------------------------------------------------------------
def encoder_v3_forward(x, weight, bias, *, dggrid_level=3, p=0.0):
    B, Cin, H, W = x.shape
    Cout = weight.shape[0]
    HW = H * W
    maxij = 2 ** dggrid_level
    n_points = 10 * maxij * maxij

    chunk = _pick_chunk(n_points)
    n_pad = chunk * (-(-n_points // chunk))                  # pad (never assert) point axis

    # Dropout: module default p=0 -> nn.Identity.
    # TODO(synk): training-mode dropout for p > eps not implemented (eval semantics == identity).
    out = x

    # Static bilinear-gather operator -> flat, MXU-friendly dense matrix (bf16 for the MXU).
    s_np = _build_sampling_matrix(n_points, H, W, n_pad)                      # (9, HW, Npad)
    s_flat = jnp.asarray(s_np.reshape(_N_TAPS * HW, n_pad)).astype(jnp.bfloat16)

    # Pre-contract the conv weights with the input (grid-invariant, tiny XLA einsum):
    #   WX[b, co, tap, hw] = sum_ci W[tap, co, ci] * x[b, ci, hw]
    x_flat = out.reshape(B, Cin, HW)                                          # f32
    w_taps = jnp.transpose(weight, (2, 3, 0, 1)).reshape(_N_TAPS, Cout, Cin)  # tap-major
    wx = jnp.einsum('toc,bch->both', w_taps, x_flat)                          # (B, Cout, 9, HW) f32
    wx = wx.reshape(B * Cout, _N_TAPS * HW).astype(jnp.bfloat16)

    bias_tile = jnp.tile(bias.astype(jnp.float32).reshape(1, Cout),
                         (B, 1)).reshape(B * Cout, 1)

    y = sphereconv_icopoint(wx, s_flat, bias_tile, chunk=chunk)               # (B*Cout, Npad) f32
    y = y[:, :n_points].reshape(B, Cout, n_points)                            # drop pad points

    # == model(out).squeeze(-1) : (B, Cout, N), then
    # rearrange 'b c (q h w) -> (b q) c h w', q=10, h=w=maxij
    # (kept in XLA: at level 3 maxij^2 = 64 < 128 lanes, so folding it into the out_spec
    #  would force masked stores; worth doing in the BlockSpec only for level >= 4.)
    y = y.reshape(B, Cout, 10, maxij, maxij)
    y = jnp.transpose(y, (0, 2, 1, 3, 4)).reshape(B * 10, Cout, maxij, maxij)
    return y


if __name__ == "__main__":
    key = jax.random.PRNGKey(0)
    k_x, k_w, k_b = jax.random.split(key, 3)

    B, Cin, Cout = 2, 4, 8
    H, W = 16, 32                 # small equirectangular input (NCHW)
    dggrid_level = 3              # maxij = 8, N_points = 10*8*8 = 640 -> chunk 384, 2 steps

    x = jax.random.normal(k_x, (B, Cin, H, W), dtype=jnp.float32)

    # Deterministic Conv2d-style init (kaiming-uniform bound = 1/sqrt(fan_in)).
    fan_in = Cin * 3 * 3
    bound = 1.0 / math.sqrt(fan_in)
    weight = jax.random.uniform(k_w, (Cout, Cin, 3, 3), dtype=jnp.float32,
                                minval=-bound, maxval=bound)
    bias = jax.random.uniform(k_b, (Cout,), dtype=jnp.float32,
                              minval=-bound, maxval=bound)

    out = encoder_v3_forward(x, weight, bias, dggrid_level=dggrid_level, p=0.0)
    out = jax.block_until_ready(out)

    expected = (B * 10, Cout, 2 ** dggrid_level, 2 ** dggrid_level)
    assert out.shape == expected, (out.shape, expected)
    assert out.dtype == jnp.float32
    assert bool(jnp.all(jnp.isfinite(out)))
    print("KERNEL_OK")
</pallas_src>

<mosaic_0001>
module attributes {stable_mosaic.version = 11 : i64} {
  func.func @_fused_sphereconv_kernel(%arg0: i32, %arg1: memref<16x4608xbf16, #tpu.memory_space<vmem>>, %arg2: memref<4608x384xbf16, #tpu.memory_space<vmem>>, %arg3: memref<16x1xf32, #tpu.memory_space<vmem>>, %arg4: memref<16x384xf32, #tpu.memory_space<vmem>>) attributes {dimension_semantics = [#tpu.dimension_semantics<parallel>], iteration_bounds = array<i64: 2>, scalar_prefetch = 0 : i64, scratch_operands = 0 : i64, tpu.core_type = #tpu.core_type<tc>, window_params = [{pipeline_mode = #tpu.pipeline_mode<synchronous>, transform_indices = @transform_0, window_bounds = array<i64: 16, 4608>}, {transform_indices = @transform_1, window_bounds = array<i64: 4608, 384>}, {pipeline_mode = #tpu.pipeline_mode<synchronous>, transform_indices = @transform_2, window_bounds = array<i64: 16, 1>}, {transform_indices = @transform_3, window_bounds = array<i64: 16, 384>}]} {
    %c0 = arith.constant 0 : index
    %c0_0 = arith.constant 0 : index
    %0 = vector.load %arg1[%c0, %c0_0] : memref<16x4608xbf16, #tpu.memory_space<vmem>>, vector<16x4608xbf16>
    %c0_1 = arith.constant 0 : index
    %c0_2 = arith.constant 0 : index
    %1 = vector.load %arg2[%c0_1, %c0_2] : memref<4608x384xbf16, #tpu.memory_space<vmem>>, vector<4608x384xbf16>
    %cst = arith.constant dense<0.000000e+00> : vector<16x384xf32>
    %2 = tpu.matmul %0, %1, %cst {dimension_numbers = #tpu.dot_dimension_numbers<[1], [0], [0], [1], [0, 0, 1, 1], [], []>} : vector<16x4608xbf16>, vector<4608x384xbf16>, vector<16x384xf32> -> vector<16x384xf32>
    %c0_3 = arith.constant 0 : index
    %c0_4 = arith.constant 0 : index
    %3 = vector.load %arg3[%c0_3, %c0_4] : memref<16x1xf32, #tpu.memory_space<vmem>>, vector<16x1xf32>
    %4 = vector.broadcast %3 : vector<16x1xf32> to vector<16x384xf32>
    %5 = arith.addf %2, %4 : vector<16x384xf32>
    %c0_5 = arith.constant 0 : index
    %c0_6 = arith.constant 0 : index
    %6 = vector.load %arg4[%c0_5, %c0_6] : memref<16x384xf32, #tpu.memory_space<vmem>>, vector<16x384xf32>
    tpu.vector_store %arg4[%c0_5, %c0_6], %5 {strides = array<i32>} : memref<16x384xf32, #tpu.memory_space<vmem>>, vector<16x384xf32>,
    return
  }
  func.func @transform_0(%arg0: i32) -> (i32, i32) {
    %c0_i32 = arith.constant 0 : i32
    %c0_i32_0 = arith.constant 0 : i32
    %c0_i32_1 = arith.constant 0 : i32
    return %c0_i32, %c0_i32_0 : i32, i32
  }
  func.func @transform_1(%arg0: i32) -> (i32, i32) {
    %c0_i32 = arith.constant 0 : i32
    %c0_i32_0 = arith.constant 0 : i32
    return %c0_i32, %arg0 : i32, i32
  }
  func.func @transform_2(%arg0: i32) -> (i32, i32) {
    %c0_i32 = arith.constant 0 : i32
    %c0_i32_0 = arith.constant 0 : i32
    %c0_i32_1 = arith.constant 0 : i32
    return %c0_i32, %c0_i32_0 : i32, i32
  }
  func.func @transform_3(%arg0: i32) -> (i32, i32) {
    %c0_i32 = arith.constant 0 : i32
    %c0_i32_0 = arith.constant 0 : i32
    return %c0_i32, %arg0 : i32, i32
  }
}

</mosaic_0001>

<bundles_post_ra>
// kernel: tpu_custom_call.1
= control target key start
LH: loop header
LB: loop body
LE: loop exit
PB: predicated region body
PF: predicated region fallthrough
CT: control target
= control target key end

     0   :  { %8 = vsyncpa [#allocation3], 0  ;;  %s11846_s0 = inlined_call_operand.hbm [shape: bf16[16,4608], index: 0, kind: input, shape index: {}]   ;;  %s11847_s1 = inlined_call_operand.hbm [shape: bf16[4608,768], index: 1, kind: input, shape index: {}]   ;;  %s11848_s2 = inlined_call_operand.vmem [shape: f32[16,1], index: 2, kind: input, shape index: {}]   ;;  %s11849_s3 = inlined_call_operand.hbm [shape: f32[16,768], index: 3, kind: output, shape index: {}]  }
   0x1   :  { %9 = vsyncpa [#allocation6], 0 }
   0x2   :  { %11 = vsyncpa [#allocation6 + $0x1], 0 }
   0x3   :  { %12 = vsyncpa [#allocation4], 0 }
   0x4   :  { %14 = vsyncpa [#allocation4 + $0x1], 0  ;;  %s10655_s12 = smov 0   ;;  %s10657_s13 = smov 0  }
   0x5   :  { %s10659_s14 = smov 0   ;;  %s10661_s15 = smov 0  }
   0x6 LB: > { %s10676_s16 = sadd.s32 4294967295, %s10621_s15   ;;  %s7812_s17 = sadd.s32 4294967294, %s10621_s15   ;;  %s10621_s15 = sphi %s10661_s15, %s11873_s15   ;;  %s10617_s14 = sphi %s10659_s14, %s11872_s14   ;;  %s10613_s13 = sphi %s10657_s13, %s11871_s13   ;;  %s10609_s12 = sphi %s10655_s12, %s11870_s12  }
   0x7   : > { %s10680_s18 = sadd.s32 1, %s10621_s15   ;;  %s48_s19 = sadd.s32 1, %s10617_s14 }
   0x8   : > { %s45_s20 = ssub.s32 %s10621_s15, %s10680_s18  ;;  %p55_p0 = scmp.ne.s32.totalorder %s10617_s14, %s10613_s13 }
   0x9   : > { %p46_p1 = scmp.eq.s32.totalorder %s45_s20, 0  ;;  %p56_p2 = scmp.eq.s32.totalorder %s10621_s15, 0 }
   0xa   : > { %p61_p3 = scmp.ne.s32.totalorder %s10613_s13, %s10609_s12  ;;  %p11850_p4 = scmp.eq.s32.totalorder %s10676_s16, 0 }
   0xb   : > { %s10692_s21 = scalar_select %p46_p1, %s10617_s14, %s48_s19  }
   0xc   : > { %p10694_p5 = por %p56_p2, %p55_p0  ;;  %p10700_p6 = por %p11850_p4, %p61_p3 }
   0xd   : > { %p106_p7 = scmp.eq.s32.totalorder %s10676_s16, 1  ;;  %p112_p8 = scmp.eq.s32.totalorder %s7812_s17, 1 }
   0xe   : > { %s11854_s22 = scalar_select %p10694_p5, 1, 0 }
   0xf   : > { %s11855_s23 = scalar_select %p10700_p6, 1, 0 }
  0x10   : > { %p7813_p9 = scmp.ge.s32.totalorder %s10621_s15, 1  ;;  %p119_p10 = scmp.lt.s32.totalorder %s10621_s15, 3 }
  0x11   : > { %p10707_p11 = por %p106_p7, %p55_p0  ;;  %p10711_p12 = por %p112_p8, %p61_p3 }
  0x12   : > { %p10715_p13 = pnand %p7813_p9, %p119_p10  ;;  %s10623_s27 = smov [#allocation2]  }
  0x13   : > { %s11856_s24 = scalar_select %p10707_p11, 1, 0 }
  0x14   : > { %s11857_s25 = scalar_select %p10711_p12, 1, 0 }
  0x15   : > { %s11858_s26 = scalar_select %p10715_p13, 1, 0 }
  0x16   : > { %p9203_p1 = pneg %p10715_p13  ;;  %s131_s28 = sshll.u32 %s10623_s27, 4  ;;  %s132_s28 = int_to_ptr.vmem [resolvable:$true] %s131_s28 }
  0x17   : > { %s148_s30 = sand.u32 1, %s10617_s14   ;;  %s10493_s6 = scalar_lea.hbm %s11846_s0, 4608 }
  0x18   : > { %p10723_p2 = pnand %p9203_p1, %p11850_p4  ;;  %p10494_p7 = scmp.ne.s32.totalorder %s11846_s0, %s10493_s6 }
  0x19   : > { %p10500_p1 = scmp.lt.u32.totalorder %s10493_s6, %s11846_s0 }
  0x1a   : > { %p10495_p8 = pneg %p10723_p2 }
  0x1c   : > { %p10496_p9 = pnand %p10495_p8, %p10494_p7 }
  0x1e   : > { %p10497_p10 = pneg %p10496_p9 }
  0x20   : > { %p10502_p4 = pnand %p10500_p1, %p10497_p10 }
  0x22   : > { %10505 = shalt.err (!%p10502_p4)
}
  0x23   : > { %s10506_s11 = scalar_lea.vmem %s132_s28, 4608  ;;  %p10514_p11 = scmp.lt.s32.totalorder %s132_s28, %s132_s28 }
  0x24   : > { %p10507_p0 = scmp.ne.s32.totalorder %s132_s28, %s10506_s11  ;;  %p10515_p6 = scmp.lt.s32.totalorder %s10506_s11, %s10506_s11 }
  0x26   : > { %p10509_p3 = pnand %p10507_p0, %p10495_p8  ;;  %p10516_p13 = por %p10515_p6, %p10514_p11 }
  0x28   : > { %p10510_p12 = pneg %p10509_p3 }
  0x2a   : > { %p10517_p5 = pnand %p10516_p13, %p10510_p12 }
  0x2c   : > { %10520 = shalt.err (!%p10517_p5)
}
  0x2d   : > { %s10624_s17 = smov 2304   ;;  %s10625_s19 = smov 144  }
  0x2e   : > { %9206 = dma.hbm_to_vmem [thread:$0]  (!%p10723_p2), %s11846_s0, 4608, %s132_s28, [#allocation3], %s10624_s17, %s10624_s17, %s10625_s19  }
  0x2f   : > { %p11860_p4 = scmp.ne.s32.totalorder %s11854_s22, 0  ;;  %p11861_p7 = scmp.lt.s32.totalorder %s10621_s15, 2 }
  0x30   : > { %s9192_s5 = smul.u32 6912, %s148_s30  ;;  %s10762_s29 = scalar_lea.sflag [#allocation6], %s148_s30 }
  0x31   : > { %p10750_p0 = pnand %p11861_p7, %p11860_p4  ;;  %s8722_s6 = smul.u32 192, %s10621_s15 }
  0x32   : > { %s152_s28 = scalar_lea.vmem [#allocation5], %s9192_s5  ;;  %s10526_s19 = scalar_lea.hbm %s11847_s1, 221184 }
  0x33   : > { %s10758_s9 = scalar_lea.hbm %s11847_s1, %s8722_s6  ;;  %s159_s22 = sshll.u32 %s152_s28, 4  ;;  %s10760_s22 = int_to_ptr.vmem [resolvable:$true] %s159_s22 }
  0x34   : > { %s10521_s10 = scalar_lea.hbm %s10758_s9, 110592  ;;  %p10523_p6 = pneg %p10750_p0 }
  0x35   : > { %p10522_p5 = scmp.ne.s32.totalorder %s10758_s9, %s10521_s10  ;;  %p10527_p13 = scmp.lt.u32.totalorder %s10758_s9, %s11847_s1 }
  0x36   : > { %p10528_p2 = scmp.lt.u32.totalorder %s10526_s19, %s10521_s10  ;;  %p10530_p8 = scmp.lt.u32.totalorder %s10521_s10, %s10758_s9 }
  0x37   : > { %p10524_p11 = pnand %p10523_p6, %p10522_p5 }
  0x38   : > { %p10529_p3 = por %p10528_p2, %p10527_p13 }
  0x39   : > { %p10525_p12 = pneg %p10524_p11 }
  0x3a   : > { %p10531_p9 = por %p10530_p8, %p10529_p3 }
  0x3c   : > { %p10532_p10 = pnand %p10531_p9, %p10525_p12 }
  0x3e   : > { %10535 = shalt.err (!%p10532_p10)
}
  0x3f   : > { %s10536_s30 = scalar_lea.vmem %s10760_s22, 110592  ;;  %s10626_s5 = smov [#allocation5]  }
  0x40   : > { %p10537_p1 = scmp.ne.s32.totalorder %s10760_s22, %s10536_s30  ;;  %s10541_s6 = sshll.u32 %s10626_s5, 4  ;;  %s10542_s6 = int_to_ptr.vmem [resolvable:$false] %s10541_s6 }
  0x41   : > { %s10543_s7 = scalar_lea.vmem %s10542_s6, 221184  ;;  %p10544_p5 = scmp.lt.s32.totalorder %s10760_s22, %s10542_s6 }
  0x42   : > { %p10539_p4 = pnand %p10537_p1, %p10523_p6  ;;  %p10545_p11 = scmp.lt.s32.totalorder %s10543_s7, %s10536_s30 }
  0x44   : > { %p10540_p7 = pneg %p10539_p4  ;;  %p10546_p13 = por %p10545_p11, %p10544_p5 }
  0x46   : > { %p10547_p2 = pnand %p10546_p13, %p10540_p7 }
  0x48   : > { %10550 = shalt.err (!%p10547_p2)
}
  0x49   : > { %s10627_s8 = smov 384   ;;  %s10628_s28 = smov 192  }
  0x4a   : > { %s10629_s10 = smov 12   ;;  %p11863_p6 = scmp.ne.s32.totalorder %s11858_s26, 0 }
  0x4b   : > { %9210 = dma.hbm_to_vmem [thread:$0]  (!%p10750_p0), %s10758_s9, 110592, %s10760_s22, %s10762_s29, %s10627_s8, %s10628_s28, %s10629_s10  }
  0x4c   : > { %171 = sbr.rel (%p11863_p6) target bundleno = 1220 (0x4c4), region = 32  ;;  %p11864_p12 = scmp.eq.s32.totalorder (!%p11863_p6), %s10676_s16, 0 }
  0x53   : > { %10596 = dma.done.wait (%p11864_p12), [#allocation3], 4608   ;;  %p11865_p3 = pmov %p11864_p12 }
  0x54   : > { %s10797_s11 = sand.u32 1, %s10613_s13   ;;  %p11866_p0 = scmp.ne.s32.totalorder %s11855_s23, 0 }
  0x55   : > { %10598 = vsyncadd (%p11865_p3), [#allocation3], 4294962688  ;;  %s9193_s17 = smul.u32 6912, %s10797_s11  ;;  %s178_s19 = scalar_lea.sflag [#allocation6], %s10797_s11 }
  0x57   : > { %s10801_s20 = scalar_lea.vmem [#allocation5], %s9193_s17 }
  0x58   : > { %10600 = dma.done.wait (%p11866_p0), %s178_s19, 110592  }
  0x59   : > { %10602 = vsyncadd (%p11866_p0), %s178_s19, 4294856704  ;;  %v9262_v0 = vld [vmem:[%s10801_s20 + $0x4] ss:$12 sps:$4 sm:$0xff]   ;;  %v9266_v2 = vld [vmem:[%s10801_s20] ss:$12 sps:$4 sm:$0xff]   ;;  %s9194_s22 = smul.u32 48, %s10797_s11 }
  0x5a   : > { %v9264_v1 = vld [vmem:[%s10801_s20 + $0x604] ss:$12 sps:$4 sm:$0xff]   ;;  %6195 = vmatprep.subr.bf16.mxu1 %v9262_v0  ;;  %v9267_v3 = vld [vmem:[%s10801_s20 + $0x600] ss:$12 sps:$4 sm:$0xff]   ;;  %v9268_v4 = vld [vmem:[%s10801_s20 + $0x1c] ss:$12 sps:$4 sm:$0xff]  }
  0x5b   : > { %6367 = vmatprep.subr.bf16.mxu0 %v9264_v1  ;;  %6196 = vmatpush1.bf16.msra.mxu1 %v9266_v2  ;;  %v9270_v5 = vld [vmem:[%s10801_s20 + $0x61c] ss:$12 sps:$4 sm:$0xff]   ;;  %v9272_v6 = vld [vmem:[%s10801_s20 + $0x18] ss:$12 sps:$4 sm:$0xff]   ;;  %v9274_v8 = vld [vmem:[%s10801_s20 + $0x34] ss:$12 sps:$4 sm:$0xff]  }
  0x5c   : > { %6368 = vmatpush1.bf16.msra.mxu0 %v9267_v3  ;;  %6197 = vmatprep.subr.bf16.mxu1 %v9268_v4  ;;  %v9273_v7 = vld [vmem:[%s10801_s20 + $0x618] ss:$12 sps:$4 sm:$0xff]   ;;  %v9276_v9 = vld [vmem:[%s10801_s20 + $0x634] ss:$12 sps:$4 sm:$0xff]   ;;  %v9278_v10 = vld [vmem:[%s10801_s20 + $0x30] ss:$12 sps:$4 sm:$0xff]  }
  0x5d   : > { %6369 = vmatprep.subr.bf16.mxu0 %v9270_v5  ;;  %v9279_v11 = vld [vmem:[%s10801_s20 + $0x630] ss:$12 sps:$4 sm:$0xff]   ;;  %v9280_v12 = vld [vmem:[%s10801_s20 + $0x4c] ss:$12 sps:$4 sm:$0xff]   ;;  %v9284_v14 = vld [vmem:[%s10801_s20 + $0x48] ss:$12 sps:$4 sm:$0xff]  }
  0x5e   : > { %v9282_v13 = vld [vmem:[%s10801_s20 + $0x64c] ss:$12 sps:$4 sm:$0xff]   ;;  %v9285_v15 = vld [vmem:[%s10801_s20 + $0x648] ss:$12 sps:$4 sm:$0xff]   ;;  %v9286_v16 = vld [vmem:[%s10801_s20 + $0x64] ss:$12 sps:$4 sm:$0xff]  }
  0x5f   : > { %6198 = vmatpush1.bf16.msra.mxu1 %v9272_v6  ;;  %v9288_v17 = vld [vmem:[%s10801_s20 + $0x664] ss:$12 sps:$4 sm:$0xff]   ;;  %v9290_v18 = vld [vmem:[%s10801_s20 + $0x60] ss:$12 sps:$4 sm:$0xff]   ;;  %v9292_v20 = vld [vmem:[%s10801_s20 + $0x7c] ss:$12 sps:$4 sm:$0xff]  }
  0x60   : > { %6370 = vmatpush1.bf16.msra.mxu0 %v9273_v7  ;;  %6199 = vmatprep.subr.bf16.mxu1 %v9274_v8  ;;  %v9291_v19 = vld [vmem:[%s10801_s20 + $0x660] ss:$12 sps:$4 sm:$0xff]   ;;  %v9294_v21 = vld [vmem:[%s10801_s20 + $0x67c] ss:$12 sps:$4 sm:$0xff]   ;;  %v9296_v22 = vld [vmem:[%s10801_s20 + $0x78] ss:$12 sps:$4 sm:$0xff]  }
  0x61   : > { %6371 = vmatprep.subr.bf16.mxu0 %v9276_v9  ;;  %v9297_v23 = vld [vmem:[%s10801_s20 + $0x678] ss:$12 sps:$4 sm:$0xff]   ;;  %v9298_v24 = vld [vmem:[%s10801_s20 + $0x94] ss:$12 sps:$4 sm:$0xff]   ;;  %v9302_v26 = vld [vmem:[%s10801_s20 + $0x90] ss:$12 sps:$4 sm:$0xff]  }
  0x62   : > { %v9300_v25 = vld [vmem:[%s10801_s20 + $0x694] ss:$12 sps:$4 sm:$0xff]   ;;  %v9303_v27 = vld [vmem:[%s10801_s20 + $0x690] ss:$12 sps:$4 sm:$0xff]   ;;  %v9304_v28 = vld [vmem:[%s10801_s20 + $0xac] ss:$12 sps:$4 sm:$0xff]  }
  0x63   : > { %6200 = vmatpush1.bf16.msra.mxu1 %v9278_v10  ;;  %v9306_v29 = vld [vmem:[%s10801_s20 + $0x6ac] ss:$12 sps:$4 sm:$0xff]   ;;  %v9308_v30 = vld [vmem:[%s10801_s20 + $0xa8] ss:$12 sps:$4 sm:$0xff]   ;;  %v9310_v32 = vld [vmem:[%s10801_s20 + $0xc4] ss:$12 sps:$4 sm:$0xff]  }
  0x64   : > { %6372 = vmatpush1.bf16.msra.mxu0 %v9279_v11  ;;  %6201 = vmatprep.subr.bf16.mxu1 %v9280_v12  ;;  %v9309_v31 = vld [vmem:[%s10801_s20 + $0x6a8] ss:$12 sps:$4 sm:$0xff]   ;;  %v9312_v33 = vld [vmem:[%s10801_s20 + $0x6c4] ss:$12 sps:$4 sm:$0xff]   ;;  %v9314_v34 = vld [vmem:[%s10801_s20 + $0xc0] ss:$12 sps:$4 sm:$0xff]  }
  0x65   : > { %6373 = vmatprep.subr.bf16.mxu0 %v9282_v13  ;;  %v9315_v35 = vld [vmem:[%s10801_s20 + $0x6c0] ss:$12 sps:$4 sm:$0xff]   ;;  %v9316_v36 = vld [vmem:[%s10801_s20 + $0xdc] ss:$12 sps:$4 sm:$0xff]   ;;  %v9320_v38 = vld [vmem:[%s10801_s20 + $0xd8] ss:$12 sps:$4 sm:$0xff]  }
  0x66   : > { %v9318_v37 = vld [vmem:[%s10801_s20 + $0x6dc] ss:$12 sps:$4 sm:$0xff]   ;;  %v9321_v39 = vld [vmem:[%s10801_s20 + $0x6d8] ss:$12 sps:$4 sm:$0xff]   ;;  %v9322_v40 = vld [vmem:[%s10801_s20 + $0xf4] ss:$12 sps:$4 sm:$0xff]  }
  0x67   : > { %6202 = vmatpush1.bf16.msra.mxu1 %v9284_v14  ;;  %v9324_v41 = vld [vmem:[%s10801_s20 + $0x6f4] ss:$12 sps:$4 sm:$0xff]   ;;  %v9326_v42 = vld [vmem:[%s10801_s20 + $0xf0] ss:$12 sps:$4 sm:$0xff]   ;;  %v9328_v44 = vld [vmem:[%s10801_s20 + $0x10c] ss:$12 sps:$4 sm:$0xff]  }
  0x68   : > { %6374 = vmatpush1.bf16.msra.mxu0 %v9285_v15  ;;  %6203 = vmatprep.subr.bf16.mxu1 %v9286_v16  ;;  %v9327_v43 = vld [vmem:[%s10801_s20 + $0x6f0] ss:$12 sps:$4 sm:$0xff]   ;;  %v9330_v45 = vld [vmem:[%s10801_s20 + $0x70c] ss:$12 sps:$4 sm:$0xff]   ;;  %v9332_v46 = vld [vmem:[%s10801_s20 + $0x108] ss:$12 sps:$4 sm:$0xff]  }
  0x69   : > { %6375 = vmatprep.subr.bf16.mxu0 %v9288_v17  ;;  %v9333_v47 = vld [vmem:[%s10801_s20 + $0x708] ss:$12 sps:$4 sm:$0xff]   ;;  %v9334_v49 = vld [vmem:[%s10801_s20 + $0x124] ss:$12 sps:$4 sm:$0xff]   ;;  %v9338_v52 = vld [vmem:[%s10801_s20 + $0x120] ss:$12 sps:$4 sm:$0xff]  }
  0x6a   : > { %v9360_v48 = vld [vmem:[#allocation2 + $0x4] ss:$144 sps:$4 sm:$0xff]   ;;  %v9339_v53 = vld [vmem:[%s10801_s20 + $0x720] ss:$12 sps:$4 sm:$0xff]   ;;  %v9340_v54 = vld [vmem:[%s10801_s20 + $0x13c] ss:$12 sps:$4 sm:$0xff]  }
  0x6b   : > { %6204 = vmatpush1.bf16.msra.mxu1 %v9290_v18  ;;  %v9336_v50 = vld [vmem:[%s10801_s20 + $0x724] ss:$12 sps:$4 sm:$0xff]   ;;  %6227 = vmatprep.mubr.bf16.mxu1 %v9360_v48  ;;  %v9342_v55 = vld [vmem:[%s10801_s20 + $0x73c] ss:$12 sps:$4 sm:$0xff]   ;;  %v9346_v58 = vld [vmem:[%s10801_s20 + $0x154] ss:$12 sps:$4 sm:$0xff]  }
  0x6c   : > { %6376 = vmatpush1.bf16.msra.mxu0 %v9291_v19  ;;  %6205 = vmatprep.subr.bf16.mxu1 %v9292_v20  ;;  %v9366_v51 = vld [vmem:[#allocation2 + $0x24] ss:$144 sps:$4 sm:$0xff]   ;;  %v9350_v60 = vld [vmem:[%s10801_s20 + $0x150] ss:$12 sps:$4 sm:$0xff]   ;;  %v9352_v62 = vld [vmem:[%s10801_s20 + $0x16c] ss:$12 sps:$4 sm:$0xff]  }
  0x6d   : > { %6377 = vmatprep.subr.bf16.mxu0 %v9294_v21  ;;  %6399 = vmatprep.mubr.bf16.mxu0 %v9366_v51  ;;  %v9344_v56 = vld [vmem:[%s10801_s20 + $0x138] ss:$12 sps:$4 sm:$0xff]   ;;  %v9348_v59 = vld [vmem:[%s10801_s20 + $0x754] ss:$12 sps:$4 sm:$0xff]   ;;  %v9351_v61 = vld [vmem:[%s10801_s20 + $0x750] ss:$12 sps:$4 sm:$0xff]  }
  0x6e   : > { %v9345_v57 = vld [vmem:[%s10801_s20 + $0x738] ss:$12 sps:$4 sm:$0xff]   ;;  %v9356_v0 = vld [vmem:[%s10801_s20 + $0x168] ss:$12 sps:$4 sm:$0xff]   ;;  %v9358_v4 = vld [vmem:[#allocation2] ss:$144 sps:$4 sm:$0xff]  }
  0x6f   : > { %6206 = vmatpush1.bf16.msra.mxu1 %v9296_v22  ;;  %v9354_v63 = vld [vmem:[%s10801_s20 + $0x76c] ss:$12 sps:$4 sm:$0xff]   ;;  %v9357_v1 = vld [vmem:[%s10801_s20 + $0x768] ss:$12 sps:$4 sm:$0xff]   ;;  %v9363_v2 = vld [vmem:[%s10801_s20 + $0x184] ss:$12 sps:$4 sm:$0xff]  }
  0x70   : > { %6378 = vmatpush1.bf16.msra.mxu0 %v9297_v23  ;;  %6207 = vmatprep.subr.bf16.mxu1 %v9298_v24  ;;  %v9369_v3 = vld [vmem:[%s10801_s20 + $0x784] ss:$12 sps:$4 sm:$0xff]   ;;  %v9361_v5 = vld [vmem:[%s10801_s20 + $0x180] ss:$12 sps:$4 sm:$0xff]   ;;  %v9372_v8 = vld [vmem:[%s10801_s20 + $0x19c] ss:$12 sps:$4 sm:$0xff]  }
  0x71   : > { %6379 = vmatprep.subr.bf16.mxu0 %v9300_v25  ;;  %v9364_v6 = vld [vmem:[#allocation2 + $0x20] ss:$144 sps:$4 sm:$0xff]   ;;  %v9375_v9 = vld [vmem:[%s10801_s20 + $0x79c] ss:$12 sps:$4 sm:$0xff]   ;;  %v9370_v10 = vld [vmem:[%s10801_s20 + $0x198] ss:$12 sps:$4 sm:$0xff]  }
  0x72   : > { %v9367_v7 = vld [vmem:[%s10801_s20 + $0x780] ss:$12 sps:$4 sm:$0xff]   ;;  %v9373_v11 = vld [vmem:[%s10801_s20 + $0x798] ss:$12 sps:$4 sm:$0xff]   ;;  %v9376_v14 = vld [vmem:[%s10801_s20 + $0x1b0] ss:$12 sps:$4 sm:$0xff]  }
  0x73   : > { %6208 = vmatpush1.bf16.msra.mxu1 %v9302_v26  ;;  %v9378_v12 = vld [vmem:[%s10801_s20 + $0x1b4] ss:$12 sps:$4 sm:$0xff]   ;;  %v9379_v15 = vld [vmem:[%s10801_s20 + $0x7b0] ss:$12 sps:$4 sm:$0xff]   ;;  %v9384_v16 = vld [vmem:[%s10801_s20 + $0x1cc] ss:$12 sps:$4 sm:$0xff]  }
  0x74   : > { %6380 = vmatpush1.bf16.msra.mxu0 %v9303_v27  ;;  %6209 = vmatprep.subr.bf16.mxu1 %v9304_v28  ;;  %v9381_v13 = vld [vmem:[%s10801_s20 + $0x7b4] ss:$12 sps:$4 sm:$0xff]   ;;  %v9387_v17 = vld [vmem:[%s10801_s20 + $0x7cc] ss:$12 sps:$4 sm:$0xff]   ;;  %v9390_v20 = vld [vmem:[%s10801_s20 + $0x1e4] ss:$12 sps:$4 sm:$0xff]  }
  0x75   : > { %6381 = vmatprep.subr.bf16.mxu0 %v9306_v29  ;;  %v9382_v18 = vld [vmem:[%s10801_s20 + $0x1c8] ss:$12 sps:$4 sm:$0xff]   ;;  %v9393_v21 = vld [vmem:[%s10801_s20 + $0x7e4] ss:$12 sps:$4 sm:$0xff]   ;;  %v9388_v22 = vld [vmem:[%s10801_s20 + $0x1e0] ss:$12 sps:$4 sm:$0xff]  }
  0x76   : > { %v9385_v19 = vld [vmem:[%s10801_s20 + $0x7c8] ss:$12 sps:$4 sm:$0xff]   ;;  %v9391_v23 = vld [vmem:[%s10801_s20 + $0x7e0] ss:$12 sps:$4 sm:$0xff]   ;;  %v9394_v26 = vld [vmem:[%s10801_s20 + $0x1f8] ss:$12 sps:$4 sm:$0xff]  }
  0x77   : > { %6210 = vmatpush1.bf16.msra.mxu1 %v9308_v30  ;;  %v9396_v24 = vld [vmem:[%s10801_s20 + $0x1fc] ss:$12 sps:$4 sm:$0xff]   ;;  %v9397_v27 = vld [vmem:[%s10801_s20 + $0x7f8] ss:$12 sps:$4 sm:$0xff]   ;;  %v9402_v28 = vld [vmem:[%s10801_s20 + $0x214] ss:$12 sps:$4 sm:$0xff]  }
  0x78   : > { %6382 = vmatpush1.bf16.msra.mxu0 %v9309_v31  ;;  %6211 = vmatprep.subr.bf16.mxu1 %v9310_v32  ;;  %v9399_v25 = vld [vmem:[%s10801_s20 + $0x7fc] ss:$12 sps:$4 sm:$0xff]   ;;  %v9405_v29 = vld [vmem:[%s10801_s20 + $0x814] ss:$12 sps:$4 sm:$0xff]   ;;  %v9408_v32 = vld [vmem:[%s10801_s20 + $0x22c] ss:$12 sps:$4 sm:$0xff]  }
  0x79   : > { %6383 = vmatprep.subr.bf16.mxu0 %v9312_v33  ;;  %v9400_v30 = vld [vmem:[%s10801_s20 + $0x210] ss:$12 sps:$4 sm:$0xff]   ;;  %v9411_v33 = vld [vmem:[%s10801_s20 + $0x82c] ss:$12 sps:$4 sm:$0xff]   ;;  %s203_s29 = scalar_lea.vmem [#allocation7], %s9194_s22  ;;  %s8723_s30 = smul.u32 384, %s10676_s16 }
  0x7a   : > { %v9403_v31 = vld [vmem:[%s10801_s20 + $0x810] ss:$12 sps:$4 sm:$0xff]   ;;  %v9435_v51 = vld [vmem:[%s10801_s20 + $0x88c] ss:$12 sps:$4 sm:$0xff]   ;;  %s7727_s27 = sshll.u32 %s203_s29, 4  ;;  %s7714_s7 = scalar_lea.sflag [#allocation4], %s10797_s11  ;;  %s11795_s27 = int_to_ptr.vmem [resolvable:$true] %s7727_s27 }
  0x7b   : > { %6212 = vmatpush1.bf16.msra.mxu1 %v9314_v34  ;;  %v9462_v34 = vld [vmem:[#allocation2 + $0xc] ss:$144 sps:$4 sm:$0xff]   ;;  %s11801_s6 = scalar_lea.hbm %s11849_s3, %s8723_s30  ;;  %s10551_s8 = scalar_lea.vmem %s11795_s27, 768 }
  0x7c   : > { %6384 = vmatpush1.bf16.msra.mxu0 %v9315_v35  ;;  %6213 = vmatprep.subr.bf16.mxu1 %v9316_v36  ;;  %v9406_v35 = vld [vmem:[%s10801_s20 + $0x228] ss:$12 sps:$4 sm:$0xff]   ;;  %v9424_v48 = vld [vmem:[%s10801_s20 + $0x270] ss:$12 sps:$4 sm:$0xff]   ;;  %p10552_p8 = scmp.ne.s32.totalorder %s11795_s27, %s10551_s8  ;;  %p11867_p9 = scmp.ne.s32.totalorder %s11856_s24, 0 }
  0x7d   : > { %6385 = vmatprep.subr.bf16.mxu0 %v9318_v37  ;;  %v9409_v36 = vld [vmem:[%s10801_s20 + $0x828] ss:$12 sps:$4 sm:$0xff]   ;;  %v9468_v37 = vld [vmem:[#allocation2 + $0x2c] ss:$144 sps:$4 sm:$0xff]   ;;  %s10631_s28 = smov [#allocation7]  }
  0x7e   : > { %p10553_p10 = pnand %p10552_p8, %p11867_p9  ;;  %s10555_s10 = sshll.u32 %s10631_s28, 4  ;;  %s10556_s10 = int_to_ptr.vmem [resolvable:$false] %s10555_s10 }
  0x7f   : > { %6214 = vmatpush1.bf16.msra.mxu1 %v9320_v38  ;;  %v9414_v38 = vld [vmem:[%s10801_s20 + $0x244] ss:$12 sps:$4 sm:$0xff]   ;;  %s10557_s17 = scalar_lea.vmem %s10556_s10, 1536  ;;  %p10558_p4 = scmp.lt.s32.totalorder %s11795_s27, %s10556_s10 }
  0x80   : > { %6386 = vmatpush1.bf16.msra.mxu0 %v9321_v39  ;;  %6215 = vmatprep.subr.bf16.mxu1 %v9322_v40  ;;  %v9417_v39 = vld [vmem:[%s10801_s20 + $0x844] ss:$12 sps:$4 sm:$0xff]   ;;  %v9412_v40 = vld [vmem:[%s10801_s20 + $0x240] ss:$12 sps:$4 sm:$0xff]   ;;  %p10554_p1 = pneg %p10553_p10  ;;  %p10559_p7 = scmp.lt.s32.totalorder %s10557_s17, %s10551_s8 }
  0x81   : > { %6387 = vmatprep.subr.bf16.mxu0 %v9324_v41  ;;  %v9415_v41 = vld [vmem:[%s10801_s20 + $0x840] ss:$12 sps:$4 sm:$0xff]  }
  0x82   : > { %p10560_p5 = por %p10559_p7, %p10558_p4 }
  0x83   : > { %6216 = vmatpush1.bf16.msra.mxu1 %v9326_v42  ;;  %v9420_v42 = vld [vmem:[%s10801_s20 + $0x25c] ss:$12 sps:$4 sm:$0xff]  }
  0x84   : > { %6388 = vmatpush1.bf16.msra.mxu0 %v9327_v43  ;;  %6217 = vmatprep.subr.bf16.mxu1 %v9328_v44  ;;  %v9423_v43 = vld [vmem:[%s10801_s20 + $0x85c] ss:$12 sps:$4 sm:$0xff]   ;;  %v9418_v44 = vld [vmem:[%s10801_s20 + $0x258] ss:$12 sps:$4 sm:$0xff]   ;;  %p10561_p11 = pnand %p10560_p5, %p10554_p1 }
  0x85   : > { %6389 = vmatprep.subr.bf16.mxu0 %v9330_v45  ;;  %v9421_v45 = vld [vmem:[%s10801_s20 + $0x858] ss:$12 sps:$4 sm:$0xff]  }
  0x87   : > { %6218 = vmatpush1.bf16.msra.mxu1 %v9332_v46  ;;  %v9426_v46 = vld [vmem:[%s10801_s20 + $0x274] ss:$12 sps:$4 sm:$0xff]  }
  0x88   : > { %6390 = vmatpush1.bf16.msra.mxu0 %v9333_v47  ;;  %6219 = vmatprep.subr.bf16.mxu1 %v9334_v49  ;;  %v9429_v47 = vld [vmem:[%s10801_s20 + $0x874] ss:$12 sps:$4 sm:$0xff]   ;;  %v9427_v49 = vld [vmem:[%s10801_s20 + $0x870] ss:$12 sps:$4 sm:$0xff]  }
  0x89   : > { %6391 = vmatprep.subr.bf16.mxu0 %v9336_v50  ;;  %v9432_v50 = vld [vmem:[%s10801_s20 + $0x28c] ss:$12 sps:$4 sm:$0xff]  }
  0x8b   : > { %6220 = vmatpush1.bf16.msra.mxu1 %v9338_v52  ;;  %v9430_v52 = vld [vmem:[%s10801_s20 + $0x288] ss:$12 sps:$4 sm:$0xff]  }
  0x8c   : > { %6392 = vmatpush1.bf16.msra.mxu0 %v9339_v53  ;;  %6221 = vmatprep.subr.bf16.mxu1 %v9340_v54  ;;  %v9433_v53 = vld [vmem:[%s10801_s20 + $0x888] ss:$12 sps:$4 sm:$0xff]   ;;  %v9438_v54 = vld [vmem:[%s10801_s20 + $0x2a4] ss:$12 sps:$4 sm:$0xff]  }
  0x8d   : > { %6393 = vmatprep.subr.bf16.mxu0 %v9342_v55  ;;  %v9441_v55 = vld [vmem:[%s10801_s20 + $0x8a4] ss:$12 sps:$4 sm:$0xff]  }
  0x8f   : > { %6222 = vmatpush1.bf16.msra.mxu1 %v9344_v56  ;;  %v9436_v56 = vld [vmem:[%s10801_s20 + $0x2a0] ss:$12 sps:$4 sm:$0xff]  }
  0x90   : > { %6394 = vmatpush1.bf16.msra.mxu0 %v9345_v57  ;;  %6223 = vmatprep.subr.bf16.mxu1 %v9346_v58  ;;  %v9439_v57 = vld [vmem:[%s10801_s20 + $0x8a0] ss:$12 sps:$4 sm:$0xff]   ;;  %v9444_v58 = vld [vmem:[%s10801_s20 + $0x2bc] ss:$12 sps:$4 sm:$0xff]  }
  0x91   : > { %6395 = vmatprep.subr.bf16.mxu0 %v9348_v59  ;;  %v9447_v59 = vld [vmem:[%s10801_s20 + $0x8bc] ss:$12 sps:$4 sm:$0xff]  }
  0x93   : > { %6224 = vmatpush1.bf16.msra.mxu1 %v9350_v60  ;;  %v9442_v60 = vld [vmem:[%s10801_s20 + $0x2b8] ss:$12 sps:$4 sm:$0xff]  }
  0x94   : > { %6396 = vmatpush1.bf16.msra.mxu0 %v9351_v61  ;;  %6225 = vmatprep.subr.bf16.mxu1 %v9352_v62  ;;  %v9445_v61 = vld [vmem:[%s10801_s20 + $0x8b8] ss:$12 sps:$4 sm:$0xff]   ;;  %v9450_v62 = vld [vmem:[%s10801_s20 + $0x2d4] ss:$12 sps:$4 sm:$0xff]  }
  0x95   : > { %6397 = vmatprep.subr.bf16.mxu0 %v9354_v63  ;;  %v9453_v63 = vld [vmem:[%s10801_s20 + $0x8d4] ss:$12 sps:$4 sm:$0xff]  }
  0x97   : > { %6226 = vmatpush1.bf16.msra.mxu1 %v9356_v0  ;;  %v9448_v0 = vld [vmem:[%s10801_s20 + $0x2d0] ss:$12 sps:$4 sm:$0xff]  }
  0x98   : > { %6398 = vmatpush1.bf16.msra.mxu0 %v9357_v1  ;;  %6238 = vmatprep.subr.bf16.mxu1 %v9363_v2  ;;  %v9451_v1 = vld [vmem:[%s10801_s20 + $0x8d0] ss:$12 sps:$4 sm:$0xff]   ;;  %v9456_v2 = vld [vmem:[%s10801_s20 + $0x2ec] ss:$12 sps:$4 sm:$0xff]  }
  0x99   : > { %6410 = vmatprep.subr.bf16.mxu0 %v9369_v3  ;;  %v9459_v3 = vld [vmem:[%s10801_s20 + $0x8ec] ss:$12 sps:$4 sm:$0xff]  }
  0x9a   : > { %6228 = vmatmul.mubr.bf16.vlgmr.msra.gmra.mrb[0].mxu1 %v9358_v4  ;;  %v9454_v4 = vld [vmem:[%s10801_s20 + $0x2e8] ss:$12 sps:$4 sm:$0xff]  }
  0x9b   : > { %6400 = vmatmul.mubr.bf16.vlgmr.msra.gmra.mrb[0].mxu0 %v9364_v6  ;;  %6239 = vmatpush1.bf16.msra.mxu1 %v9361_v5  ;;  %v9457_v5 = vld [vmem:[%s10801_s20 + $0x8e8] ss:$12 sps:$4 sm:$0xff]   ;;  %v9465_v6 = vld [vmem:[%s10801_s20 + $0x304] ss:$12 sps:$4 sm:$0xff]  }
  0x9c   : > { %6411 = vmatpush1.bf16.msra.mxu0 %v9367_v7  ;;  %6240 = vmatprep.subr.bf16.mxu1 %v9372_v8  ;;  %v9471_v7 = vld [vmem:[%s10801_s20 + $0x904] ss:$12 sps:$4 sm:$0xff]   ;;  %v9460_v8 = vld [vmem:[#allocation2 + $0x8] ss:$144 sps:$4 sm:$0xff]  }
  0x9d   : > { %6412 = vmatprep.subr.bf16.mxu0 %v9375_v9  ;;  %6270 = vmatprep.mubr.bf16.mxu1 %v9462_v34  ;;  %v9463_v9 = vld [vmem:[%s10801_s20 + $0x300] ss:$12 sps:$4 sm:$0xff]  }
  0x9e   : > { %6442 = vmatprep.mubr.bf16.mxu0 %v9468_v37  ;;  %v9504_v34 = vld [vmem:[%s10801_s20 + $0x394] ss:$12 sps:$4 sm:$0xff]   ;;  %v9505_v37 = vld [vmem:[%s10801_s20 + $0x990] ss:$12 sps:$4 sm:$0xff]  }
  0x9f   : > { %6241 = vmatpush1.bf16.msra.mxu1 %v9370_v10  ;;  %v9466_v10 = vld [vmem:[#allocation2 + $0x28] ss:$144 sps:$4 sm:$0xff]  }
  0xa0   : > { %6413 = vmatpush1.bf16.msra.mxu0 %v9373_v11  ;;  %6242 = vmatprep.subr.bf16.mxu1 %v9378_v12  ;;  %v9469_v11 = vld [vmem:[%s10801_s20 + $0x900] ss:$12 sps:$4 sm:$0xff]   ;;  %v9474_v12 = vld [vmem:[%s10801_s20 + $0x31c] ss:$12 sps:$4 sm:$0xff]  }
  0xa1   : > { %6414 = vmatprep.subr.bf16.mxu0 %v9381_v13  ;;  %v9477_v13 = vld [vmem:[%s10801_s20 + $0x91c] ss:$12 sps:$4 sm:$0xff]  }
  0xa3   : > { %6243 = vmatpush1.bf16.msra.mxu1 %v9376_v14  ;;  %v9472_v14 = vld [vmem:[%s10801_s20 + $0x318] ss:$12 sps:$4 sm:$0xff]  }
  0xa4   : > { %6415 = vmatpush1.bf16.msra.mxu0 %v9379_v15  ;;  %6244 = vmatprep.subr.bf16.mxu1 %v9384_v16  ;;  %v9475_v15 = vld [vmem:[%s10801_s20 + $0x918] ss:$12 sps:$4 sm:$0xff]   ;;  %v9480_v16 = vld [vmem:[%s10801_s20 + $0x334] ss:$12 sps:$4 sm:$0xff]  }
  0xa5   : > { %6416 = vmatprep.subr.bf16.mxu0 %v9387_v17  ;;  %v9483_v17 = vld [vmem:[%s10801_s20 + $0x934] ss:$12 sps:$4 sm:$0xff]  }
  0xa7   : > { %6245 = vmatpush1.bf16.msra.mxu1 %v9382_v18  ;;  %v9478_v18 = vld [vmem:[%s10801_s20 + $0x330] ss:$12 sps:$4 sm:$0xff]  }
  0xa8   : > { %6417 = vmatpush1.bf16.msra.mxu0 %v9385_v19  ;;  %6246 = vmatprep.subr.bf16.mxu1 %v9390_v20  ;;  %v9564_v19 = vld [vmem:[#allocation2 + $0x14] ss:$144 sps:$4 sm:$0xff]   ;;  %v9481_v20 = vld [vmem:[%s10801_s20 + $0x930] ss:$12 sps:$4 sm:$0xff]  }
  0xa9   : > { %6418 = vmatprep.subr.bf16.mxu0 %v9393_v21  ;;  %v9486_v21 = vld [vmem:[%s10801_s20 + $0x34c] ss:$12 sps:$4 sm:$0xff]  }
  0xab   : > { %6247 = vmatpush1.bf16.msra.mxu1 %v9388_v22  ;;  %v9489_v22 = vld [vmem:[%s10801_s20 + $0x94c] ss:$12 sps:$4 sm:$0xff]  }
  0xac   : > { %6419 = vmatpush1.bf16.msra.mxu0 %v9391_v23  ;;  %6248 = vmatprep.subr.bf16.mxu1 %v9396_v24  ;;  %v9570_v23 = vld [vmem:[#allocation2 + $0x34] ss:$144 sps:$4 sm:$0xff]  }
  0xad   : > { %6420 = vmatprep.subr.bf16.mxu0 %v9399_v25  ;;  %v9484_v24 = vld [vmem:[%s10801_s20 + $0x348] ss:$12 sps:$4 sm:$0xff]  }
  0xae   : > { %v9487_v25 = vld [vmem:[%s10801_s20 + $0x948] ss:$12 sps:$4 sm:$0xff]  }
  0xaf   : > { %6249 = vmatpush1.bf16.msra.mxu1 %v9394_v26  ;;  %v9492_v26 = vld [vmem:[%s10801_s20 + $0x364] ss:$12 sps:$4 sm:$0xff]  }
  0xb0   : > { %6421 = vmatpush1.bf16.msra.mxu0 %v9397_v27  ;;  %6250 = vmatprep.subr.bf16.mxu1 %v9402_v28  ;;  %v9495_v27 = vld [vmem:[%s10801_s20 + $0x964] ss:$12 sps:$4 sm:$0xff]   ;;  %v9490_v28 = vld [vmem:[%s10801_s20 + $0x360] ss:$12 sps:$4 sm:$0xff]  }
  0xb1   : > { %6422 = vmatprep.subr.bf16.mxu0 %v9405_v29  ;;  %v9493_v29 = vld [vmem:[%s10801_s20 + $0x960] ss:$12 sps:$4 sm:$0xff]  }
  0xb3   : > { %6251 = vmatpush1.bf16.msra.mxu1 %v9400_v30  ;;  %v9498_v30 = vld [vmem:[%s10801_s20 + $0x37c] ss:$12 sps:$4 sm:$0xff]  }
  0xb4   : > { %6423 = vmatpush1.bf16.msra.mxu0 %v9403_v31  ;;  %6252 = vmatprep.subr.bf16.mxu1 %v9408_v32  ;;  %v9501_v31 = vld [vmem:[%s10801_s20 + $0x97c] ss:$12 sps:$4 sm:$0xff]   ;;  %v9496_v32 = vld [vmem:[%s10801_s20 + $0x378] ss:$12 sps:$4 sm:$0xff]  }
  0xb5   : > { %6424 = vmatprep.subr.bf16.mxu0 %v9411_v33  ;;  %v9499_v33 = vld [vmem:[%s10801_s20 + $0x978] ss:$12 sps:$4 sm:$0xff]  }
  0xb7   : > { %6253 = vmatpush1.bf16.msra.mxu1 %v9406_v35  ;;  %v9507_v35 = vld [vmem:[%s10801_s20 + $0x994] ss:$12 sps:$4 sm:$0xff]  }
  0xb8   : > { %6425 = vmatpush1.bf16.msra.mxu0 %v9409_v36  ;;  %6254 = vmatprep.subr.bf16.mxu1 %v9414_v38  ;;  %v9502_v36 = vld [vmem:[%s10801_s20 + $0x390] ss:$12 sps:$4 sm:$0xff]   ;;  %v9510_v38 = vld [vmem:[%s10801_s20 + $0x3ac] ss:$12 sps:$4 sm:$0xff]  }
  0xb9   : > { %6426 = vmatprep.subr.bf16.mxu0 %v9417_v39  ;;  %v9513_v39 = vld [vmem:[%s10801_s20 + $0x9ac] ss:$12 sps:$4 sm:$0xff]  }
  0xbb   : > { %6255 = vmatpush1.bf16.msra.mxu1 %v9412_v40  ;;  %v9508_v40 = vld [vmem:[%s10801_s20 + $0x3a8] ss:$12 sps:$4 sm:$0xff]  }
  0xbc   : > { %6427 = vmatpush1.bf16.msra.mxu0 %v9415_v41  ;;  %6256 = vmatprep.subr.bf16.mxu1 %v9420_v42  ;;  %v9511_v41 = vld [vmem:[%s10801_s20 + $0x9a8] ss:$12 sps:$4 sm:$0xff]   ;;  %v9516_v42 = vld [vmem:[%s10801_s20 + $0x3c4] ss:$12 sps:$4 sm:$0xff]  }
  0xbd   : > { %6428 = vmatprep.subr.bf16.mxu0 %v9423_v43  ;;  %v9519_v43 = vld [vmem:[%s10801_s20 + $0x9c4] ss:$12 sps:$4 sm:$0xff]  }
  0xbf   : > { %6257 = vmatpush1.bf16.msra.mxu1 %v9418_v44  ;;  %v9514_v44 = vld [vmem:[%s10801_s20 + $0x3c0] ss:$12 sps:$4 sm:$0xff]  }
  0xc0   : > { %6429 = vmatpush1.bf16.msra.mxu0 %v9421_v45  ;;  %6258 = vmatprep.subr.bf16.mxu1 %v9426_v46  ;;  %v9517_v45 = vld [vmem:[%s10801_s20 + $0x9c0] ss:$12 sps:$4 sm:$0xff]   ;;  %v9522_v46 = vld [vmem:[%s10801_s20 + $0x3dc] ss:$12 sps:$4 sm:$0xff]  }
  0xc1   : > { %6430 = vmatprep.subr.bf16.mxu0 %v9429_v47  ;;  %v9525_v47 = vld [vmem:[%s10801_s20 + $0x9dc] ss:$12 sps:$4 sm:$0xff]  }
  0xc3   : > { %6259 = vmatpush1.bf16.msra.mxu1 %v9424_v48  ;;  %v9520_v48 = vld [vmem:[%s10801_s20 + $0x3d8] ss:$12 sps:$4 sm:$0xff]  }
  0xc4   : > { %6431 = vmatpush1.bf16.msra.mxu0 %v9427_v49  ;;  %6260 = vmatprep.subr.bf16.mxu1 %v9432_v50  ;;  %v9523_v49 = vld [vmem:[%s10801_s20 + $0x9d8] ss:$12 sps:$4 sm:$0xff]   ;;  %v9528_v50 = vld [vmem:[%s10801_s20 + $0x3f4] ss:$12 sps:$4 sm:$0xff]  }
  0xc5   : > { %6432 = vmatprep.subr.bf16.mxu0 %v9435_v51  ;;  %v9531_v51 = vld [vmem:[%s10801_s20 + $0x9f4] ss:$12 sps:$4 sm:$0xff]  }
  0xc7   : > { %6261 = vmatpush1.bf16.msra.mxu1 %v9430_v52  ;;  %v9526_v52 = vld [vmem:[%s10801_s20 + $0x3f0] ss:$12 sps:$4 sm:$0xff]  }
  0xc8   : > { %6433 = vmatpush1.bf16.msra.mxu0 %v9433_v53  ;;  %6262 = vmatprep.subr.bf16.mxu1 %v9438_v54  ;;  %v9529_v53 = vld [vmem:[%s10801_s20 + $0x9f0] ss:$12 sps:$4 sm:$0xff]   ;;  %v9534_v54 = vld [vmem:[%s10801_s20 + $0x40c] ss:$12 sps:$4 sm:$0xff]  }
  0xc9   : > { %6434 = vmatprep.subr.bf16.mxu0 %v9441_v55  ;;  %v9537_v55 = vld [vmem:[%s10801_s20 + $0xa0c] ss:$12 sps:$4 sm:$0xff]  }
  0xcb   : > { %6263 = vmatpush1.bf16.msra.mxu1 %v9436_v56  ;;  %v9532_v56 = vld [vmem:[%s10801_s20 + $0x408] ss:$12 sps:$4 sm:$0xff]  }
  0xcc   : > { %6435 = vmatpush1.bf16.msra.mxu0 %v9439_v57  ;;  %6264 = vmatprep.subr.bf16.mxu1 %v9444_v58  ;;  %v9535_v57 = vld [vmem:[%s10801_s20 + $0xa08] ss:$12 sps:$4 sm:$0xff]   ;;  %v9540_v58 = vld [vmem:[%s10801_s20 + $0x424] ss:$12 sps:$4 sm:$0xff]  }
  0xcd   : > { %6436 = vmatprep.subr.bf16.mxu0 %v9447_v59  ;;  %v9543_v59 = vld [vmem:[%s10801_s20 + $0xa24] ss:$12 sps:$4 sm:$0xff]  }
  0xcf   : > { %6265 = vmatpush1.bf16.msra.mxu1 %v9442_v60  ;;  %v9538_v60 = vld [vmem:[%s10801_s20 + $0x420] ss:$12 sps:$4 sm:$0xff]  }
  0xd0   : > { %6437 = vmatpush1.bf16.msra.mxu0 %v9445_v61  ;;  %6266 = vmatprep.subr.bf16.mxu1 %v9450_v62  ;;  %v9541_v61 = vld [vmem:[%s10801_s20 + $0xa20] ss:$12 sps:$4 sm:$0xff]   ;;  %v9546_v62 = vld [vmem:[%s10801_s20 + $0x43c] ss:$12 sps:$4 sm:$0xff]  }
  0xd1   : > { %6438 = vmatprep.subr.bf16.mxu0 %v9453_v63  ;;  %v9549_v63 = vld [vmem:[%s10801_s20 + $0xa3c] ss:$12 sps:$4 sm:$0xff]  }
  0xd3   : > { %6267 = vmatpush1.bf16.msra.mxu1 %v9448_v0  ;;  %v9544_v0 = vld [vmem:[%s10801_s20 + $0x438] ss:$12 sps:$4 sm:$0xff]  }
  0xd4   : > { %6439 = vmatpush1.bf16.msra.mxu0 %v9451_v1  ;;  %6268 = vmatprep.subr.bf16.mxu1 %v9456_v2  ;;  %v9547_v1 = vld [vmem:[%s10801_s20 + $0xa38] ss:$12 sps:$4 sm:$0xff]   ;;  %v9552_v2 = vld [vmem:[%s10801_s20 + $0x454] ss:$12 sps:$4 sm:$0xff]  }
  0xd5   : > { %6440 = vmatprep.subr.bf16.mxu0 %v9459_v3  ;;  %v9555_v3 = vld [vmem:[%s10801_s20 + $0xa54] ss:$12 sps:$4 sm:$0xff]  }
  0xd7   : > { %6269 = vmatpush1.bf16.msra.mxu1 %v9454_v4  ;;  %v9550_v4 = vld [vmem:[%s10801_s20 + $0x450] ss:$12 sps:$4 sm:$0xff]  }
  0xd8   : > { %6441 = vmatpush1.bf16.msra.mxu0 %v9457_v5  ;;  %6281 = vmatprep.subr.bf16.mxu1 %v9465_v6  ;;  %v9553_v5 = vld [vmem:[%s10801_s20 + $0xa50] ss:$12 sps:$4 sm:$0xff]   ;;  %v9558_v6 = vld [vmem:[%s10801_s20 + $0x46c] ss:$12 sps:$4 sm:$0xff]  }
  0xd9   : > { %6453 = vmatprep.subr.bf16.mxu0 %v9471_v7  ;;  %v9561_v7 = vld [vmem:[%s10801_s20 + $0xa6c] ss:$12 sps:$4 sm:$0xff]  }
  0xda   : > { %6271 = vmatmul.mubr.bf16.vlgmr.msra.gmra.mrb[0].mxu1 %v9460_v8  ;;  %v9556_v8 = vld [vmem:[%s10801_s20 + $0x468] ss:$12 sps:$4 sm:$0xff]  }
  0xdb   : > { %6443 = vmatmul.mubr.bf16.vlgmr.msra.gmra.mrb[0].mxu0 %v9466_v10  ;;  %6282 = vmatpush1.bf16.msra.mxu1 %v9463_v9  ;;  %v9559_v9 = vld [vmem:[%s10801_s20 + $0xa68] ss:$12 sps:$4 sm:$0xff]   ;;  %v9567_v10 = vld [vmem:[%s10801_s20 + $0x484] ss:$12 sps:$4 sm:$0xff]  }
  0xdc   : > { %6454 = vmatpush1.bf16.msra.mxu0 %v9469_v11  ;;  %6283 = vmatprep.subr.bf16.mxu1 %v9474_v12  ;;  %v9562_v11 = vld [vmem:[#allocation2 + $0x10] ss:$144 sps:$4 sm:$0xff]  }
  0xdd   : > { %6455 = vmatprep.subr.bf16.mxu0 %v9477_v13  ;;  %6313 = vmatprep.mubr.bf16.mxu1 %v9564_v19  ;;  %v9573_v12 = vld [vmem:[%s10801_s20 + $0xa84] ss:$12 sps:$4 sm:$0xff]   ;;  %v9565_v13 = vld [vmem:[%s10801_s20 + $0x480] ss:$12 sps:$4 sm:$0xff]  }
  0xde   : > { %6485 = vmatprep.mubr.bf16.mxu0 %v9570_v23  ;;  %v9669_v19 = vld [vmem:[#allocation2 + $0x3c] ss:$144 sps:$4 sm:$0xff]   ;;  %v9585_v23 = vld [vmem:[%s10801_s20 + $0xab4] ss:$12 sps:$4 sm:$0xff]  }
  0xdf   : > { %6284 = vmatpush1.bf16.msra.mxu1 %v9472_v14  ;;  %v9568_v14 = vld [vmem:[#allocation2 + $0x30] ss:$144 sps:$4 sm:$0xff]  }
  0xe0   : > { %6456 = vmatpush1.bf16.msra.mxu0 %v9475_v15  ;;  %6285 = vmatprep.subr.bf16.mxu1 %v9480_v16  ;;  %v9571_v15 = vld [vmem:[%s10801_s20 + $0xa80] ss:$12 sps:$4 sm:$0xff]   ;;  %v9576_v16 = vld [vmem:[%s10801_s20 + $0x49c] ss:$12 sps:$4 sm:$0xff]  }
  0xe1   : > { %6457 = vmatprep.subr.bf16.mxu0 %v9483_v17  ;;  %v9579_v17 = vld [vmem:[%s10801_s20 + $0xa9c] ss:$12 sps:$4 sm:$0xff]  }
  0xe3   : > { %6286 = vmatpush1.bf16.msra.mxu1 %v9478_v18  ;;  %v9666_v18 = vld [vmem:[#allocation2 + $0x1c] ss:$144 sps:$4 sm:$0xff]  }
  0xe4   : > { %6458 = vmatpush1.bf16.msra.mxu0 %v9481_v20  ;;  %6287 = vmatprep.subr.bf16.mxu1 %v9486_v21  ;;  %v9574_v20 = vld [vmem:[%s10801_s20 + $0x498] ss:$12 sps:$4 sm:$0xff]  }
  0xe5   : > { %6459 = vmatprep.subr.bf16.mxu0 %v9489_v22  ;;  %v9577_v21 = vld [vmem:[%s10801_s20 + $0xa98] ss:$12 sps:$4 sm:$0xff]   ;;  %v9582_v22 = vld [vmem:[%s10801_s20 + $0x4b4] ss:$12 sps:$4 sm:$0xff]  }
  0xe7   : > { %6288 = vmatpush1.bf16.msra.mxu1 %v9484_v24  ;;  %v9580_v24 = vld [vmem:[%s10801_s20 + $0x4b0] ss:$12 sps:$4 sm:$0xff]  }
  0xe8   : > { %6460 = vmatpush1.bf16.msra.mxu0 %v9487_v25  ;;  %6289 = vmatprep.subr.bf16.mxu1 %v9492_v26  ;;  %v9583_v25 = vld [vmem:[%s10801_s20 + $0xab0] ss:$12 sps:$4 sm:$0xff]   ;;  %v9588_v26 = vld [vmem:[%s10801_s20 + $0x4cc] ss:$12 sps:$4 sm:$0xff]  }
  0xe9   : > { %6461 = vmatprep.subr.bf16.mxu0 %v9495_v27  ;;  %v9591_v27 = vld [vmem:[%s10801_s20 + $0xacc] ss:$12 sps:$4 sm:$0xff]  }
  0xeb   : > { %6290 = vmatpush1.bf16.msra.mxu1 %v9490_v28  ;;  %v9586_v28 = vld [vmem:[%s10801_s20 + $0x4c8] ss:$12 sps:$4 sm:$0xff]  }
  0xec   : > { %6462 = vmatpush1.bf16.msra.mxu0 %v9493_v29  ;;  %6291 = vmatprep.subr.bf16.mxu1 %v9498_v30  ;;  %v9589_v29 = vld [vmem:[%s10801_s20 + $0xac8] ss:$12 sps:$4 sm:$0xff]   ;;  %v9594_v30 = vld [vmem:[%s10801_s20 + $0x4e4] ss:$12 sps:$4 sm:$0xff]  }
  0xed   : > { %6463 = vmatprep.subr.bf16.mxu0 %v9501_v31  ;;  %v9597_v31 = vld [vmem:[%s10801_s20 + $0xae4] ss:$12 sps:$4 sm:$0xff]  }
  0xef   : > { %6292 = vmatpush1.bf16.msra.mxu1 %v9496_v32  ;;  %v9592_v32 = vld [vmem:[%s10801_s20 + $0x4e0] ss:$12 sps:$4 sm:$0xff]  }
  0xf0   : > { %6464 = vmatpush1.bf16.msra.mxu0 %v9499_v33  ;;  %6293 = vmatprep.subr.bf16.mxu1 %v9504_v34  ;;  %v9595_v33 = vld [vmem:[%s10801_s20 + $0xae0] ss:$12 sps:$4 sm:$0xff]   ;;  %v9600_v34 = vld [vmem:[%s10801_s20 + $0x4fc] ss:$12 sps:$4 sm:$0xff]  }
  0xf1   : > { %6465 = vmatprep.subr.bf16.mxu0 %v9507_v35  ;;  %v9603_v35 = vld [vmem:[%s10801_s20 + $0xafc] ss:$12 sps:$4 sm:$0xff]  }
  0xf3   : > { %6294 = vmatpush1.bf16.msra.mxu1 %v9502_v36  ;;  %v9598_v36 = vld [vmem:[%s10801_s20 + $0x4f8] ss:$12 sps:$4 sm:$0xff]  }
  0xf4   : > { %6466 = vmatpush1.bf16.msra.mxu0 %v9505_v37  ;;  %6295 = vmatprep.subr.bf16.mxu1 %v9510_v38  ;;  %v9601_v37 = vld [vmem:[%s10801_s20 + $0xaf8] ss:$12 sps:$4 sm:$0xff]   ;;  %v9606_v38 = vld [vmem:[%s10801_s20 + $0x514] ss:$12 sps:$4 sm:$0xff]  }
  0xf5   : > { %6467 = vmatprep.subr.bf16.mxu0 %v9513_v39  ;;  %v9609_v39 = vld [vmem:[%s10801_s20 + $0xb14] ss:$12 sps:$4 sm:$0xff]  }
  0xf7   : > { %6296 = vmatpush1.bf16.msra.mxu1 %v9508_v40  ;;  %v10630_v40 = vmov 0  }
  0xf8   : > { %6468 = vmatpush1.bf16.msra.mxu0 %v9511_v41  ;;  %6297 = vmatprep.subr.bf16.mxu1 %v9516_v42  ;;  %v9604_v41 = vld [vmem:[%s10801_s20 + $0x510] ss:$12 sps:$4 sm:$0xff]  }
  0xf9   : > { %6469 = vmatprep.subr.bf16.mxu0 %v9519_v43  ;;  %9261 = vset.pattern.permute.xlu0 %v10630_v40  ;;  %v9607_v42 = vld [vmem:[%s10801_s20 + $0xb10] ss:$12 sps:$4 sm:$0xff]   ;;  %v9612_v43 = vld [vmem:[%s10801_s20 + $0x52c] ss:$12 sps:$4 sm:$0xff]   ;;  %v9694_v40 = vld [vmem:[%s10801_s20 + $0x68] ss:$12 sps:$4 sm:$0xff]  }
  0xfb   : > { %6298 = vmatpush1.bf16.msra.mxu1 %v9514_v44  ;;  %v9615_v44 = vld [vmem:[%s10801_s20 + $0xb2c] ss:$12 sps:$4 sm:$0xff]  }
  0xfc   : > { %6470 = vmatpush1.bf16.msra.mxu0 %v9517_v45  ;;  %6299 = vmatprep.subr.bf16.mxu1 %v9522_v46  ;;  %v9610_v45 = vld [vmem:[%s10801_s20 + $0x528] ss:$12 sps:$4 sm:$0xff]  }
  0xfd   : > { %6471 = vmatprep.subr.bf16.mxu0 %v9525_v47  ;;  %v9613_v46 = vld [vmem:[%s10801_s20 + $0xb28] ss:$12 sps:$4 sm:$0xff]   ;;  %v9618_v47 = vld [vmem:[%s10801_s20 + $0x544] ss:$12 sps:$4 sm:$0xff]  }
  0xff   : > { %6300 = vmatpush1.bf16.msra.mxu1 %v9520_v48  ;;  %v9621_v48 = vld [vmem:[%s10801_s20 + $0xb44] ss:$12 sps:$4 sm:$0xff]  }
 0x100   : > { %6472 = vmatpush1.bf16.msra.mxu0 %v9523_v49  ;;  %6301 = vmatprep.subr.bf16.mxu1 %v9528_v50  ;;  %v9616_v49 = vld [vmem:[%s10801_s20 + $0x540] ss:$12 sps:$4 sm:$0xff]  }
 0x101   : > { %6473 = vmatprep.subr.bf16.mxu0 %v9531_v51  ;;  %v9619_v50 = vld [vmem:[%s10801_s20 + $0xb40] ss:$12 sps:$4 sm:$0xff]   ;;  %v9624_v51 = vld [vmem:[%s10801_s20 + $0x55c] ss:$12 sps:$4 sm:$0xff]  }
 0x103   : > { %6302 = vmatpush1.bf16.msra.mxu1 %v9526_v52  ;;  %v9627_v52 = vld [vmem:[%s10801_s20 + $0xb5c] ss:$12 sps:$4 sm:$0xff]  }
 0x104   : > { %6474 = vmatpush1.bf16.msra.mxu0 %v9529_v53  ;;  %6303 = vmatprep.subr.bf16.mxu1 %v9534_v54  ;;  %v9622_v53 = vld [vmem:[%s10801_s20 + $0x558] ss:$12 sps:$4 sm:$0xff]  }
 0x105   : > { %6475 = vmatprep.subr.bf16.mxu0 %v9537_v55  ;;  %v9625_v54 = vld [vmem:[%s10801_s20 + $0xb58] ss:$12 sps:$4 sm:$0xff]   ;;  %v9630_v55 = vld [vmem:[%s10801_s20 + $0x574] ss:$12 sps:$4 sm:$0xff]  }
 0x107   : > { %6304 = vmatpush1.bf16.msra.mxu1 %v9532_v56  ;;  %v9633_v56 = vld [vmem:[%s10801_s20 + $0xb74] ss:$12 sps:$4 sm:$0xff]  }
 0x108   : > { %6476 = vmatpush1.bf16.msra.mxu0 %v9535_v57  ;;  %6305 = vmatprep.subr.bf16.mxu1 %v9540_v58  ;;  %v9628_v57 = vld [vmem:[%s10801_s20 + $0x570] ss:$12 sps:$4 sm:$0xff]  }
 0x109   : > { %6477 = vmatprep.subr.bf16.mxu0 %v9543_v59  ;;  %v9631_v58 = vld [vmem:[%s10801_s20 + $0xb70] ss:$12 sps:$4 sm:$0xff]   ;;  %v9636_v59 = vld [vmem:[%s10801_s20 + $0x58c] ss:$12 sps:$4 sm:$0xff]  }
 0x10b   : > { %6306 = vmatpush1.bf16.msra.mxu1 %v9538_v60  ;;  %v9639_v60 = vld [vmem:[%s10801_s20 + $0xb8c] ss:$12 sps:$4 sm:$0xff]  }
 0x10c   : > { %6478 = vmatpush1.bf16.msra.mxu0 %v9541_v61  ;;  %6307 = vmatprep.subr.bf16.mxu1 %v9546_v62  ;;  %v9634_v61 = vld [vmem:[%s10801_s20 + $0x588] ss:$12 sps:$4 sm:$0xff]  }
 0x10d   : > { %6479 = vmatprep.subr.bf16.mxu0 %v9549_v63  ;;  %v9637_v62 = vld [vmem:[%s10801_s20 + $0xb88] ss:$12 sps:$4 sm:$0xff]   ;;  %v9642_v63 = vld [vmem:[%s10801_s20 + $0x5a4] ss:$12 sps:$4 sm:$0xff]  }
 0x10f   : > { %6308 = vmatpush1.bf16.msra.mxu1 %v9544_v0  ;;  %v9645_v0 = vld [vmem:[%s10801_s20 + $0xba4] ss:$12 sps:$4 sm:$0xff]  }
 0x110   : > { %6480 = vmatpush1.bf16.msra.mxu0 %v9547_v1  ;;  %6309 = vmatprep.subr.bf16.mxu1 %v9552_v2  ;;  %v9640_v1 = vld [vmem:[%s10801_s20 + $0x5a0] ss:$12 sps:$4 sm:$0xff]  }
 0x111   : > { %6481 = vmatprep.subr.bf16.mxu0 %v9555_v3  ;;  %v9643_v2 = vld [vmem:[%s10801_s20 + $0xba0] ss:$12 sps:$4 sm:$0xff]   ;;  %v9648_v3 = vld [vmem:[%s10801_s20 + $0x5bc] ss:$12 sps:$4 sm:$0xff]  }
 0x113   : > { %6310 = vmatpush1.bf16.msra.mxu1 %v9550_v4  ;;  %v9651_v4 = vld [vmem:[%s10801_s20 + $0xbbc] ss:$12 sps:$4 sm:$0xff]  }
 0x114   : > { %6482 = vmatpush1.bf16.msra.mxu0 %v9553_v5  ;;  %6311 = vmatprep.subr.bf16.mxu1 %v9558_v6  ;;  %v9646_v5 = vld [vmem:[%s10801_s20 + $0x5b8] ss:$12 sps:$4 sm:$0xff]  }
 0x115   : > { %6483 = vmatprep.subr.bf16.mxu0 %v9561_v7  ;;  %v9649_v6 = vld [vmem:[%s10801_s20 + $0xbb8] ss:$12 sps:$4 sm:$0xff]   ;;  %v9654_v7 = vld [vmem:[%s10801_s20 + $0x5d4] ss:$12 sps:$4 sm:$0xff]  }
 0x117   : > { %6312 = vmatpush1.bf16.msra.mxu1 %v9556_v8  ;;  %v9657_v8 = vld [vmem:[%s10801_s20 + $0xbd4] ss:$12 sps:$4 sm:$0xff]  }
 0x118   : > { %6484 = vmatpush1.bf16.msra.mxu0 %v9559_v9  ;;  %6324 = vmatprep.subr.bf16.mxu1 %v9567_v10  ;;  %v9652_v9 = vld [vmem:[%s10801_s20 + $0x5d0] ss:$12 sps:$4 sm:$0xff]  }
 0x119   : > { %6496 = vmatprep.subr.bf16.mxu0 %v9573_v12  ;;  %v9655_v10 = vld [vmem:[%s10801_s20 + $0xbd0] ss:$12 sps:$4 sm:$0xff]   ;;  %v9663_v12 = vld [vmem:[%s10801_s20 + $0xbec] ss:$12 sps:$4 sm:$0xff]  }
 0x11a   : > { %6314 = vmatmul.mubr.bf16.vlgmr.msra.gmra.mrb[0].mxu1 %v9562_v11  ;;  %v9660_v11 = vld [vmem:[%s10801_s20 + $0x5ec] ss:$12 sps:$4 sm:$0xff]  }
 0x11b   : > { %6486 = vmatmul.mubr.bf16.vlgmr.msra.gmra.mrb[0].mxu0 %v9568_v14  ;;  %6325 = vmatpush1.bf16.msra.mxu1 %v9565_v13  ;;  %v9658_v13 = vld [vmem:[%s10801_s20 + $0x5e8] ss:$12 sps:$4 sm:$0xff]  }
 0x11c   : > { %6497 = vmatpush1.bf16.msra.mxu0 %v9571_v15  ;;  %6326 = vmatprep.subr.bf16.mxu1 %v9576_v16  ;;  %v9661_v14 = vld [vmem:[%s10801_s20 + $0xbe8] ss:$12 sps:$4 sm:$0xff]   ;;  %v9672_v15 = vld [vmem:[%s10801_s20 + $0xc04] ss:$12 sps:$4 sm:$0xff]  }
 0x11d   : > { %6498 = vmatprep.subr.bf16.mxu0 %v9579_v17  ;;  %6356 = vmatprep.mubr.bf16.mxu1 %v9666_v18  ;;  %v1395_v16 = vld [vmem:[%s11848_s2] sm:$0xff]  ;;  %v9664_v17 = vld [vmem:[#allocation2 + $0x18] ss:$144 sps:$4 sm:$0xff]  }
 0x11e   : > { %6528 = vmatprep.mubr.bf16.mxu0 %v9669_v19  ;;  %v9673_v18 = vld [vmem:[%s10801_s20 + $0xc8] ss:$12 sps:$4 sm:$0xff]   ;;  %1399 = vperm.xlu0 %9261, %v1395_v16   ;;  %v9743_v16 = vld [vmem:[%s10801_s20 + $0x2d8] ss:$12 sps:$4 sm:$0xff]  }
 0x11f   : > { %6327 = vmatpush1.bf16.msra.mxu1 %v9574_v20  ;;  %v9667_v19 = vld [vmem:[#allocation2 + $0x38] ss:$144 sps:$4 sm:$0xff]   ;;  %v9670_v20 = vld [vmem:[%s10801_s20 + $0xc00] ss:$12 sps:$4 sm:$0xff]  }
 0x120   : > { %6499 = vmatpush1.bf16.msra.mxu0 %v9577_v21  ;;  %6328 = vmatprep.subr.bf16.mxu1 %v9582_v22  ;;  %v9674_v21 = vld [vmem:[%s10801_s20 + $0x8] ss:$12 sps:$4 sm:$0xff]  }
 0x121   : > { %6500 = vmatprep.subr.bf16.mxu0 %v9585_v23  ;;  %v1396_v22 = vld [vmem:[%s11848_s2 + $0x8] sm:$0xff] }
 0x122   : > { %v9677_v23 = vld [vmem:[%s10801_s20 + $0xc1c] ss:$12 sps:$4 sm:$0xff]   ;;  %1404 = vperm.xlu0 %9261, %v1396_v22  }
 0x123   : > { %6329 = vmatpush1.bf16.msra.mxu1 %v9580_v24  ;;  %v9678_v24 = vld [vmem:[%s10801_s20 + $0xe0] ss:$12 sps:$4 sm:$0xff]   ;;  %v9749_v22 = vld [vmem:[%s10801_s20 + $0x230] ss:$12 sps:$4 sm:$0xff]  }
 0x124   : > { %6501 = vmatpush1.bf16.msra.mxu0 %v9583_v25  ;;  %6330 = vmatprep.subr.bf16.mxu1 %v9588_v26  ;;  %v9675_v25 = vld [vmem:[%s10801_s20 + $0xc18] ss:$12 sps:$4 sm:$0xff]  }
 0x125   : > { %6502 = vmatprep.subr.bf16.mxu0 %v9591_v27  ;;  %v9752_v26 = vld [vmem:[#allocation2 + $0x44] ss:$144 sps:$4 sm:$0xff]   ;;  %v9679_v27 = vld [vmem:[%s10801_s20 + $0x20] ss:$12 sps:$4 sm:$0xff]  }
 0x127   : > { %6331 = vmatpush1.bf16.msra.mxu1 %v9586_v28  ;;  %v9682_v28 = vld [vmem:[%s10801_s20 + $0xc34] ss:$12 sps:$4 sm:$0xff]  }
 0x128   : > { %6503 = vmatpush1.bf16.msra.mxu0 %v9589_v29  ;;  %6332 = vmatprep.subr.bf16.mxu1 %v9594_v30  ;;  %v9683_v29 = vld [vmem:[%s10801_s20 + $0xf8] ss:$12 sps:$4 sm:$0xff]  }
 0x129   : > { %6504 = vmatprep.subr.bf16.mxu0 %v9597_v31  ;;  %v10468_v30 = vld [vmem:[#allocation2 + $0x4] ss:$144 sps:$4 sm:$0xff]   ;;  %v9680_v31 = vld [vmem:[%s10801_s20 + $0xc30] ss:$12 sps:$4 sm:$0xff]  }
 0x12b   : > { %6333 = vmatpush1.bf16.msra.mxu1 %v9592_v32  ;;  %v9684_v32 = vld [vmem:[%s10801_s20 + $0x38] ss:$12 sps:$4 sm:$0xff]  }
 0x12c   : > { %6505 = vmatpush1.bf16.msra.mxu0 %v9595_v33  ;;  %6334 = vmatprep.subr.bf16.mxu1 %v9600_v34  ;;  %v9687_v33 = vld [vmem:[%s10801_s20 + $0xc4c] ss:$12 sps:$4 sm:$0xff]   ;;  %v9688_v34 = vld [vmem:[%s10801_s20 + $0x110] ss:$12 sps:$4 sm:$0xff]  }
 0x12d   : > { %6506 = vmatprep.subr.bf16.mxu0 %v9603_v35  ;;  %v9685_v35 = vld [vmem:[%s10801_s20 + $0xc48] ss:$12 sps:$4 sm:$0xff]  }
 0x12f   : > { %6335 = vmatpush1.bf16.msra.mxu1 %v9598_v36  ;;  %v9689_v36 = vld [vmem:[%s10801_s20 + $0x50] ss:$12 sps:$4 sm:$0xff]  }
 0x130   : > { %6507 = vmatpush1.bf16.msra.mxu0 %v9601_v37  ;;  %6336 = vmatprep.subr.bf16.mxu1 %v9606_v38  ;;  %v9692_v37 = vld [vmem:[%s10801_s20 + $0xc64] ss:$12 sps:$4 sm:$0xff]   ;;  %v9693_v38 = vld [vmem:[%s10801_s20 + $0x128] ss:$12 sps:$4 sm:$0xff]  }
 0x131   : > { %6508 = vmatprep.subr.bf16.mxu0 %v9609_v39  ;;  %v9690_v39 = vld [vmem:[%s10801_s20 + $0xc60] ss:$12 sps:$4 sm:$0xff]  }
 0x133   : > { %6337 = vmatpush1.bf16.msra.mxu1 %v9604_v41  ;;  %v9697_v41 = vld [vmem:[%s10801_s20 + $0xc7c] ss:$12 sps:$4 sm:$0xff]  }
 0x134   : > { %6509 = vmatpush1.bf16.msra.mxu0 %v9607_v42  ;;  %6338 = vmatprep.subr.bf16.mxu1 %v9612_v43  ;;  %v9698_v42 = vld [vmem:[%s10801_s20 + $0x140] ss:$12 sps:$4 sm:$0xff]   ;;  %v9695_v43 = vld [vmem:[%s10801_s20 + $0xc78] ss:$12 sps:$4 sm:$0xff]  }
 0x135   : > { %6510 = vmatprep.subr.bf16.mxu0 %v9615_v44  ;;  %v9699_v44 = vld [vmem:[%s10801_s20 + $0x80] ss:$12 sps:$4 sm:$0xff]  }
 0x137   : > { %6339 = vmatpush1.bf16.msra.mxu1 %v9610_v45  ;;  %v9702_v45 = vld [vmem:[%s10801_s20 + $0xc94] ss:$12 sps:$4 sm:$0xff]  }
 0x138   : > { %6511 = vmatpush1.bf16.msra.mxu0 %v9613_v46  ;;  %6340 = vmatprep.subr.bf16.mxu1 %v9618_v47  ;;  %v9703_v46 = vld [vmem:[%s10801_s20 + $0x158] ss:$12 sps:$4 sm:$0xff]   ;;  %v9700_v47 = vld [vmem:[%s10801_s20 + $0xc90] ss:$12 sps:$4 sm:$0xff]  }
 0x139   : > { %6512 = vmatprep.subr.bf16.mxu0 %v9621_v48  ;;  %v9704_v48 = vld [vmem:[%s10801_s20 + $0x98] ss:$12 sps:$4 sm:$0xff]  }
 0x13b   : > { %6341 = vmatpush1.bf16.msra.mxu1 %v9616_v49  ;;  %v9707_v49 = vld [vmem:[%s10801_s20 + $0xcac] ss:$12 sps:$4 sm:$0xff]  }
 0x13c   : > { %6513 = vmatpush1.bf16.msra.mxu0 %v9619_v50  ;;  %6342 = vmatprep.subr.bf16.mxu1 %v9624_v51  ;;  %v9708_v50 = vld [vmem:[%s10801_s20 + $0x170] ss:$12 sps:$4 sm:$0xff]   ;;  %v9705_v51 = vld [vmem:[%s10801_s20 + $0xca8] ss:$12 sps:$4 sm:$0xff]  }
 0x13d   : > { %6514 = vmatprep.subr.bf16.mxu0 %v9627_v52  ;;  %v9709_v52 = vld [vmem:[%s10801_s20 + $0xb0] ss:$12 sps:$4 sm:$0xff]  }
 0x13f   : > { %6343 = vmatpush1.bf16.msra.mxu1 %v9622_v53  ;;  %v9712_v53 = vld [vmem:[%s10801_s20 + $0xcc4] ss:$12 sps:$4 sm:$0xff]  }
 0x140   : > { %6515 = vmatpush1.bf16.msra.mxu0 %v9625_v54  ;;  %6344 = vmatprep.subr.bf16.mxu1 %v9630_v55  ;;  %v9713_v54 = vld [vmem:[%s10801_s20 + $0x248] ss:$12 sps:$4 sm:$0xff]   ;;  %v9710_v55 = vld [vmem:[%s10801_s20 + $0xcc0] ss:$12 sps:$4 sm:$0xff]  }
 0x141   : > { %6516 = vmatprep.subr.bf16.mxu0 %v9633_v56  ;;  %v9714_v56 = vld [vmem:[%s10801_s20 + $0x188] ss:$12 sps:$4 sm:$0xff]  }
 0x143   : > { %6345 = vmatpush1.bf16.msra.mxu1 %v9628_v57  ;;  %v9717_v57 = vld [vmem:[%s10801_s20 + $0xcdc] ss:$12 sps:$4 sm:$0xff]  }
 0x144   : > { %6517 = vmatpush1.bf16.msra.mxu0 %v9631_v58  ;;  %6346 = vmatprep.subr.bf16.mxu1 %v9636_v59  ;;  %v9718_v58 = vld [vmem:[%s10801_s20 + $0x260] ss:$12 sps:$4 sm:$0xff]  }
 0x145   : > { %6518 = vmatprep.subr.bf16.mxu0 %v9639_v60  ;;  %v10469_v59 = vld [vmem:[#allocation2] ss:$144 sps:$4 sm:$0xff]   ;;  %v9715_v60 = vld [vmem:[%s10801_s20 + $0xcd8] ss:$12 sps:$4 sm:$0xff]  }
 0x147   : > { %6347 = vmatpush1.bf16.msra.mxu1 %v9634_v61  ;;  %v9719_v61 = vld [vmem:[%s10801_s20 + $0x1a0] ss:$12 sps:$4 sm:$0xff]  }
 0x148   : > { %6519 = vmatpush1.bf16.msra.mxu0 %v9637_v62  ;;  %6348 = vmatprep.subr.bf16.mxu1 %v9642_v63  ;;  %v9722_v62 = vld [vmem:[%s10801_s20 + $0xcf4] ss:$12 sps:$4 sm:$0xff]   ;;  %v9723_v63 = vld [vmem:[%s10801_s20 + $0x278] ss:$12 sps:$4 sm:$0xff]  }
 0x149   : > { %6520 = vmatprep.subr.bf16.mxu0 %v9645_v0  ;;  %v10470_v0 = vld [vmem:[#allocation2 + $0xc] ss:$144 sps:$4 sm:$0xff]  }
 0x14b   : > { %6349 = vmatpush1.bf16.msra.mxu1 %v9640_v1  ;;  %v9720_v1 = vld [vmem:[%s10801_s20 + $0xcf0] ss:$12 sps:$4 sm:$0xff]  }
 0x14c   : > { %6521 = vmatpush1.bf16.msra.mxu0 %v9643_v2  ;;  %6350 = vmatprep.subr.bf16.mxu1 %v9648_v3  ;;  %v9724_v2 = vld [vmem:[%s10801_s20 + $0x1b8] ss:$12 sps:$4 sm:$0xff]  }
 0x14d   : > { %6522 = vmatprep.subr.bf16.mxu0 %v9651_v4  ;;  %v9727_v3 = vld [vmem:[%s10801_s20 + $0xd0c] ss:$12 sps:$4 sm:$0xff]   ;;  %v9728_v4 = vld [vmem:[%s10801_s20 + $0x290] ss:$12 sps:$4 sm:$0xff]  }
 0x14f   : > { %6351 = vmatpush1.bf16.msra.mxu1 %v9646_v5  ;;  %v9725_v5 = vld [vmem:[%s10801_s20 + $0xd08] ss:$12 sps:$4 sm:$0xff]  }
 0x150   : > { %6523 = vmatpush1.bf16.msra.mxu0 %v9649_v6  ;;  %6352 = vmatprep.subr.bf16.mxu1 %v9654_v7  ;;  %v9729_v6 = vld [vmem:[%s10801_s20 + $0x1d0] ss:$12 sps:$4 sm:$0xff]  }
 0x151   : > { %6524 = vmatprep.subr.bf16.mxu0 %v9657_v8  ;;  %v9732_v7 = vld [vmem:[%s10801_s20 + $0xd24] ss:$12 sps:$4 sm:$0xff]   ;;  %v9733_v8 = vld [vmem:[%s10801_s20 + $0x2a8] ss:$12 sps:$4 sm:$0xff]  }
 0x153   : > { %6353 = vmatpush1.bf16.msra.mxu1 %v9652_v9  ;;  %v9730_v9 = vld [vmem:[%s10801_s20 + $0xd20] ss:$12 sps:$4 sm:$0xff]  }
 0x154   : > { %6525 = vmatpush1.bf16.msra.mxu0 %v9655_v10  ;;  %6354 = vmatprep.subr.bf16.mxu1 %v9660_v11  ;;  %v9734_v10 = vld [vmem:[%s10801_s20 + $0x1e8] ss:$12 sps:$4 sm:$0xff]  }
 0x155   : > { %6526 = vmatprep.subr.bf16.mxu0 %v9663_v12  ;;  %v9737_v11 = vld [vmem:[%s10801_s20 + $0xd3c] ss:$12 sps:$4 sm:$0xff]   ;;  %v9738_v12 = vld [vmem:[%s10801_s20 + $0x2c0] ss:$12 sps:$4 sm:$0xff]  }
 0x157   : > { %6355 = vmatpush1.bf16.msra.mxu1 %v9658_v13  ;;  %v9735_v13 = vld [vmem:[%s10801_s20 + $0xd38] ss:$12 sps:$4 sm:$0xff]  }
 0x158   : > { %6527 = vmatpush1.bf16.msra.mxu0 %v9661_v14  ;;  %8724 = vmatprep.subr.bf16.mxu1 %v9673_v18  ;;  %v9739_v14 = vld [vmem:[%s10801_s20 + $0x200] ss:$12 sps:$4 sm:$0xff]   ;;  %v9744_v18 = vld [vmem:[%s10801_s20 + $0x218] ss:$12 sps:$4 sm:$0xff]  }
 0x159   : > { %6539 = vmatprep.subr.bf16.mxu0 %v9672_v15  ;;  %v9742_v15 = vld [vmem:[%s10801_s20 + $0xd54] ss:$12 sps:$4 sm:$0xff]  }
 0x15a   : > { %6357 = vmatmul.mubr.bf16.vlgmr.msra.gmra.mrb[0].mxu1 %v9664_v17  ;;  %v9740_v17 = vld [vmem:[%s10801_s20 + $0xd50] ss:$12 sps:$4 sm:$0xff]  }
 0x15b   : > { %6529 = vmatmul.mubr.bf16.vlgmr.msra.gmra.mrb[0].mxu0 %v9667_v19  ;;  %8725 = vmatpush3.bf16.msra.mxu1 %v9674_v21  ;;  %v9747_v19 = vld [vmem:[%s10801_s20 + $0xd6c] ss:$12 sps:$4 sm:$0xff]   ;;  %v9745_v21 = vld [vmem:[%s10801_s20 + $0xd68] ss:$12 sps:$4 sm:$0xff]  }
 0x15c   : > { %6540 = vmatpush1.bf16.msra.mxu0 %v9670_v20  ;;  %8726 = vmatprep.subr.bf16.mxu1 %v9678_v24  ;;  %v9748_v20 = vld [vmem:[%s10801_s20 + $0x2f0] ss:$12 sps:$4 sm:$0xff]  }
 0x15d   : > { %6541 = vmatprep.subr.bf16.mxu0 %v9677_v23  ;;  %7001 = vmatprep.mubr.bf16.mxu1 %v10468_v30  ;;  %v9755_v23 = vld [vmem:[%s10801_s20 + $0xd84] ss:$12 sps:$4 sm:$0xff]   ;;  %v9835_v30 = vld [vmem:[#allocation2 + $0x4c] ss:$144 sps:$4 sm:$0xff]  }
 0x15e   : > { %6571 = vmatprep.mubr.bf16.mxu0 %v9752_v26  ;;  %v9750_v24 = vld [vmem:[#allocation2 + $0x40] ss:$144 sps:$4 sm:$0xff]  }
 0x15f   : > { %8727 = vmatpush3.bf16.msra.mxu1 %v9679_v27  ;;  %v9753_v26 = vld [vmem:[%s10801_s20 + $0xd80] ss:$12 sps:$4 sm:$0xff]   ;;  %v9757_v27 = vld [vmem:[%s10801_s20 + $0x308] ss:$12 sps:$4 sm:$0xff]  }
 0x160   : > { %6542 = vmatpush1.bf16.msra.mxu0 %v9675_v25  ;;  %8728 = vmatprep.subr.bf16.mxu1 %v9683_v29  ;;  %v9756_v25 = vld [vmem:[%s10801_s20 + $0x3c8] ss:$12 sps:$4 sm:$0xff]   ;;  %v9761_v29 = vld [vmem:[%s10801_s20 + $0x3e0] ss:$12 sps:$4 sm:$0xff]  }
 0x161   : > { %6543 = vmatprep.subr.bf16.mxu0 %v9682_v28  ;;  %v9760_v28 = vld [vmem:[%s10801_s20 + $0xd9c] ss:$12 sps:$4 sm:$0xff]  }
 0x163   : > { %8729 = vmatpush3.bf16.msra.mxu1 %v9684_v32  ;;  %v9758_v32 = vld [vmem:[%s10801_s20 + $0xd98] ss:$12 sps:$4 sm:$0xff]  }
 0x164   : > { %6544 = vmatpush1.bf16.msra.mxu0 %v9680_v31  ;;  %8730 = vmatprep.subr.bf16.mxu1 %v9688_v34  ;;  %v10471_v31 = vld [vmem:[#allocation2 + $0x8] ss:$144 sps:$4 sm:$0xff]   ;;  %v9765_v34 = vld [vmem:[%s10801_s20 + $0xdb4] ss:$12 sps:$4 sm:$0xff]  }
 0x165   : > { %6545 = vmatprep.subr.bf16.mxu0 %v9687_v33  ;;  %v9762_v33 = vld [vmem:[%s10801_s20 + $0x320] ss:$12 sps:$4 sm:$0xff]  }
 0x167   : > { %8731 = vmatpush3.bf16.msra.mxu1 %v9689_v36  ;;  %v9763_v36 = vld [vmem:[%s10801_s20 + $0xdb0] ss:$12 sps:$4 sm:$0xff]  }
 0x168   : > { %6546 = vmatpush1.bf16.msra.mxu0 %v9685_v35  ;;  %8732 = vmatprep.subr.bf16.mxu1 %v9693_v38  ;;  %v9766_v35 = vld [vmem:[%s10801_s20 + $0x3f8] ss:$12 sps:$4 sm:$0xff]  }
 0x169   : > { %6547 = vmatprep.subr.bf16.mxu0 %v9692_v37  ;;  %v10472_v37 = vld [vmem:[#allocation2 + $0x14] ss:$144 sps:$4 sm:$0xff]  }
 0x16a   : > { %v9767_v38 = vld [vmem:[%s10801_s20 + $0x338] ss:$12 sps:$4 sm:$0xff]  }
 0x16b   : > { %8733 = vmatpush3.bf16.msra.mxu1 %v9694_v40  ;;  %v9771_v40 = vld [vmem:[%s10801_s20 + $0x410] ss:$12 sps:$4 sm:$0xff]  }
 0x16c   : > { %6548 = vmatpush1.bf16.msra.mxu0 %v9690_v39  ;;  %8734 = vmatprep.subr.bf16.mxu1 %v9698_v42  ;;  %v9770_v39 = vld [vmem:[%s10801_s20 + $0xdcc] ss:$12 sps:$4 sm:$0xff]   ;;  %v9772_v42 = vld [vmem:[%s10801_s20 + $0x350] ss:$12 sps:$4 sm:$0xff]  }
 0x16d   : > { %6549 = vmatprep.subr.bf16.mxu0 %v9697_v41  ;;  %v9768_v41 = vld [vmem:[%s10801_s20 + $0xdc8] ss:$12 sps:$4 sm:$0xff]  }
 0x16f   : > { %8735 = vmatpush3.bf16.msra.mxu1 %v9699_v44  ;;  %v9776_v44 = vld [vmem:[%s10801_s20 + $0x428] ss:$12 sps:$4 sm:$0xff]  }
 0x170   : > { %6550 = vmatpush1.bf16.msra.mxu0 %v9695_v43  ;;  %8736 = vmatprep.subr.bf16.mxu1 %v9703_v46  ;;  %v9775_v43 = vld [vmem:[%s10801_s20 + $0xde4] ss:$12 sps:$4 sm:$0xff]   ;;  %v9777_v46 = vld [vmem:[%s10801_s20 + $0x368] ss:$12 sps:$4 sm:$0xff]  }
 0x171   : > { %6551 = vmatprep.subr.bf16.mxu0 %v9702_v45  ;;  %v9773_v45 = vld [vmem:[%s10801_s20 + $0xde0] ss:$12 sps:$4 sm:$0xff]  }
 0x173   : > { %8737 = vmatpush3.bf16.msra.mxu1 %v9704_v48  ;;  %v9781_v48 = vld [vmem:[%s10801_s20 + $0x440] ss:$12 sps:$4 sm:$0xff]  }
 0x174   : > { %6552 = vmatpush1.bf16.msra.mxu0 %v9700_v47  ;;  %8738 = vmatprep.subr.bf16.mxu1 %v9708_v50  ;;  %v9780_v47 = vld [vmem:[%s10801_s20 + $0xdfc] ss:$12 sps:$4 sm:$0xff]   ;;  %v9782_v50 = vld [vmem:[%s10801_s20 + $0x380] ss:$12 sps:$4 sm:$0xff]  }
 0x175   : > { %6553 = vmatprep.subr.bf16.mxu0 %v9707_v49  ;;  %v9778_v49 = vld [vmem:[%s10801_s20 + $0xdf8] ss:$12 sps:$4 sm:$0xff]  }
 0x177   : > { %8739 = vmatpush3.bf16.msra.mxu1 %v9709_v52  ;;  %v9786_v52 = vld [vmem:[%s10801_s20 + $0x458] ss:$12 sps:$4 sm:$0xff]  }
 0x178   : > { %6554 = vmatpush1.bf16.msra.mxu0 %v9705_v51  ;;  %8746 = vmatprep.subr.bf16.mxu1 %v9713_v54  ;;  %v9785_v51 = vld [vmem:[%s10801_s20 + $0xe14] ss:$12 sps:$4 sm:$0xff]   ;;  %v9787_v54 = vld [vmem:[%s10801_s20 + $0x398] ss:$12 sps:$4 sm:$0xff]  }
 0x179   : > { %6555 = vmatprep.subr.bf16.mxu0 %v9712_v53  ;;  %v9783_v53 = vld [vmem:[%s10801_s20 + $0xe10] ss:$12 sps:$4 sm:$0xff]  }
 0x17a   : > { %7002 = vmatmul.mubr.bf16.vlgmr.msra.gmra.mrb[4].mxu1 %v10469_v59  ;;  %v9795_v59 = vld [vmem:[%s10801_s20 + $0xe44] ss:$12 sps:$4 sm:$0xff]  }
 0x17b   : > { %8747 = vmatpush3.bf16.msra.mxu1 %v9714_v56  ;;  %7042 = vmatprep.mubr.bf16.mxu1 %v10470_v0  ;;  %v9791_v56 = vld [vmem:[%s10801_s20 + $0x470] ss:$12 sps:$4 sm:$0xff]   ;;  %v9801_v0 = vld [vmem:[%s10801_s20 + $0x560] ss:$12 sps:$4 sm:$0xff]  }
 0x17c   : > { %6556 = vmatpush1.bf16.msra.mxu0 %v9710_v55  ;;  %8748 = vmatprep.subr.bf16.mxu1 %v9718_v58  ;;  %v9790_v55 = vld [vmem:[%s10801_s20 + $0xe2c] ss:$12 sps:$4 sm:$0xff]   ;;  %v9792_v58 = vld [vmem:[%s10801_s20 + $0x3b0] ss:$12 sps:$4 sm:$0xff]  }
 0x17d   : > { %6557 = vmatprep.subr.bf16.mxu0 %v9717_v57  ;;  %v9788_v57 = vld [vmem:[%s10801_s20 + $0xe28] ss:$12 sps:$4 sm:$0xff]  }
 0x17f   : > { %8749 = vmatpush3.bf16.msra.mxu1 %v9719_v61  ;;  %v9793_v61 = vld [vmem:[%s10801_s20 + $0xe40] ss:$12 sps:$4 sm:$0xff]  }
 0x180   : > { %6558 = vmatpush1.bf16.msra.mxu0 %v9715_v60  ;;  %8750 = vmatprep.subr.bf16.mxu1 %v9723_v63  ;;  %v9796_v60 = vld [vmem:[%s10801_s20 + $0x548] ss:$12 sps:$4 sm:$0xff]  }
 0x181   : > { %6559 = vmatprep.subr.bf16.mxu0 %v9722_v62  ;;  %v9797_v62 = vld [vmem:[%s10801_s20 + $0x488] ss:$12 sps:$4 sm:$0xff]  }
 0x182   : > { %v9800_v63 = vld [vmem:[%s10801_s20 + $0xe5c] ss:$12 sps:$4 sm:$0xff]  }
 0x183   : > { %8751 = vmatpush3.bf16.msra.mxu1 %v9724_v2  ;;  %v10473_v2 = vld [vmem:[#allocation2 + $0x10] ss:$144 sps:$4 sm:$0xff]  }
 0x184   : > { %6560 = vmatpush1.bf16.msra.mxu0 %v9720_v1  ;;  %8752 = vmatprep.subr.bf16.mxu1 %v9728_v4  ;;  %v9798_v1 = vld [vmem:[%s10801_s20 + $0xe58] ss:$12 sps:$4 sm:$0xff]   ;;  %v9805_v4 = vld [vmem:[%s10801_s20 + $0xe74] ss:$12 sps:$4 sm:$0xff]  }
 0x185   : > { %6561 = vmatprep.subr.bf16.mxu0 %v9727_v3  ;;  %v9802_v3 = vld [vmem:[%s10801_s20 + $0x4a0] ss:$12 sps:$4 sm:$0xff]  }
 0x187   : > { %8753 = vmatpush3.bf16.msra.mxu1 %v9729_v6  ;;  %v10474_v6 = vld [vmem:[#allocation2 + $0x1c] ss:$144 sps:$4 sm:$0xff]  }
 0x188   : > { %6562 = vmatpush1.bf16.msra.mxu0 %v9725_v5  ;;  %8754 = vmatprep.subr.bf16.mxu1 %v9733_v8  ;;  %v9806_v5 = vld [vmem:[%s10801_s20 + $0x578] ss:$12 sps:$4 sm:$0xff]  }
 0x189   : > { %6563 = vmatprep.subr.bf16.mxu0 %v9732_v7  ;;  %v9803_v7 = vld [vmem:[%s10801_s20 + $0xe70] ss:$12 sps:$4 sm:$0xff]   ;;  %v9807_v8 = vld [vmem:[%s10801_s20 + $0x4b8] ss:$12 sps:$4 sm:$0xff]  }
 0x18b   : > { %8755 = vmatpush3.bf16.msra.mxu1 %v9734_v10  ;;  %v9811_v10 = vld [vmem:[%s10801_s20 + $0x590] ss:$12 sps:$4 sm:$0xff]  }
 0x18c   : > { %6564 = vmatpush1.bf16.msra.mxu0 %v9730_v9  ;;  %8756 = vmatprep.subr.bf16.mxu1 %v9738_v12  ;;  %v9810_v9 = vld [vmem:[%s10801_s20 + $0xe8c] ss:$12 sps:$4 sm:$0xff]   ;;  %v9812_v12 = vld [vmem:[%s10801_s20 + $0x4d0] ss:$12 sps:$4 sm:$0xff]  }
 0x18d   : > { %6565 = vmatprep.subr.bf16.mxu0 %v9737_v11  ;;  %v9808_v11 = vld [vmem:[%s10801_s20 + $0xe88] ss:$12 sps:$4 sm:$0xff]  }
 0x18f   : > { %8757 = vmatpush3.bf16.msra.mxu1 %v9739_v14  ;;  %v9816_v14 = vld [vmem:[%s10801_s20 + $0x5a8] ss:$12 sps:$4 sm:$0xff]  }
 0x190   : > { %6566 = vmatpush1.bf16.msra.mxu0 %v9735_v13  ;;  %8758 = vmatprep.subr.bf16.mxu1 %v9743_v16  ;;  %v9815_v13 = vld [vmem:[%s10801_s20 + $0xea4] ss:$12 sps:$4 sm:$0xff]   ;;  %v9817_v16 = vld [vmem:[%s10801_s20 + $0x4e8] ss:$12 sps:$4 sm:$0xff]  }
 0x191   : > { %6567 = vmatprep.subr.bf16.mxu0 %v9742_v15  ;;  %v9813_v15 = vld [vmem:[%s10801_s20 + $0xea0] ss:$12 sps:$4 sm:$0xff]  }
 0x193   : > { %8759 = vmatpush3.bf16.msra.mxu1 %v9744_v18  ;;  %v9821_v18 = vld [vmem:[%s10801_s20 + $0x5c0] ss:$12 sps:$4 sm:$0xff]  }
 0x194   : > { %6568 = vmatpush1.bf16.msra.mxu0 %v9740_v17  ;;  %8760 = vmatprep.subr.bf16.mxu1 %v9748_v20  ;;  %v9820_v17 = vld [vmem:[%s10801_s20 + $0xebc] ss:$12 sps:$4 sm:$0xff]   ;;  %v9822_v20 = vld [vmem:[%s10801_s20 + $0x500] ss:$12 sps:$4 sm:$0xff]  }
 0x195   : > { %6569 = vmatprep.subr.bf16.mxu0 %v9747_v19  ;;  %v9818_v19 = vld [vmem:[%s10801_s20 + $0xeb8] ss:$12 sps:$4 sm:$0xff]  }
 0x197   : > { %8761 = vmatpush3.bf16.msra.mxu1 %v9749_v22  ;;  %v9826_v22 = vld [vmem:[%s10801_s20 + $0x5d8] ss:$12 sps:$4 sm:$0xff]  }
 0x198   : > { %6570 = vmatpush1.bf16.msra.mxu0 %v9745_v21  ;;  %8768 = vmatprep.subr.bf16.mxu1 %v9756_v25  ;;  %v9825_v21 = vld [vmem:[%s10801_s20 + $0xed4] ss:$12 sps:$4 sm:$0xff]   ;;  %v9830_v25 = vld [vmem:[%s10801_s20 + $0xeec] ss:$12 sps:$4 sm:$0xff]  }
 0x199   : > { %6582 = vmatprep.subr.bf16.mxu0 %v9755_v23  ;;  %v9823_v23 = vld [vmem:[%s10801_s20 + $0xed0] ss:$12 sps:$4 sm:$0xff]  }
 0x19a   : > { %7043 = vmatmul.mubr.bf16.vlgmr.msra.gmra.mrb[8].mxu1 %v10471_v31  ;;  %v9833_v31 = vld [vmem:[#allocation2 + $0x48] ss:$144 sps:$4 sm:$0xff]  }
 0x19b   : > { %6572 = vmatmul.mubr.bf16.vlgmr.msra.gmra.mrb[0].mxu0 %v9750_v24  ;;  %8769 = vmatpush3.bf16.msra.mxu1 %v9757_v27  ;;  %v9827_v24 = vld [vmem:[%s10801_s20 + $0x518] ss:$12 sps:$4 sm:$0xff]   ;;  %v9828_v27 = vld [vmem:[%s10801_s20 + $0xee8] ss:$12 sps:$4 sm:$0xff]  }
 0x19c   : > { %6583 = vmatpush1.bf16.msra.mxu0 %v9753_v26  ;;  %8770 = vmatprep.subr.bf16.mxu1 %v9761_v29  ;;  %v9831_v26 = vld [vmem:[%s10801_s20 + $0x5f0] ss:$12 sps:$4 sm:$0xff]  }
 0x19d   : > { %6584 = vmatprep.subr.bf16.mxu0 %v9760_v28  ;;  %7083 = vmatprep.mubr.bf16.mxu1 %v10472_v37  ;;  %v9832_v28 = vld [vmem:[%s10801_s20 + $0x530] ss:$12 sps:$4 sm:$0xff]   ;;  %v9918_v37 = vld [vmem:[#allocation2 + $0x54] ss:$144 sps:$4 sm:$0xff]  }
 0x19e   : > { %6614 = vmatprep.mubr.bf16.mxu0 %v9835_v30  ;;  %v9838_v29 = vld [vmem:[%s10801_s20 + $0xf04] ss:$12 sps:$4 sm:$0xff]   ;;  %v9839_v30 = vld [vmem:[%s10801_s20 + $0x6c8] ss:$12 sps:$4 sm:$0xff]  }
 0x19f   : > { %8771 = vmatpush3.bf16.msra.mxu1 %v9762_v33  ;;  %v9840_v33 = vld [vmem:[%s10801_s20 + $0x608] ss:$12 sps:$4 sm:$0xff]  }
 0x1a0   : > { %6585 = vmatpush1.bf16.msra.mxu0 %v9758_v32  ;;  %8772 = vmatprep.subr.bf16.mxu1 %v9766_v35  ;;  %v9836_v32 = vld [vmem:[%s10801_s20 + $0xf00] ss:$12 sps:$4 sm:$0xff]  }
 0x1a1   : > { %6586 = vmatprep.subr.bf16.mxu0 %v9765_v34  ;;  %v9843_v34 = vld [vmem:[%s10801_s20 + $0xf1c] ss:$12 sps:$4 sm:$0xff]   ;;  %v9844_v35 = vld [vmem:[%s10801_s20 + $0x6e0] ss:$12 sps:$4 sm:$0xff]  }
 0x1a3   : > { %8773 = vmatpush3.bf16.msra.mxu1 %v9767_v38  ;;  %v10475_v38 = vld [vmem:[#allocation2 + $0x18] ss:$144 sps:$4 sm:$0xff]  }
 0x1a4   : > { %6587 = vmatpush1.bf16.msra.mxu0 %v9763_v36  ;;  %8774 = vmatprep.subr.bf16.mxu1 %v9771_v40  ;;  %v9841_v36 = vld [vmem:[%s10801_s20 + $0xf18] ss:$12 sps:$4 sm:$0xff]   ;;  %v9848_v40 = vld [vmem:[%s10801_s20 + $0xf34] ss:$12 sps:$4 sm:$0xff]  }
 0x1a5   : > { %6588 = vmatprep.subr.bf16.mxu0 %v9770_v39  ;;  %v9845_v39 = vld [vmem:[%s10801_s20 + $0x620] ss:$12 sps:$4 sm:$0xff]  }
 0x1a7   : > { %8775 = vmatpush3.bf16.msra.mxu1 %v9772_v42  ;;  %v10476_v42 = vld [vmem:[#allocation2 + $0x24] ss:$144 sps:$4 sm:$0xff]  }
 0x1a8   : > { %6589 = vmatpush1.bf16.msra.mxu0 %v9768_v41  ;;  %8776 = vmatprep.subr.bf16.mxu1 %v9776_v44  ;;  %v9849_v41 = vld [vmem:[%s10801_s20 + $0x6f8] ss:$12 sps:$4 sm:$0xff]  }
 0x1a9   : > { %6590 = vmatprep.subr.bf16.mxu0 %v9775_v43  ;;  %v9846_v43 = vld [vmem:[%s10801_s20 + $0xf30] ss:$12 sps:$4 sm:$0xff]   ;;  %v9850_v44 = vld [vmem:[%s10801_s20 + $0x638] ss:$12 sps:$4 sm:$0xff]  }
 0x1ab   : > { %8777 = vmatpush3.bf16.msra.mxu1 %v9777_v46  ;;  %v9854_v46 = vld [vmem:[%s10801_s20 + $0x710] ss:$12 sps:$4 sm:$0xff]  }
 0x1ac   : > { %6591 = vmatpush1.bf16.msra.mxu0 %v9773_v45  ;;  %8778 = vmatprep.subr.bf16.mxu1 %v9781_v48  ;;  %v9853_v45 = vld [vmem:[%s10801_s20 + $0xf4c] ss:$12 sps:$4 sm:$0xff]   ;;  %v9855_v48 = vld [vmem:[%s10801_s20 + $0x650] ss:$12 sps:$4 sm:$0xff]  }
 0x1ad   : > { %6592 = vmatprep.subr.bf16.mxu0 %v9780_v47  ;;  %v9851_v47 = vld [vmem:[%s10801_s20 + $0xf48] ss:$12 sps:$4 sm:$0xff]  }
 0x1af   : > { %8779 = vmatpush3.bf16.msra.mxu1 %v9782_v50  ;;  %v9859_v50 = vld [vmem:[%s10801_s20 + $0x728] ss:$12 sps:$4 sm:$0xff]  }
 0x1b0   : > { %6593 = vmatpush1.bf16.msra.mxu0 %v9778_v49  ;;  %8780 = vmatprep.subr.bf16.mxu1 %v9786_v52  ;;  %v9858_v49 = vld [vmem:[%s10801_s20 + $0xf64] ss:$12 sps:$4 sm:$0xff]   ;;  %v9860_v52 = vld [vmem:[%s10801_s20 + $0x668] ss:$12 sps:$4 sm:$0xff]  }
 0x1b1   : > { %6594 = vmatprep.subr.bf16.mxu0 %v9785_v51  ;;  %v9856_v51 = vld [vmem:[%s10801_s20 + $0xf60] ss:$12 sps:$4 sm:$0xff]  }
 0x1b3   : > { %8781 = vmatpush3.bf16.msra.mxu1 %v9787_v54  ;;  %v9864_v54 = vld [vmem:[%s10801_s20 + $0x740] ss:$12 sps:$4 sm:$0xff]  }
 0x1b4   : > { %6595 = vmatpush1.bf16.msra.mxu0 %v9783_v53  ;;  %8782 = vmatprep.subr.bf16.mxu1 %v9791_v56  ;;  %v9863_v53 = vld [vmem:[%s10801_s20 + $0xf7c] ss:$12 sps:$4 sm:$0xff]   ;;  %v9865_v56 = vld [vmem:[%s10801_s20 + $0x680] ss:$12 sps:$4 sm:$0xff]  }
 0x1b5   : > { %6596 = vmatprep.subr.bf16.mxu0 %v9790_v55  ;;  %v9861_v55 = vld [vmem:[%s10801_s20 + $0xf78] ss:$12 sps:$4 sm:$0xff]  }
 0x1b7   : > { %8783 = vmatpush3.bf16.msra.mxu1 %v9792_v58  ;;  %v9869_v58 = vld [vmem:[%s10801_s20 + $0x758] ss:$12 sps:$4 sm:$0xff]  }
 0x1b8   : > { %6597 = vmatpush1.bf16.msra.mxu0 %v9788_v57  ;;  %8790 = vmatprep.subr.bf16.mxu1 %v9796_v60  ;;  %v9868_v57 = vld [vmem:[%s10801_s20 + $0xf94] ss:$12 sps:$4 sm:$0xff]   ;;  %v9870_v60 = vld [vmem:[%s10801_s20 + $0x698] ss:$12 sps:$4 sm:$0xff]  }
 0x1b9   : > { %6598 = vmatprep.subr.bf16.mxu0 %v9795_v59  ;;  %v9866_v59 = vld [vmem:[%s10801_s20 + $0xf90] ss:$12 sps:$4 sm:$0xff]  }
 0x1ba   : > { %7084 = vmatmul.mubr.bf16.vlgmr.msra.gmra.mrb[12].mxu1 %v10473_v2  ;;  %v9879_v2 = vld [vmem:[%s10801_s20 + $0x848] ss:$12 sps:$4 sm:$0xff]  }
 0x1bb   : > { %8791 = vmatpush3.bf16.msra.mxu1 %v9797_v62  ;;  %7124 = vmatprep.mubr.bf16.mxu1 %v10474_v6  ;;  %v9874_v62 = vld [vmem:[%s10801_s20 + $0x770] ss:$12 sps:$4 sm:$0xff]   ;;  %v9884_v6 = vld [vmem:[%s10801_s20 + $0x860] ss:$12 sps:$4 sm:$0xff]  }
 0x1bc   : > { %6599 = vmatpush1.bf16.msra.mxu0 %v9793_v61  ;;  %8792 = vmatprep.subr.bf16.mxu1 %v9801_v0  ;;  %v9873_v61 = vld [vmem:[%s10801_s20 + $0xfac] ss:$12 sps:$4 sm:$0xff]   ;;  %v9875_v0 = vld [vmem:[%s10801_s20 + $0x6b0] ss:$12 sps:$4 sm:$0xff]  }
 0x1bd   : > { %6600 = vmatprep.subr.bf16.mxu0 %v9800_v63  ;;  %v9871_v63 = vld [vmem:[%s10801_s20 + $0xfa8] ss:$12 sps:$4 sm:$0xff]  }
 0x1bf   : > { %8793 = vmatpush3.bf16.msra.mxu1 %v9802_v3  ;;  %v9876_v3 = vld [vmem:[%s10801_s20 + $0xfc0] ss:$12 sps:$4 sm:$0xff]  }
 0x1c0   : > { %6601 = vmatpush1.bf16.msra.mxu0 %v9798_v1  ;;  %8794 = vmatprep.subr.bf16.mxu1 %v9806_v5  ;;  %v9878_v1 = vld [vmem:[%s10801_s20 + $0xfc4] ss:$12 sps:$4 sm:$0xff]   ;;  %v9883_v5 = vld [vmem:[%s10801_s20 + $0xfdc] ss:$12 sps:$4 sm:$0xff]  }
 0x1c1   : > { %6602 = vmatprep.subr.bf16.mxu0 %v9805_v4  ;;  %v9880_v4 = vld [vmem:[%s10801_s20 + $0x788] ss:$12 sps:$4 sm:$0xff]  }
 0x1c3   : > { %8795 = vmatpush3.bf16.msra.mxu1 %v9807_v8  ;;  %v9881_v8 = vld [vmem:[%s10801_s20 + $0xfd8] ss:$12 sps:$4 sm:$0xff]  }
 0x1c4   : > { %6603 = vmatpush1.bf16.msra.mxu0 %v9803_v7  ;;  %8796 = vmatprep.subr.bf16.mxu1 %v9811_v10  ;;  %v10477_v7 = vld [vmem:[#allocation2 + $0x20] ss:$144 sps:$4 sm:$0xff]  }
 0x1c5   : > { %6604 = vmatprep.subr.bf16.mxu0 %v9810_v9  ;;  %v9885_v9 = vld [vmem:[%s10801_s20 + $0x7a0] ss:$12 sps:$4 sm:$0xff]  }
 0x1c6   : > { %v9888_v10 = vld [vmem:[%s10801_s20 + $0xff4] ss:$12 sps:$4 sm:$0xff]  }
 0x1c7   : > { %8797 = vmatpush3.bf16.msra.mxu1 %v9812_v12  ;;  %v9886_v12 = vld [vmem:[%s10801_s20 + $0xff0] ss:$12 sps:$4 sm:$0xff]  }
 0x1c8   : > { %6605 = vmatpush1.bf16.msra.mxu0 %v9808_v11  ;;  %8798 = vmatprep.subr.bf16.mxu1 %v9816_v14  ;;  %v9889_v11 = vld [vmem:[%s10801_s20 + $0x878] ss:$12 sps:$4 sm:$0xff]  }
 0x1c9   : > { %6606 = vmatprep.subr.bf16.mxu0 %v9815_v13  ;;  %v10478_v13 = vld [vmem:[#allocation2 + $0x2c] ss:$144 sps:$4 sm:$0xff]   ;;  %v9890_v14 = vld [vmem:[%s10801_s20 + $0x7b8] ss:$12 sps:$4 sm:$0xff]  }
 0x1cb   : > { %8799 = vmatpush3.bf16.msra.mxu1 %v9817_v16  ;;  %v9894_v16 = vld [vmem:[%s10801_s20 + $0x890] ss:$12 sps:$4 sm:$0xff]  }
 0x1cc   : > { %6607 = vmatpush1.bf16.msra.mxu0 %v9813_v15  ;;  %8800 = vmatprep.subr.bf16.mxu1 %v9821_v18  ;;  %v9893_v15 = vld [vmem:[%s10801_s20 + $0x100c] ss:$12 sps:$4 sm:$0xff]   ;;  %v9895_v18 = vld [vmem:[%s10801_s20 + $0x7d0] ss:$12 sps:$4 sm:$0xff]  }
 0x1cd   : > { %6608 = vmatprep.subr.bf16.mxu0 %v9820_v17  ;;  %v9891_v17 = vld [vmem:[%s10801_s20 + $0x1008] ss:$12 sps:$4 sm:$0xff]  }
 0x1cf   : > { %8801 = vmatpush3.bf16.msra.mxu1 %v9822_v20  ;;  %v9899_v20 = vld [vmem:[%s10801_s20 + $0x8a8] ss:$12 sps:$4 sm:$0xff]  }
 0x1d0   : > { %6609 = vmatpush1.bf16.msra.mxu0 %v9818_v19  ;;  %8802 = vmatprep.subr.bf16.mxu1 %v9826_v22  ;;  %v9898_v19 = vld [vmem:[%s10801_s20 + $0x1024] ss:$12 sps:$4 sm:$0xff]   ;;  %v9900_v22 = vld [vmem:[%s10801_s20 + $0x7e8] ss:$12 sps:$4 sm:$0xff]  }
 0x1d1   : > { %6610 = vmatprep.subr.bf16.mxu0 %v9825_v21  ;;  %v9896_v21 = vld [vmem:[%s10801_s20 + $0x1020] ss:$12 sps:$4 sm:$0xff]  }
 0x1d3   : > { %8803 = vmatpush3.bf16.msra.mxu1 %v9827_v24  ;;  %v9904_v24 = vld [vmem:[%s10801_s20 + $0x8c0] ss:$12 sps:$4 sm:$0xff]  }
 0x1d4   : > { %6611 = vmatpush1.bf16.msra.mxu0 %v9823_v23  ;;  %8804 = vmatprep.subr.bf16.mxu1 %v9831_v26  ;;  %v9903_v23 = vld [vmem:[%s10801_s20 + $0x103c] ss:$12 sps:$4 sm:$0xff]   ;;  %v9905_v26 = vld [vmem:[%s10801_s20 + $0x800] ss:$12 sps:$4 sm:$0xff]  }
 0x1d5   : > { %6612 = vmatprep.subr.bf16.mxu0 %v9830_v25  ;;  %v9901_v25 = vld [vmem:[%s10801_s20 + $0x1038] ss:$12 sps:$4 sm:$0xff]  }
 0x1d7   : > { %8805 = vmatpush3.bf16.msra.mxu1 %v9832_v28  ;;  %v9909_v28 = vld [vmem:[%s10801_s20 + $0x8d8] ss:$12 sps:$4 sm:$0xff]  }
 0x1d8   : > { %6613 = vmatpush1.bf16.msra.mxu0 %v9828_v27  ;;  %8812 = vmatprep.subr.bf16.mxu1 %v9839_v30  ;;  %v9908_v27 = vld [vmem:[%s10801_s20 + $0x1054] ss:$12 sps:$4 sm:$0xff]   ;;  %v9910_v30 = vld [vmem:[%s10801_s20 + $0x818] ss:$12 sps:$4 sm:$0xff]  }
 0x1d9   : > { %6625 = vmatprep.subr.bf16.mxu0 %v9838_v29  ;;  %v9906_v29 = vld [vmem:[%s10801_s20 + $0x1050] ss:$12 sps:$4 sm:$0xff]  }
 0x1da   : > { %7125 = vmatmul.mubr.bf16.vlgmr.msra.gmra.mrb[16].mxu1 %v10475_v38  ;;  %v9919_v38 = vld [vmem:[%s10801_s20 + $0x1080] ss:$12 sps:$4 sm:$0xff]  }
 0x1db   : > { %6615 = vmatmul.mubr.bf16.vlgmr.msra.gmra.mrb[0].mxu0 %v9833_v31  ;;  %8813 = vmatpush3.bf16.msra.mxu1 %v9840_v33  ;;  %v9913_v31 = vld [vmem:[%s10801_s20 + $0x106c] ss:$12 sps:$4 sm:$0xff]   ;;  %v9911_v33 = vld [vmem:[%s10801_s20 + $0x1068] ss:$12 sps:$4 sm:$0xff]  }
 0x1dc   : > { %6626 = vmatpush1.bf16.msra.mxu0 %v9836_v32  ;;  %8814 = vmatprep.subr.bf16.mxu1 %v9844_v35  ;;  %v9914_v32 = vld [vmem:[%s10801_s20 + $0x8f0] ss:$12 sps:$4 sm:$0xff]  }
 0x1dd   : > { %6627 = vmatprep.subr.bf16.mxu0 %v9843_v34  ;;  %7165 = vmatprep.mubr.bf16.mxu1 %v10476_v42  ;;  %v9915_v34 = vld [vmem:[%s10801_s20 + $0x830] ss:$12 sps:$4 sm:$0xff]  }
 0x1de   : > { %6657 = vmatprep.mubr.bf16.mxu0 %v9918_v37  ;;  %v9921_v35 = vld [vmem:[%s10801_s20 + $0x1084] ss:$12 sps:$4 sm:$0xff]   ;;  %v10001_v42 = vld [vmem:[#allocation2 + $0x5c] ss:$144 sps:$4 sm:$0xff]  }
 0x1df   : > { %8815 = vmatpush3.bf16.msra.mxu1 %v9845_v39  ;;  %v9916_v37 = vld [vmem:[#allocation2 + $0x50] ss:$144 sps:$4 sm:$0xff]   ;;  %v9923_v39 = vld [vmem:[%s10801_s20 + $0x908] ss:$12 sps:$4 sm:$0xff]  }
 0x1e0   : > { %6628 = vmatpush1.bf16.msra.mxu0 %v9841_v36  ;;  %8816 = vmatprep.subr.bf16.mxu1 %v9849_v41  ;;  %v9922_v36 = vld [vmem:[%s10801_s20 + $0x9c8] ss:$12 sps:$4 sm:$0xff]   ;;  %v9927_v41 = vld [vmem:[%s10801_s20 + $0x9e0] ss:$12 sps:$4 sm:$0xff]  }
 0x1e1   : > { %6629 = vmatprep.subr.bf16.mxu0 %v9848_v40  ;;  %v9926_v40 = vld [vmem:[%s10801_s20 + $0x109c] ss:$12 sps:$4 sm:$0xff]  }
 0x1e3   : > { %8817 = vmatpush3.bf16.msra.mxu1 %v9850_v44  ;;  %v9924_v44 = vld [vmem:[%s10801_s20 + $0x1098] ss:$12 sps:$4 sm:$0xff]  }
 0x1e4   : > { %6630 = vmatpush1.bf16.msra.mxu0 %v9846_v43  ;;  %8818 = vmatprep.subr.bf16.mxu1 %v9854_v46  ;;  %v10479_v43 = vld [vmem:[#allocation2 + $0x28] ss:$144 sps:$4 sm:$0xff]   ;;  %v9931_v46 = vld [vmem:[%s10801_s20 + $0x10b4] ss:$12 sps:$4 sm:$0xff]  }
 0x1e5   : > { %6631 = vmatprep.subr.bf16.mxu0 %v9853_v45  ;;  %v9928_v45 = vld [vmem:[%s10801_s20 + $0x920] ss:$12 sps:$4 sm:$0xff]  }
 0x1e7   : > { %8819 = vmatpush3.bf16.msra.mxu1 %v9855_v48  ;;  %v10480_v48 = vld [vmem:[#allocation2 + $0x34] ss:$144 sps:$4 sm:$0xff]  }
 0x1e8   : > { %6632 = vmatpush1.bf16.msra.mxu0 %v9851_v47  ;;  %8820 = vmatprep.subr.bf16.mxu1 %v9859_v50  ;;  %v9932_v47 = vld [vmem:[%s10801_s20 + $0x9f8] ss:$12 sps:$4 sm:$0xff]  }
 0x1e9   : > { %6633 = vmatprep.subr.bf16.mxu0 %v9858_v49  ;;  %v9929_v49 = vld [vmem:[%s10801_s20 + $0x10b0] ss:$12 sps:$4 sm:$0xff]   ;;  %v9933_v50 = vld [vmem:[%s10801_s20 + $0x938] ss:$12 sps:$4 sm:$0xff]  }
 0x1eb   : > { %8821 = vmatpush3.bf16.msra.mxu1 %v9860_v52  ;;  %v9937_v52 = vld [vmem:[%s10801_s20 + $0xa10] ss:$12 sps:$4 sm:$0xff]  }
 0x1ec   : > { %6634 = vmatpush1.bf16.msra.mxu0 %v9856_v51  ;;  %8822 = vmatprep.subr.bf16.mxu1 %v9864_v54  ;;  %v9936_v51 = vld [vmem:[%s10801_s20 + $0x10cc] ss:$12 sps:$4 sm:$0xff]   ;;  %v9938_v54 = vld [vmem:[%s10801_s20 + $0x950] ss:$12 sps:$4 sm:$0xff]  }
 0x1ed   : > { %6635 = vmatprep.subr.bf16.mxu0 %v9863_v53  ;;  %v9934_v53 = vld [vmem:[%s10801_s20 + $0x10c8] ss:$12 sps:$4 sm:$0xff]  }
 0x1ef   : > { %8823 = vmatpush3.bf16.msra.mxu1 %v9865_v56  ;;  %v9942_v56 = vld [vmem:[%s10801_s20 + $0xa28] ss:$12 sps:$4 sm:$0xff]  }
 0x1f0   : > { %6636 = vmatpush1.bf16.msra.mxu0 %v9861_v55  ;;  %8824 = vmatprep.subr.bf16.mxu1 %v9869_v58  ;;  %v9941_v55 = vld [vmem:[%s10801_s20 + $0x10e4] ss:$12 sps:$4 sm:$0xff]   ;;  %v9943_v58 = vld [vmem:[%s10801_s20 + $0x968] ss:$12 sps:$4 sm:$0xff]  }
 0x1f1   : > { %6637 = vmatprep.subr.bf16.mxu0 %v9868_v57  ;;  %v9939_v57 = vld [vmem:[%s10801_s20 + $0x10e0] ss:$12 sps:$4 sm:$0xff]  }
 0x1f3   : > { %8825 = vmatpush3.bf16.msra.mxu1 %v9870_v60  ;;  %v9946_v60 = vld [vmem:[%s10801_s20 + $0x10fc] ss:$12 sps:$4 sm:$0xff]  }
 0x1f4   : > { %6638 = vmatpush1.bf16.msra.mxu0 %v9866_v59  ;;  %8826 = vmatprep.subr.bf16.mxu1 %v9874_v62  ;;  %v11281_v59 = vpop.permute.xlu0 %1399  ;;  %v9944_v62 = vld [vmem:[%s10801_s20 + $0x10f8] ss:$12 sps:$4 sm:$0xff]  }
 0x1f5   : > { %6639 = vmatprep.subr.bf16.mxu0 %v9873_v61  ;;  %v9947_v61 = vld [vmem:[%s10801_s20 + $0xa40] ss:$12 sps:$4 sm:$0xff]  }
 0x1f7   : > { %8827 = vmatpush3.bf16.msra.mxu1 %v9875_v0  ;;  %v9951_v0 = vld [vmem:[%s10801_s20 + $0x1114] ss:$12 sps:$4 sm:$0xff]  }
 0x1f8   : > { %6640 = vmatpush1.bf16.msra.mxu0 %v9871_v63  ;;  %8834 = vmatprep.subr.bf16.mxu1 %v9879_v2  ;;  %v9948_v63 = vld [vmem:[%s10801_s20 + $0x980] ss:$12 sps:$4 sm:$0xff]  }
 0x1f9   : > { %6641 = vmatprep.subr.bf16.mxu0 %v9878_v1  ;;  %v9952_v1 = vld [vmem:[%s10801_s20 + $0xa58] ss:$12 sps:$4 sm:$0xff]  }
 0x1fa   : > { %7166 = vmatmul.mubr.bf16.vlgmr.msra.gmra.mrb[20].mxu1 %v10477_v7  ;;  %v9953_v7 = vld [vmem:[%s10801_s20 + $0x998] ss:$12 sps:$4 sm:$0xff]  }
 0x1fb   : > { %8835 = vmatpush3.bf16.msra.mxu1 %v9880_v4  ;;  %7206 = vmatprep.mubr.bf16.mxu1 %v10478_v13  ;;  %v9954_v13 = vld [vmem:[%s10801_s20 + $0x1128] ss:$12 sps:$4 sm:$0xff]  }
 0x1fc   : > { %6642 = vmatpush1.bf16.msra.mxu0 %v9876_v3  ;;  %8836 = vmatprep.subr.bf16.mxu1 %v9884_v6  ;;  %v11291_v3 = vpop.permute.xlu0 %1404 }
 0x1fd   : > { %6643 = vmatprep.subr.bf16.mxu0 %v9883_v5  ;;  %v9949_v5 = vld [vmem:[%s10801_s20 + $0x1110] ss:$12 sps:$4 sm:$0xff]  }
 0x1ff   : > { %8837 = vmatpush3.bf16.msra.mxu1 %v9885_v9 }
 0x200   : > { %6644 = vmatpush1.bf16.msra.mxu0 %v9881_v8  ;;  %8838 = vmatprep.subr.bf16.mxu1 %v9889_v11  ;;  %v9957_v11 = vld [vmem:[%s10801_s20 + $0xa70] ss:$12 sps:$4 sm:$0xff]  }
 0x201   : > { %6645 = vmatprep.subr.bf16.mxu0 %v9888_v10  ;;  %v9956_v10 = vld [vmem:[%s10801_s20 + $0x112c] ss:$12 sps:$4 sm:$0xff]  }
 0x203   : > { %8839 = vmatpush3.bf16.msra.mxu1 %v9890_v14  ;;  %v9958_v14 = vld [vmem:[%s10801_s20 + $0x9b0] ss:$12 sps:$4 sm:$0xff]  }
 0x204   : > { %6646 = vmatpush1.bf16.msra.mxu0 %v9886_v12  ;;  %8840 = vmatprep.subr.bf16.mxu1 %v9894_v16  ;;  %v9962_v16 = vld [vmem:[%s10801_s20 + $0xb48] ss:$12 sps:$4 sm:$0xff]  }
 0x205   : > { %6647 = vmatprep.subr.bf16.mxu0 %v9893_v15  ;;  %v9961_v15 = vld [vmem:[%s10801_s20 + $0x1144] ss:$12 sps:$4 sm:$0xff]  }
 0x207   : > { %8841 = vmatpush3.bf16.msra.mxu1 %v9895_v18  ;;  %v9963_v18 = vld [vmem:[%s10801_s20 + $0xa88] ss:$12 sps:$4 sm:$0xff]  }
 0x208   : > { %6648 = vmatpush1.bf16.msra.mxu0 %v9891_v17  ;;  %8842 = vmatprep.subr.bf16.mxu1 %v9899_v20  ;;  %v9959_v17 = vld [vmem:[%s10801_s20 + $0x1140] ss:$12 sps:$4 sm:$0xff]  }
 0x209   : > { %6649 = vmatprep.subr.bf16.mxu0 %v9898_v19  ;;  %v9966_v19 = vld [vmem:[%s10801_s20 + $0x115c] ss:$12 sps:$4 sm:$0xff]   ;;  %v9967_v20 = vld [vmem:[%s10801_s20 + $0xb60] ss:$12 sps:$4 sm:$0xff]  }
 0x20b   : > { %8843 = vmatpush3.bf16.msra.mxu1 %v9900_v22  ;;  %v10481_v22 = vld [vmem:[#allocation2 + $0x30] ss:$144 sps:$4 sm:$0xff]  }
 0x20c   : > { %6650 = vmatpush1.bf16.msra.mxu0 %v9896_v21  ;;  %8844 = vmatprep.subr.bf16.mxu1 %v9904_v24  ;;  %v9964_v21 = vld [vmem:[%s10801_s20 + $0x1158] ss:$12 sps:$4 sm:$0xff]   ;;  %v9971_v24 = vld [vmem:[%s10801_s20 + $0x1174] ss:$12 sps:$4 sm:$0xff]  }
 0x20d   : > { %6651 = vmatprep.subr.bf16.mxu0 %v9903_v23  ;;  %v9968_v23 = vld [vmem:[%s10801_s20 + $0xaa0] ss:$12 sps:$4 sm:$0xff]  }
 0x20f   : > { %8845 = vmatpush3.bf16.msra.mxu1 %v9905_v26  ;;  %v10482_v26 = vld [vmem:[#allocation2 + $0x3c] ss:$144 sps:$4 sm:$0xff]  }
 0x210   : > { %6652 = vmatpush1.bf16.msra.mxu0 %v9901_v25  ;;  %8846 = vmatprep.subr.bf16.mxu1 %v9909_v28  ;;  %v9972_v25 = vld [vmem:[%s10801_s20 + $0xb78] ss:$12 sps:$4 sm:$0xff]  }
 0x211   : > { %6653 = vmatprep.subr.bf16.mxu0 %v9908_v27  ;;  %v9969_v27 = vld [vmem:[%s10801_s20 + $0x1170] ss:$12 sps:$4 sm:$0xff]   ;;  %v9973_v28 = vld [vmem:[%s10801_s20 + $0xab8] ss:$12 sps:$4 sm:$0xff]  }
 0x213   : > { %8847 = vmatpush3.bf16.msra.mxu1 %v9910_v30  ;;  %v9977_v30 = vld [vmem:[%s10801_s20 + $0xb90] ss:$12 sps:$4 sm:$0xff]  }
 0x214   : > { %6654 = vmatpush1.bf16.msra.mxu0 %v9906_v29  ;;  %8848 = vmatprep.subr.bf16.mxu1 %v9914_v32  ;;  %v9976_v29 = vld [vmem:[%s10801_s20 + $0x118c] ss:$12 sps:$4 sm:$0xff]   ;;  %v9978_v32 = vld [vmem:[%s10801_s20 + $0xad0] ss:$12 sps:$4 sm:$0xff]  }
 0x215   : > { %6655 = vmatprep.subr.bf16.mxu0 %v9913_v31  ;;  %v9974_v31 = vld [vmem:[%s10801_s20 + $0x1188] ss:$12 sps:$4 sm:$0xff]  }
 0x217   : > { %8849 = vmatpush3.bf16.msra.mxu1 %v9915_v34  ;;  %v9982_v34 = vld [vmem:[%s10801_s20 + $0xba8] ss:$12 sps:$4 sm:$0xff]  }
 0x218   : > { %6656 = vmatpush1.bf16.msra.mxu0 %v9911_v33  ;;  %8856 = vmatprep.subr.bf16.mxu1 %v9922_v36  ;;  %v9981_v33 = vld [vmem:[%s10801_s20 + $0x11a4] ss:$12 sps:$4 sm:$0xff]   ;;  %v9983_v36 = vld [vmem:[%s10801_s20 + $0xae8] ss:$12 sps:$4 sm:$0xff]  }
 0x219   : > { %6668 = vmatprep.subr.bf16.mxu0 %v9921_v35  ;;  %v9979_v35 = vld [vmem:[%s10801_s20 + $0x11a0] ss:$12 sps:$4 sm:$0xff]  }
 0x21a   : > { %7207 = vmatmul.mubr.bf16.vlgmr.msra.gmra.mrb[24].mxu1 %v10479_v43  ;;  %v9989_v43 = vld [vmem:[%s10801_s20 + $0x11d0] ss:$12 sps:$4 sm:$0xff]  }
 0x21b   : > { %6658 = vmatmul.mubr.bf16.vlgmr.msra.gmra.mrb[0].mxu0 %v9916_v37  ;;  %8857 = vmatpush3.bf16.msra.mxu1 %v9923_v39  ;;  %v9986_v37 = vld [vmem:[%s10801_s20 + $0x11bc] ss:$12 sps:$4 sm:$0xff]   ;;  %v9984_v39 = vld [vmem:[%s10801_s20 + $0x11b8] ss:$12 sps:$4 sm:$0xff]  }
 0x21c   : > { %6669 = vmatpush1.bf16.msra.mxu0 %v9919_v38  ;;  %8858 = vmatprep.subr.bf16.mxu1 %v9927_v41  ;;  %v9987_v38 = vld [vmem:[%s10801_s20 + $0xbc0] ss:$12 sps:$4 sm:$0xff]  }
 0x21d   : > { %6670 = vmatprep.subr.bf16.mxu0 %v9926_v40  ;;  %7247 = vmatprep.mubr.bf16.mxu1 %v10480_v48  ;;  %v9988_v40 = vld [vmem:[%s10801_s20 + $0xb00] ss:$12 sps:$4 sm:$0xff]  }
 0x21e   : > { %6700 = vmatprep.mubr.bf16.mxu0 %v10001_v42  ;;  %v9991_v41 = vld [vmem:[%s10801_s20 + $0x11d4] ss:$12 sps:$4 sm:$0xff]   ;;  %v9992_v42 = vld [vmem:[%s10801_s20 + $0xbd8] ss:$12 sps:$4 sm:$0xff]  }
 0x21f   : > { %8859 = vmatpush3.bf16.msra.mxu1 %v9928_v45 }
 0x220   : > { %6671 = vmatpush1.bf16.msra.mxu0 %v9924_v44  ;;  %8860 = vmatprep.subr.bf16.mxu1 %v9932_v47  ;;  %v9993_v44 = vld [vmem:[%s10801_s20 + $0xb18] ss:$12 sps:$4 sm:$0xff]  }
 0x221   : > { %6672 = vmatprep.subr.bf16.mxu0 %v9931_v46 }
 0x223   : > { %8861 = vmatpush3.bf16.msra.mxu1 %v9933_v50  ;;  %v9997_v50 = vld [vmem:[%s10801_s20 + $0xbf0] ss:$12 sps:$4 sm:$0xff]  }
 0x224   : > { %6673 = vmatpush1.bf16.msra.mxu0 %v9929_v49  ;;  %8862 = vmatprep.subr.bf16.mxu1 %v9937_v52  ;;  %v9996_v49 = vld [vmem:[%s10801_s20 + $0x11ec] ss:$12 sps:$4 sm:$0xff]   ;;  %v9994_v52 = vld [vmem:[%s10801_s20 + $0x11e8] ss:$12 sps:$4 sm:$0xff]  }
 0x225   : > { %6674 = vmatprep.subr.bf16.mxu0 %v9936_v51 }
 0x227   : > { %8863 = vmatpush3.bf16.msra.mxu1 %v9938_v54  ;;  %v9998_v54 = vld [vmem:[%s10801_s20 + $0xb30] ss:$12 sps:$4 sm:$0xff]  }
 0x228   : > { %6675 = vmatpush1.bf16.msra.mxu0 %v9934_v53  ;;  %8864 = vmatprep.subr.bf16.mxu1 %v9942_v56  ;;  %v10005_v56 = vld [vmem:[%s10801_s20 + $0xcc8] ss:$12 sps:$4 sm:$0xff]  }
 0x229   : > { %6676 = vmatprep.subr.bf16.mxu0 %v9941_v55  ;;  %v10004_v55 = vld [vmem:[%s10801_s20 + $0x1204] ss:$12 sps:$4 sm:$0xff]  }
 0x22b   : > { %8865 = vmatpush3.bf16.msra.mxu1 %v9943_v58  ;;  %v10002_v58 = vld [vmem:[%s10801_s20 + $0x1200] ss:$12 sps:$4 sm:$0xff]  }
 0x22c   : > { %6677 = vmatpush1.bf16.msra.mxu0 %v9939_v57  ;;  %8866 = vmatprep.subr.bf16.mxu1 %v9947_v61  ;;  %v9999_v57 = vld [vmem:[#allocation2 + $0x58] ss:$144 sps:$4 sm:$0xff]  }
 0x22d   : > { %6678 = vmatprep.subr.bf16.mxu0 %v9946_v60  ;;  %v11289_v2 = vpop.f32.mrb[0].mxu1  ;;  %v10006_v60 = vld [vmem:[%s10801_s20 + $0xc08] ss:$12 sps:$4 sm:$0xff]  }
 0x22e   : > { %v11293_v4 = vpop.f32.mrb[1].mxu1  ;;  %v10009_v61 = vld [vmem:[%s10801_s20 + $0x121c] ss:$12 sps:$4 sm:$0xff]  }
 0x22f   : > { %v6362_v6 = vpop.f32.mrb[2].mxu1  ;;  %8867 = vmatpush3.bf16.msra.mxu1 %v9948_v63  ;;  %v10007_v63 = vld [vmem:[%s10801_s20 + $0x1218] ss:$12 sps:$4 sm:$0xff]  }
 0x230   : > { %6679 = vmatpush1.bf16.msra.mxu0 %v9944_v62  ;;  %v11298_v8 = vadd.f32 %v6362_v6, %v11291_v3  ;;  %v6364_v9 = vpop.f32.mrb[3].mxu1  ;;  %8868 = vmatprep.subr.bf16.mxu1 %v9952_v1  ;;  %v10010_v62 = vld [vmem:[%s10801_s20 + $0xce0] ss:$12 sps:$4 sm:$0xff]   ;;  %v10483_v1 = vld [vmem:[#allocation2 + $0x38] ss:$144 sps:$4 sm:$0xff]  }
 0x231   : > { %6680 = vmatprep.subr.bf16.mxu0 %v9951_v0  ;;  %v11303_v12 = vadd.f32 %v6364_v9, %v11291_v3  ;;  %v10084_v0 = vld [vmem:[#allocation2 + $0x64] ss:$144 sps:$4 sm:$0xff]   ;;  %v10012_v9 = vld [vmem:[%s10801_s20 + $0x1230] ss:$12 sps:$4 sm:$0xff]  }
 0x232   : > { %v10014_v6 = vld [vmem:[%s10801_s20 + $0x1234] ss:$12 sps:$4 sm:$0xff]  }
 0x233   : > { %8869 = vmatpush3.bf16.msra.mxu1 %v9953_v7  ;;  %v10015_v7 = vld [vmem:[%s10801_s20 + $0xcf8] ss:$12 sps:$4 sm:$0xff]  }
 0x234   : > { %6681 = vmatpush1.bf16.msra.mxu0 %v9949_v5  ;;  %8870 = vmatprep.subr.bf16.mxu1 %v9957_v11  ;;  %v10011_v5 = vld [vmem:[%s10801_s20 + $0xc20] ss:$12 sps:$4 sm:$0xff]   ;;  %v10016_v11 = vld [vmem:[%s10801_s20 + $0xc38] ss:$12 sps:$4 sm:$0xff]  }
 0x235   : > { %6682 = vmatprep.subr.bf16.mxu0 %v9956_v10  ;;  %v10484_v10 = vld [vmem:[#allocation2 + $0x44] ss:$144 sps:$4 sm:$0xff]  }
 0x237   : > { %8871 = vmatpush3.bf16.msra.mxu1 %v9958_v14  ;;  %v10020_v14 = vld [vmem:[%s10801_s20 + $0xd10] ss:$12 sps:$4 sm:$0xff]  }
 0x238   : > { %6683 = vmatpush1.bf16.msra.mxu0 %v9954_v13  ;;  %8878 = vmatprep.subr.bf16.mxu1 %v9962_v16  ;;  %v10019_v13 = vld [vmem:[%s10801_s20 + $0x124c] ss:$12 sps:$4 sm:$0xff]   ;;  %v10021_v16 = vld [vmem:[%s10801_s20 + $0xc50] ss:$12 sps:$4 sm:$0xff]  }
 0x239   : > { %6684 = vmatprep.subr.bf16.mxu0 %v9961_v15  ;;  %v10017_v15 = vld [vmem:[%s10801_s20 + $0x1248] ss:$12 sps:$4 sm:$0xff]  }
 0x23a   : > { %7248 = vmatmul.mubr.bf16.vlgmr.msra.gmra.mrb[28].mxu1 %v10481_v22  ;;  %v10030_v22 = vld [vmem:[%s10801_s20 + $0xd40] ss:$12 sps:$4 sm:$0xff]  }
 0x23b   : > { %8879 = vmatpush3.bf16.msra.mxu1 %v9963_v18  ;;  %7288 = vmatprep.mubr.bf16.mxu1 %v10482_v26  ;;  %v10025_v18 = vld [vmem:[%s10801_s20 + $0xd28] ss:$12 sps:$4 sm:$0xff]   ;;  %v10035_v26 = vld [vmem:[%s10801_s20 + $0xd58] ss:$12 sps:$4 sm:$0xff]  }
 0x23c   : > { %6685 = vmatpush1.bf16.msra.mxu0 %v9959_v17  ;;  %8880 = vmatprep.subr.bf16.mxu1 %v9967_v20  ;;  %v10024_v17 = vld [vmem:[%s10801_s20 + $0x1264] ss:$12 sps:$4 sm:$0xff]   ;;  %v10026_v20 = vld [vmem:[%s10801_s20 + $0xc68] ss:$12 sps:$4 sm:$0xff]  }
 0x23d   : > { %6686 = vmatprep.subr.bf16.mxu0 %v9966_v19  ;;  %v10022_v19 = vld [vmem:[%s10801_s20 + $0x1260] ss:$12 sps:$4 sm:$0xff]  }
 0x23f   : > { %8881 = vmatpush3.bf16.msra.mxu1 %v9968_v23  ;;  %v10027_v23 = vld [vmem:[%s10801_s20 + $0x1278] ss:$12 sps:$4 sm:$0xff]  }
 0x240   : > { %6687 = vmatpush1.bf16.msra.mxu0 %v9964_v21  ;;  %8882 = vmatprep.subr.bf16.mxu1 %v9972_v25  ;;  %v10029_v21 = vld [vmem:[%s10801_s20 + $0x127c] ss:$12 sps:$4 sm:$0xff]   ;;  %v10034_v25 = vld [vmem:[%s10801_s20 + $0x1294] ss:$12 sps:$4 sm:$0xff]  }
 0x241   : > { %6688 = vmatprep.subr.bf16.mxu0 %v9971_v24  ;;  %v10031_v24 = vld [vmem:[%s10801_s20 + $0xc80] ss:$12 sps:$4 sm:$0xff]  }
 0x243   : > { %8883 = vmatpush3.bf16.msra.mxu1 %v9973_v28  ;;  %v10036_v28 = vld [vmem:[%s10801_s20 + $0xc98] ss:$12 sps:$4 sm:$0xff]  }
 0x244   : > { %6689 = vmatpush1.bf16.msra.mxu0 %v9969_v27  ;;  %8884 = vmatprep.subr.bf16.mxu1 %v9977_v30  ;;  %v10032_v27 = vld [vmem:[%s10801_s20 + $0x1290] ss:$12 sps:$4 sm:$0xff]  }
 0x245   : > { %6690 = vmatprep.subr.bf16.mxu0 %v9976_v29 }
 0x247   : > { %8885 = vmatpush3.bf16.msra.mxu1 %v9978_v32 }
 0x248   : > { %6691 = vmatpush1.bf16.msra.mxu0 %v9974_v31  ;;  %8886 = vmatprep.subr.bf16.mxu1 %v9982_v34 }
 0x249   : > { %6692 = vmatprep.subr.bf16.mxu0 %v9981_v33 }
 0x24b   : > { %8887 = vmatpush3.bf16.msra.mxu1 %v9983_v36  ;;  %v10040_v36 = vld [vmem:[%s10801_s20 + $0xd70] ss:$12 sps:$4 sm:$0xff]  }
 0x24c   : > { %6693 = vmatpush1.bf16.msra.mxu0 %v9979_v35  ;;  %8888 = vmatprep.subr.bf16.mxu1 %v9987_v38  ;;  %v10039_v35 = vld [vmem:[%s10801_s20 + $0x12ac] ss:$12 sps:$4 sm:$0xff]   ;;  %v10037_v38 = vld [vmem:[%s10801_s20 + $0x12a8] ss:$12 sps:$4 sm:$0xff]  }
 0x24d   : > { %6694 = vmatprep.subr.bf16.mxu0 %v9986_v37  ;;  %v8740_v45 = vpop.f32.mrb[4].mxu1 }
 0x24e   : > { %v8741_v46 = vpop.f32.mrb[5].mxu1 }
 0x24f   : > { %8889 = vmatpush3.bf16.msra.mxu1 %v9988_v40  ;;  %v11335_v47 = vadd.f32 %v8741_v46, %v8740_v45  ;;  %v8743_v48 = vpop.f32.mrb[6].mxu1  ;;  %v10046_v45 = vld [vmem:[%s10801_s20 + $0xd88] ss:$12 sps:$4 sm:$0xff]  }
 0x250   : > { %6695 = vmatpush1.bf16.msra.mxu0 %v9984_v39  ;;  %8890 = vmatprep.subr.bf16.mxu1 %v9992_v42  ;;  %v8744_v51 = vpop.f32.mrb[7].mxu1  ;;  %v10049_v46 = vld [vmem:[%s10801_s20 + $0x12dc] ss:$12 sps:$4 sm:$0xff]  }
 0x251   : > { %6696 = vmatprep.subr.bf16.mxu0 %v9991_v41  ;;  %v11340_v53 = vadd.f32 %v8744_v51, %v8743_v48  ;;  %v7004_v29 = vadd.f32 %v11335_v47, %v11281_v59  ;;  %v10044_v41 = vld [vmem:[%s10801_s20 + $0x12c4] ss:$12 sps:$4 sm:$0xff]   ;;  %v10050_v47 = vld [vmem:[%s10801_s20 + $0xe60] ss:$12 sps:$4 sm:$0xff]  }
 0x252   : > { %v10047_v48 = vld [vmem:[%s10801_s20 + $0x12d8] ss:$12 sps:$4 sm:$0xff]   ;;  %v10054_v51 = vld [vmem:[%s10801_s20 + $0x12f4] ss:$12 sps:$4 sm:$0xff]  }
 0x253   : > { %8891 = vmatpush3.bf16.msra.mxu1 %v9993_v44  ;;  %v7007_v32 = vadd.f32 %v11340_v53, %v11291_v3  ;;  %v10041_v3 = vld [vmem:[%s10801_s20 + $0xcb0] ss:$12 sps:$4 sm:$0xff]   ;;  %v10042_v44 = vld [vmem:[%s10801_s20 + $0x12c0] ss:$12 sps:$4 sm:$0xff]  }
 0x254   : > { %6697 = vmatpush1.bf16.msra.mxu0 %v9989_v43  ;;  %8892 = vmatprep.subr.bf16.mxu1 %v9997_v50  ;;  %v10045_v43 = vld [vmem:[%s10801_s20 + $0xe48] ss:$12 sps:$4 sm:$0xff]   ;;  %v10051_v50 = vld [vmem:[%s10801_s20 + $0xda0] ss:$12 sps:$4 sm:$0xff]   ;;  %v10052_v53 = vld [vmem:[%s10801_s20 + $0x12f0] ss:$12 sps:$4 sm:$0xff]  }
 0x255   : > { %6698 = vmatprep.subr.bf16.mxu0 %v9996_v49  ;;  %v10485_v49 = vld [vmem:[#allocation2 + $0x40] ss:$144 sps:$4 sm:$0xff]  }
 0x257   : > { %8893 = vmatpush3.bf16.msra.mxu1 %v9998_v54  ;;  %v10486_v54 = vld [vmem:[#allocation2 + $0x4c] ss:$144 sps:$4 sm:$0xff]  }
 0x258   : > { %6699 = vmatpush1.bf16.msra.mxu0 %v9994_v52  ;;  %8900 = vmatprep.subr.bf16.mxu1 %v10005_v56  ;;  %v10055_v52 = vld [vmem:[%s10801_s20 + $0xe78] ss:$12 sps:$4 sm:$0xff]  }
 0x259   : > { %6711 = vmatprep.subr.bf16.mxu0 %v10004_v55  ;;  %v10056_v55 = vld [vmem:[%s10801_s20 + $0xdb8] ss:$12 sps:$4 sm:$0xff]  }
 0x25a   : > { %7289 = vmatmul.mubr.bf16.vlgmr.msra.gmra.mrb[32].mxu1 %v10483_v1  ;;  %v10059_v56 = vld [vmem:[%s10801_s20 + $0x130c] ss:$12 sps:$4 sm:$0xff]   ;;  %v10069_v1 = vld [vmem:[%s10801_s20 + $0x133c] ss:$12 sps:$4 sm:$0xff]  }
 0x25b   : > { %6701 = vmatmul.mubr.bf16.vlgmr.msra.gmra.mrb[0].mxu0 %v9999_v57  ;;  %8901 = vmatpush3.bf16.msra.mxu1 %v10006_v60  ;;  %v10060_v57 = vld [vmem:[%s10801_s20 + $0xe90] ss:$12 sps:$4 sm:$0xff]  }
 0x25c   : > { %6712 = vmatpush1.bf16.msra.mxu0 %v10002_v58  ;;  %8902 = vmatprep.subr.bf16.mxu1 %v10010_v62  ;;  %v10057_v58 = vld [vmem:[%s10801_s20 + $0x1308] ss:$12 sps:$4 sm:$0xff]   ;;  %v10061_v60 = vld [vmem:[%s10801_s20 + $0xdd0] ss:$12 sps:$4 sm:$0xff]  }
 0x25d   : > { %6713 = vmatprep.subr.bf16.mxu0 %v10009_v61  ;;  %7329 = vmatprep.mubr.bf16.mxu1 %v10484_v10  ;;  %v10064_v61 = vld [vmem:[%s10801_s20 + $0x1324] ss:$12 sps:$4 sm:$0xff]   ;;  %v10065_v62 = vld [vmem:[%s10801_s20 + $0xea8] ss:$12 sps:$4 sm:$0xff]  }
 0x25e   : > { %6743 = vmatprep.mubr.bf16.mxu0 %v10084_v0  ;;  %v10066_v0 = vld [vmem:[%s10801_s20 + $0xde8] ss:$12 sps:$4 sm:$0xff]   ;;  %v10075_v10 = vld [vmem:[%s10801_s20 + $0xed8] ss:$12 sps:$4 sm:$0xff]  }
 0x25f   : > { %8903 = vmatpush3.bf16.msra.mxu1 %v10011_v5  ;;  %v10070_v5 = vld [vmem:[%s10801_s20 + $0xec0] ss:$12 sps:$4 sm:$0xff]  }
 0x260   : > { %6714 = vmatpush1.bf16.msra.mxu0 %v10007_v63  ;;  %8904 = vmatprep.subr.bf16.mxu1 %v10015_v7  ;;  %v10062_v63 = vld [vmem:[%s10801_s20 + $0x1320] ss:$12 sps:$4 sm:$0xff]  }
 0x261   : > { %6715 = vmatprep.subr.bf16.mxu0 %v10014_v6  ;;  %v10067_v6 = vld [vmem:[%s10801_s20 + $0x1338] ss:$12 sps:$4 sm:$0xff]   ;;  %v10071_v7 = vld [vmem:[%s10801_s20 + $0xe00] ss:$12 sps:$4 sm:$0xff]  }
 0x263   : > { %8905 = vmatpush3.bf16.msra.mxu1 %v10016_v11 }
 0x264   : > { %6716 = vmatpush1.bf16.msra.mxu0 %v10012_v9  ;;  %8906 = vmatprep.subr.bf16.mxu1 %v10020_v14  ;;  %v10074_v9 = vld [vmem:[%s10801_s20 + $0x1354] ss:$12 sps:$4 sm:$0xff]   ;;  %v10076_v14 = vld [vmem:[%s10801_s20 + $0xe18] ss:$12 sps:$4 sm:$0xff]  }
 0x265   : > { %6717 = vmatprep.subr.bf16.mxu0 %v10019_v13  ;;  %v10072_v13 = vld [vmem:[%s10801_s20 + $0x1350] ss:$12 sps:$4 sm:$0xff]  }
 0x267   : > { %8907 = vmatpush3.bf16.msra.mxu1 %v10021_v16 }
 0x268   : > { %6718 = vmatpush1.bf16.msra.mxu0 %v10017_v15  ;;  %8908 = vmatprep.subr.bf16.mxu1 %v10025_v18 }
 0x269   : > { %6719 = vmatprep.subr.bf16.mxu0 %v10024_v17 }
 0x26b   : > { %8909 = vmatpush3.bf16.msra.mxu1 %v10026_v20  ;;  %v10080_v20 = vld [vmem:[%s10801_s20 + $0xef0] ss:$12 sps:$4 sm:$0xff]  }
 0x26c   : > { %6720 = vmatpush1.bf16.msra.mxu0 %v10022_v19  ;;  %8910 = vmatprep.subr.bf16.mxu1 %v10030_v22  ;;  %v10079_v19 = vld [vmem:[%s10801_s20 + $0x136c] ss:$12 sps:$4 sm:$0xff]  }
 0x26d   : > { %6721 = vmatprep.subr.bf16.mxu0 %v10029_v21  ;;  %v8762_v30 = vpop.f32.mrb[8].mxu1 }
 0x26e   : > { %v8763_v31 = vpop.f32.mrb[9].mxu1 }
 0x26f   : > { %8911 = vmatpush3.bf16.msra.mxu1 %v10031_v24  ;;  %v8764_v33 = vadd.f32 %v8763_v31, %v8762_v30  ;;  %v8765_v34 = vpop.f32.mrb[10].mxu1  ;;  %v10089_v30 = vld [vmem:[%s10801_s20 + $0xf08] ss:$12 sps:$4 sm:$0xff]  }
 0x270   : > { %6722 = vmatpush1.bf16.msra.mxu0 %v10027_v23  ;;  %8912 = vmatprep.subr.bf16.mxu1 %v10035_v26  ;;  %v8766_v37 = vpop.f32.mrb[11].mxu1  ;;  %v10077_v23 = vld [vmem:[%s10801_s20 + $0x1368] ss:$12 sps:$4 sm:$0xff]   ;;  %v10087_v26 = vld [vmem:[%s10801_s20 + $0x1384] ss:$12 sps:$4 sm:$0xff]  }
 0x271   : > { %6723 = vmatprep.subr.bf16.mxu0 %v10034_v25  ;;  %v11378_v39 = vadd.f32 %v8764_v33, %v7004_v29  ;;  %v8767_v40 = vadd.f32 %v8766_v37, %v8765_v34  ;;  %v10081_v25 = vld [vmem:[%s10801_s20 + $0xe30] ss:$12 sps:$4 sm:$0xff]   ;;  %v10085_v29 = vld [vmem:[%s10801_s20 + $0x1380] ss:$12 sps:$4 sm:$0xff]   ;;  %v10090_v33 = vld [vmem:[%s10801_s20 + $0x1398] ss:$12 sps:$4 sm:$0xff]  }
 0x272   : > { %v10092_v31 = vld [vmem:[%s10801_s20 + $0x139c] ss:$12 sps:$4 sm:$0xff]   ;;  %v10097_v37 = vld [vmem:[%s10801_s20 + $0x13b4] ss:$12 sps:$4 sm:$0xff]  }
 0x273   : > { %8913 = vmatpush3.bf16.msra.mxu1 %v10036_v28  ;;  %v11382_v42 = vadd.f32 %v8767_v40, %v7007_v32  ;;  %v11423_v28 = vld [vmem:[#allocation2 + $0x60] ss:$144 sps:$4 sm:$0xff]   ;;  %v11430_v34 = vld [vmem:[#allocation2 + $0x6c] ss:$144 sps:$4 sm:$0xff]   ;;  %v10488_v40 = vld [vmem:[#allocation2 + $0x54] ss:$144 sps:$4 sm:$0xff]  }
 0x274   : > { %6724 = vmatpush1.bf16.msra.mxu0 %v10032_v27  ;;  %8914 = vmatprep.subr.bf16.mxu1 %v10040_v36  ;;  %v10088_v27 = vld [vmem:[%s10801_s20 + $0xfc8] ss:$12 sps:$4 sm:$0xff]   ;;  %v10093_v32 = vld [vmem:[%s10801_s20 + $0xfe0] ss:$12 sps:$4 sm:$0xff]  }
 0x275   : > { %6725 = vmatprep.subr.bf16.mxu0 %v10039_v35  ;;  %v10487_v35 = vld [vmem:[#allocation2 + $0x48] ss:$144 sps:$4 sm:$0xff]   ;;  %v10094_v36 = vld [vmem:[%s10801_s20 + $0xf20] ss:$12 sps:$4 sm:$0xff]  }
 0x277   : > { %8915 = vmatpush3.bf16.msra.mxu1 %v10041_v3  ;;  %v10099_v3 = vld [vmem:[%s10801_s20 + $0xf38] ss:$12 sps:$4 sm:$0xff]  }
 0x278   : > { %6726 = vmatpush1.bf16.msra.mxu0 %v10037_v38  ;;  %8922 = vmatprep.subr.bf16.mxu1 %v10045_v43  ;;  %v10098_v38 = vld [vmem:[%s10801_s20 + $0xff8] ss:$12 sps:$4 sm:$0xff]   ;;  %v10100_v43 = vld [vmem:[%s10801_s20 + $0x13c8] ss:$12 sps:$4 sm:$0xff]  }
 0x279   : > { %6727 = vmatprep.subr.bf16.mxu0 %v10044_v41  ;;  %v10102_v41 = vld [vmem:[%s10801_s20 + $0x13cc] ss:$12 sps:$4 sm:$0xff]  }
 0x27a   : > { %7330 = vmatmul.mubr.bf16.vlgmr.msra.gmra.mrb[36].mxu1 %v10485_v49  ;;  %v10112_v49 = vld [vmem:[%s10801_s20 + $0x13fc] ss:$12 sps:$4 sm:$0xff]  }
 0x27b   : > { %8923 = vmatpush3.bf16.msra.mxu1 %v10046_v45  ;;  %7370 = vmatprep.mubr.bf16.mxu1 %v10486_v54  ;;  %v10107_v45 = vld [vmem:[%s10801_s20 + $0x13e4] ss:$12 sps:$4 sm:$0xff]  }
 0x27c   : > { %6728 = vmatpush1.bf16.msra.mxu0 %v10042_v44  ;;  %8924 = vmatprep.subr.bf16.mxu1 %v10050_v47  ;;  %v10104_v44 = vld [vmem:[%s10801_s20 + $0xf50] ss:$12 sps:$4 sm:$0xff]   ;;  %v10105_v47 = vld [vmem:[%s10801_s20 + $0x13e0] ss:$12 sps:$4 sm:$0xff]   ;;  %v10118_v54 = vld [vmem:[%s10801_s20 + $0x1058] ss:$12 sps:$4 sm:$0xff]  }
 0x27d   : > { %6729 = vmatprep.subr.bf16.mxu0 %v10049_v46  ;;  %v10108_v46 = vld [vmem:[%s10801_s20 + $0x1028] ss:$12 sps:$4 sm:$0xff]  }
 0x27f   : > { %8925 = vmatpush3.bf16.msra.mxu1 %v10051_v50  ;;  %v10113_v50 = vld [vmem:[%s10801_s20 + $0x1040] ss:$12 sps:$4 sm:$0xff]  }
 0x280   : > { %6730 = vmatpush1.bf16.msra.mxu0 %v10047_v48  ;;  %8926 = vmatprep.subr.bf16.mxu1 %v10055_v52  ;;  %v10109_v48 = vld [vmem:[%s10801_s20 + $0xf68] ss:$12 sps:$4 sm:$0xff]   ;;  %v10114_v52 = vld [vmem:[%s10801_s20 + $0xf80] ss:$12 sps:$4 sm:$0xff]  }
 0x281   : > { %6731 = vmatprep.subr.bf16.mxu0 %v10054_v51  ;;  %v10110_v51 = vld [vmem:[%s10801_s20 + $0x13f8] ss:$12 sps:$4 sm:$0xff]  }
 0x283   : > { %8927 = vmatpush3.bf16.msra.mxu1 %v10056_v55 }
 0x284   : > { %6732 = vmatpush1.bf16.msra.mxu0 %v10052_v53  ;;  %8928 = vmatprep.subr.bf16.mxu1 %v10060_v57  ;;  %v10117_v53 = vld [vmem:[%s10801_s20 + $0x1414] ss:$12 sps:$4 sm:$0xff]   ;;  %v10119_v57 = vld [vmem:[%s10801_s20 + $0xf98] ss:$12 sps:$4 sm:$0xff]  }
 0x285   : > { %6733 = vmatprep.subr.bf16.mxu0 %v10059_v56  ;;  %v10115_v56 = vld [vmem:[%s10801_s20 + $0x1410] ss:$12 sps:$4 sm:$0xff]  }
 0x287   : > { %8929 = vmatpush3.bf16.msra.mxu1 %v10061_v60 }
 0x288   : > { %6734 = vmatpush1.bf16.msra.mxu0 %v10057_v58  ;;  %8930 = vmatprep.subr.bf16.mxu1 %v10065_v62 }
 0x289   : > { %6735 = vmatprep.subr.bf16.mxu0 %v10064_v61 }
 0x28b   : > { %8931 = vmatpush3.bf16.msra.mxu1 %v10066_v0  ;;  %v10123_v0 = vld [vmem:[%s10801_s20 + $0x1070] ss:$12 sps:$4 sm:$0xff]  }
 0x28c   : > { %6736 = vmatpush1.bf16.msra.mxu0 %v10062_v63  ;;  %8932 = vmatprep.subr.bf16.mxu1 %v10070_v5  ;;  %v10122_v63 = vld [vmem:[%s10801_s20 + $0x142c] ss:$12 sps:$4 sm:$0xff]  }
 0x28d   : > { %6737 = vmatprep.subr.bf16.mxu0 %v10069_v1  ;;  %v8784_v11 = vpop.f32.mrb[12].mxu1 }
 0x28e   : > { %v8785_v15 = vpop.f32.mrb[13].mxu1 }
 0x28f   : > { %v8786_v16 = vadd.f32 %v8785_v15, %v8784_v11  ;;  %v8787_v17 = vpop.f32.mrb[14].mxu1  ;;  %8933 = vmatpush3.bf16.msra.mxu1 %v10071_v7  ;;  %v10128_v11 = vld [vmem:[%s10801_s20 + $0x1148] ss:$12 sps:$4 sm:$0xff]  }
 0x290   : > { %6738 = vmatpush1.bf16.msra.mxu0 %v10067_v6  ;;  %v8788_v18 = vpop.f32.mrb[15].mxu1  ;;  %8934 = vmatprep.subr.bf16.mxu1 %v10075_v10  ;;  %v10120_v6 = vld [vmem:[%s10801_s20 + $0x1428] ss:$12 sps:$4 sm:$0xff]   ;;  %v10127_v10 = vld [vmem:[%s10801_s20 + $0x1444] ss:$12 sps:$4 sm:$0xff]  }
 0x291   : > { %6739 = vmatprep.subr.bf16.mxu0 %v10074_v9  ;;  %v11414_v21 = vadd.f32 %v8786_v16, %v11378_v39  ;;  %v8789_v22 = vadd.f32 %v8788_v18, %v8787_v17  ;;  %v10095_v39 = vld [vmem:[%s10801_s20 + $0x13b0] ss:$12 sps:$4 sm:$0xff]   ;;  %v10133_v16 = vld [vmem:[%s10801_s20 + $0x1160] ss:$12 sps:$4 sm:$0xff]   ;;  %v10130_v17 = vld [vmem:[%s10801_s20 + $0x1458] ss:$12 sps:$4 sm:$0xff]  }
 0x292   : > { %v10124_v9 = vld [vmem:[%s10801_s20 + $0xfb0] ss:$12 sps:$4 sm:$0xff]  }
 0x293   : > { %v11418_v24 = vadd.f32 %v8789_v22, %v11382_v42  ;;  %8935 = vmatpush3.bf16.msra.mxu1 %v10076_v14  ;;  %v10103_v42 = vld [vmem:[%s10801_s20 + $0x1010] ss:$12 sps:$4 sm:$0xff]   ;;  %v10129_v14 = vld [vmem:[%s10801_s20 + $0x1088] ss:$12 sps:$4 sm:$0xff]  }
 0x294   : > { %6740 = vmatpush1.bf16.msra.mxu0 %v10072_v13  ;;  %8936 = vmatprep.subr.bf16.mxu1 %v10080_v20  ;;  %v10125_v13 = vld [vmem:[%s10801_s20 + $0x1440] ss:$12 sps:$4 sm:$0xff]   ;;  %v10132_v15 = vld [vmem:[%s10801_s20 + $0x145c] ss:$12 sps:$4 sm:$0xff]  }
 0x295   : > { %6741 = vmatprep.subr.bf16.mxu0 %v10079_v19  ;;  %v10489_v18 = vld [vmem:[#allocation2 + $0x50] ss:$144 sps:$4 sm:$0xff]  }
 0x296   : > { %v10134_v19 = vld [vmem:[%s10801_s20 + $0x10a0] ss:$12 sps:$4 sm:$0xff]   ;;  %v10135_v22 = vld [vmem:[%s10801_s20 + $0x1470] ss:$12 sps:$4 sm:$0xff]  }
 0x297   : > { %8937 = vmatpush3.bf16.msra.mxu1 %v10081_v25  ;;  %v10137_v20 = vld [vmem:[%s10801_s20 + $0x1474] ss:$12 sps:$4 sm:$0xff]   ;;  %v10142_v25 = vld [vmem:[%s10801_s20 + $0x148c] ss:$12 sps:$4 sm:$0xff]  }
 0x298   : > { %6742 = vmatpush1.bf16.msra.mxu0 %v10077_v23  ;;  %8944 = vmatprep.subr.bf16.mxu1 %v10088_v27  ;;  %v10490_v23 = vld [vmem:[#allocation2 + $0x5c] ss:$144 sps:$4 sm:$0xff]   ;;  %v10140_v27 = vld [vmem:[%s10801_s20 + $0x1488] ss:$12 sps:$4 sm:$0xff]  }
 0x299   : > { %6754 = vmatprep.subr.bf16.mxu0 %v10087_v26  ;;  %v10143_v26 = vld [vmem:[%s10801_s20 + $0x1190] ss:$12 sps:$4 sm:$0xff]  }
 0x29a   : > { %7371 = vmatmul.mubr.bf16.vlgmr.msra.gmra.mrb[40].mxu1 %v10487_v35  ;;  %v10152_v35 = vld [vmem:[%s10801_s20 + $0x14bc] ss:$12 sps:$4 sm:$0xff]  }
 0x29b   : > { %6744 = vmatmul.mubr.bf16.vlgmr.msra.gmra.mrb[0].mxu0 %v11423_v28  ;;  %8945 = vmatpush3.bf16.msra.mxu1 %v10089_v30  ;;  %v10147_v30 = vld [vmem:[%s10801_s20 + $0x14a4] ss:$12 sps:$4 sm:$0xff]  }
 0x29c   : > { %6755 = vmatpush1.bf16.msra.mxu0 %v10085_v29  ;;  %8946 = vmatprep.subr.bf16.mxu1 %v10093_v32  ;;  %v10144_v29 = vld [vmem:[%s10801_s20 + $0x10d0] ss:$12 sps:$4 sm:$0xff]   ;;  %v10145_v32 = vld [vmem:[%s10801_s20 + $0x14a0] ss:$12 sps:$4 sm:$0xff]  }
 0x29d   : > { %6756 = vmatprep.subr.bf16.mxu0 %v10092_v31  ;;  %7411 = vmatprep.mubr.bf16.mxu1 %v10488_v40  ;;  %v10148_v31 = vld [vmem:[%s10801_s20 + $0x11a8] ss:$12 sps:$4 sm:$0xff]   ;;  %v10158_v40 = vld [vmem:[%s10801_s20 + $0x11d8] ss:$12 sps:$4 sm:$0xff]  }
 0x29e   : > { %6786 = vmatprep.mubr.bf16.mxu0 %v11430_v34 }
 0x29f   : > { %8947 = vmatpush3.bf16.msra.mxu1 %v10094_v36  ;;  %v10153_v36 = vld [vmem:[%s10801_s20 + $0x11c0] ss:$12 sps:$4 sm:$0xff]  }
 0x2a0   : > { %6757 = vmatpush1.bf16.msra.mxu0 %v10090_v33  ;;  %8948 = vmatprep.subr.bf16.mxu1 %v10098_v38  ;;  %v10149_v33 = vld [vmem:[%s10801_s20 + $0x10e8] ss:$12 sps:$4 sm:$0xff]   ;;  %v10154_v38 = vld [vmem:[%s10801_s20 + $0x1100] ss:$12 sps:$4 sm:$0xff]  }
 0x2a1   : > { %6758 = vmatprep.subr.bf16.mxu0 %v10097_v37  ;;  %v10150_v37 = vld [vmem:[%s10801_s20 + $0x14b8] ss:$12 sps:$4 sm:$0xff]  }
 0x2a3   : > { %8949 = vmatpush3.bf16.msra.mxu1 %v10099_v3 }
 0x2a4   : > { %6759 = vmatpush1.bf16.msra.mxu0 %v10095_v39  ;;  %8950 = vmatprep.subr.bf16.mxu1 %v10103_v42  ;;  %v10157_v39 = vld [vmem:[%s10801_s20 + $0x14d4] ss:$12 sps:$4 sm:$0xff]   ;;  %v10159_v42 = vld [vmem:[%s10801_s20 + $0x1118] ss:$12 sps:$4 sm:$0xff]  }
 0x2a5   : > { %6760 = vmatprep.subr.bf16.mxu0 %v10102_v41  ;;  %v10155_v41 = vld [vmem:[%s10801_s20 + $0x14d0] ss:$12 sps:$4 sm:$0xff]  }
 0x2a7   : > { %8951 = vmatpush3.bf16.msra.mxu1 %v10104_v44 }
 0x2a8   : > { %6761 = vmatpush1.bf16.msra.mxu0 %v10100_v43  ;;  %8952 = vmatprep.subr.bf16.mxu1 %v10108_v46 }
 0x2a9   : > { %6762 = vmatprep.subr.bf16.mxu0 %v10107_v45 }
 0x2ab   : > { %8953 = vmatpush3.bf16.msra.mxu1 %v10109_v48  ;;  %v10163_v48 = vld [vmem:[%s10801_s20 + $0x11f0] ss:$12 sps:$4 sm:$0xff]  }
 0x2ac   : > { %6763 = vmatpush1.bf16.msra.mxu0 %v10105_v47  ;;  %8954 = vmatprep.subr.bf16.mxu1 %v10113_v50  ;;  %v10162_v47 = vld [vmem:[%s10801_s20 + $0x14ec] ss:$12 sps:$4 sm:$0xff]  }
 0x2ad   : > { %6764 = vmatprep.subr.bf16.mxu0 %v10112_v49  ;;  %v8806_v55 = vpop.f32.mrb[16].mxu1 }
 0x2ae   : > { %v8807_v58 = vpop.f32.mrb[17].mxu1 }
 0x2af   : > { %v8808_v60 = vadd.f32 %v8807_v58, %v8806_v55  ;;  %v8809_v61 = vpop.f32.mrb[18].mxu1  ;;  %8955 = vmatpush3.bf16.msra.mxu1 %v10114_v52  ;;  %v10171_v55 = vld [vmem:[%s10801_s20 + $0x12c8] ss:$12 sps:$4 sm:$0xff]  }
 0x2b0   : > { %6765 = vmatpush1.bf16.msra.mxu0 %v10110_v51  ;;  %v8810_v62 = vpop.f32.mrb[19].mxu1  ;;  %8956 = vmatprep.subr.bf16.mxu1 %v10118_v54  ;;  %v10160_v51 = vld [vmem:[%s10801_s20 + $0x14e8] ss:$12 sps:$4 sm:$0xff]   ;;  %v10170_v54 = vld [vmem:[%s10801_s20 + $0x1504] ss:$12 sps:$4 sm:$0xff]  }
 0x2b1   : > { %6766 = vmatprep.subr.bf16.mxu0 %v10117_v53  ;;  %v11458_v1 = vadd.f32 %v8808_v60, %v11414_v21  ;;  %v8811_v5 = vadd.f32 %v8810_v62, %v8809_v61  ;;  %v10138_v21 = vld [vmem:[%s10801_s20 + $0x1178] ss:$12 sps:$4 sm:$0xff]   ;;  %v10164_v53 = vld [vmem:[%s10801_s20 + $0x1130] ss:$12 sps:$4 sm:$0xff]   ;;  %v10172_v58 = vld [vmem:[%s10801_s20 + $0x1208] ss:$12 sps:$4 sm:$0xff]  }
 0x2b2   : > { %v10175_v60 = vld [vmem:[%s10801_s20 + $0x151c] ss:$12 sps:$4 sm:$0xff]   ;;  %v10176_v61 = vld [vmem:[%s10801_s20 + $0x12e0] ss:$12 sps:$4 sm:$0xff]   ;;  %v10173_v62 = vld [vmem:[%s10801_s20 + $0x1518] ss:$12 sps:$4 sm:$0xff]  }
 0x2b3   : > { %v11462_v7 = vadd.f32 %v8811_v5, %v11418_v24  ;;  %8957 = vmatpush3.bf16.msra.mxu1 %v10119_v57  ;;  %v10139_v24 = vld [vmem:[%s10801_s20 + $0x10b8] ss:$12 sps:$4 sm:$0xff]   ;;  %v10168_v57 = vld [vmem:[%s10801_s20 + $0x1500] ss:$12 sps:$4 sm:$0xff]  }
 0x2b4   : > { %6767 = vmatpush1.bf16.msra.mxu0 %v10115_v56  ;;  %8958 = vmatprep.subr.bf16.mxu1 %v10123_v0  ;;  %v11505_v56 = vld [vmem:[#allocation2 + $0x68] ss:$144 sps:$4 sm:$0xff]   ;;  %v10180_v5 = vld [vmem:[%s10801_s20 + $0x1534] ss:$12 sps:$4 sm:$0xff]  }
 0x2b5   : > { %6768 = vmatprep.subr.bf16.mxu0 %v10122_v63  ;;  %v11512_v63 = vld [vmem:[#allocation2 + $0x74] ss:$144 sps:$4 sm:$0xff]   ;;  %v10491_v0 = vld [vmem:[#allocation2 + $0x58] ss:$144 sps:$4 sm:$0xff]  }
 0x2b7   : > { %8959 = vmatpush3.bf16.msra.mxu1 %v10124_v9  ;;  %v10492_v9 = vld [vmem:[#allocation2 + $0x64] ss:$144 sps:$4 sm:$0xff]  }
 0x2b8   : > { %6769 = vmatpush1.bf16.msra.mxu0 %v10120_v6  ;;  %8966 = vmatprep.subr.bf16.mxu1 %v10128_v11  ;;  %v10181_v6 = vld [vmem:[%s10801_s20 + $0x12f8] ss:$12 sps:$4 sm:$0xff]  }
 0x2b9   : > { %6770 = vmatprep.subr.bf16.mxu0 %v10127_v10  ;;  %v10182_v10 = vld [vmem:[%s10801_s20 + $0x1238] ss:$12 sps:$4 sm:$0xff]  }
 0x2ba   : > { %7412 = vmatmul.mubr.bf16.vlgmr.msra.gmra.mrb[44].mxu1 %v10489_v18  ;;  %v10185_v11 = vld [vmem:[%s10801_s20 + $0x154c] ss:$12 sps:$4 sm:$0xff]  }
 0x2bb   : > { %8967 = vmatpush3.bf16.msra.mxu1 %v10129_v14  ;;  %7452 = vmatprep.mubr.bf16.mxu1 %v10490_v23  ;;  %v10183_v14 = vld [vmem:[%s10801_s20 + $0x1548] ss:$12 sps:$4 sm:$0xff]   ;;  %v10188_v18 = vld [vmem:[%s10801_s20 + $0x1560] ss:$12 sps:$4 sm:$0xff]  }
 0x2bc   : > { %6771 = vmatpush1.bf16.msra.mxu0 %v10125_v13  ;;  %8968 = vmatprep.subr.bf16.mxu1 %v10133_v16  ;;  %v10186_v13 = vld [vmem:[%s10801_s20 + $0x1310] ss:$12 sps:$4 sm:$0xff]   ;;  %v10197_v23 = vld [vmem:[%s10801_s20 + $0x1280] ss:$12 sps:$4 sm:$0xff]  }
 0x2bd   : > { %6772 = vmatprep.subr.bf16.mxu0 %v10132_v15  ;;  %v10187_v15 = vld [vmem:[%s10801_s20 + $0x1250] ss:$12 sps:$4 sm:$0xff]  }
 0x2be   : > { %v10190_v16 = vld [vmem:[%s10801_s20 + $0x1564] ss:$12 sps:$4 sm:$0xff]  }
 0x2bf   : > { %8969 = vmatpush3.bf16.msra.mxu1 %v10134_v19  ;;  %v10192_v19 = vld [vmem:[%s10801_s20 + $0x1268] ss:$12 sps:$4 sm:$0xff]  }
 0x2c0   : > { %6773 = vmatpush1.bf16.msra.mxu0 %v10130_v17  ;;  %8970 = vmatprep.subr.bf16.mxu1 %v10138_v21  ;;  %v10191_v17 = vld [vmem:[%s10801_s20 + $0x1328] ss:$12 sps:$4 sm:$0xff]   ;;  %v10196_v21 = vld [vmem:[%s10801_s20 + $0x1340] ss:$12 sps:$4 sm:$0xff]  }
 0x2c1   : > { %6774 = vmatprep.subr.bf16.mxu0 %v10137_v20  ;;  %v10195_v20 = vld [vmem:[%s10801_s20 + $0x157c] ss:$12 sps:$4 sm:$0xff]  }
 0x2c3   : > { %8971 = vmatpush3.bf16.msra.mxu1 %v10139_v24  ;;  %v10200_v24 = vld [vmem:[%s10801_s20 + $0x1594] ss:$12 sps:$4 sm:$0xff]  }
 0x2c4   : > { %6775 = vmatpush1.bf16.msra.mxu0 %v10135_v22  ;;  %8972 = vmatprep.subr.bf16.mxu1 %v10143_v26  ;;  %v10193_v22 = vld [vmem:[%s10801_s20 + $0x1578] ss:$12 sps:$4 sm:$0xff]  }
 0x2c5   : > { %6776 = vmatprep.subr.bf16.mxu0 %v10142_v25  ;;  %v10201_v25 = vld [vmem:[%s10801_s20 + $0x1358] ss:$12 sps:$4 sm:$0xff]  }
 0x2c7   : > { %8973 = vmatpush3.bf16.msra.mxu1 %v10144_v29  ;;  %v10202_v29 = vld [vmem:[%s10801_s20 + $0x1298] ss:$12 sps:$4 sm:$0xff]  }
 0x2c8   : > { %6777 = vmatpush1.bf16.msra.mxu0 %v10140_v27  ;;  %8974 = vmatprep.subr.bf16.mxu1 %v10148_v31  ;;  %v10198_v27 = vld [vmem:[%s10801_s20 + $0x1590] ss:$12 sps:$4 sm:$0xff]  }
 0x2c9   : > { %6778 = vmatprep.subr.bf16.mxu0 %v10147_v30 }
 0x2cb   : > { %8975 = vmatpush3.bf16.msra.mxu1 %v10149_v33 }
 0x2cc   : > { %6779 = vmatpush1.bf16.msra.mxu0 %v10145_v32  ;;  %8976 = vmatprep.subr.bf16.mxu1 %v10153_v36  ;;  %v10206_v36 = vld [vmem:[%s10801_s20 + $0x1370] ss:$12 sps:$4 sm:$0xff]  }
 0x2cd   : > { %6780 = vmatprep.subr.bf16.mxu0 %v10152_v35  ;;  %v8828_v3 = vpop.f32.mrb[20].mxu1  ;;  %v10205_v35 = vld [vmem:[%s10801_s20 + $0x15ac] ss:$12 sps:$4 sm:$0xff]  }
 0x2ce   : > { %v8829_v43 = vpop.f32.mrb[21].mxu1 }
 0x2cf   : > { %v8830_v44 = vadd.f32 %v8829_v43, %v8828_v3  ;;  %v8831_v45 = vpop.f32.mrb[22].mxu1  ;;  %8977 = vmatpush3.bf16.msra.mxu1 %v10154_v38  ;;  %v10207_v3 = vld [vmem:[%s10801_s20 + $0x12b0] ss:$12 sps:$4 sm:$0xff]   ;;  %v10208_v43 = vld [vmem:[%s10801_s20 + $0x15c0] ss:$12 sps:$4 sm:$0xff]  }
 0x2d0   : > { %6781 = vmatpush1.bf16.msra.mxu0 %v10150_v37  ;;  %v8832_v46 = vpop.f32.mrb[23].mxu1  ;;  %8978 = vmatprep.subr.bf16.mxu1 %v10158_v40 }
 0x2d1   : > { %6782 = vmatprep.subr.bf16.mxu0 %v10157_v39  ;;  %v11496_v49 = vadd.f32 %v8830_v44, %v11458_v1  ;;  %v8833_v50 = vadd.f32 %v8832_v46, %v8831_v45  ;;  %v10177_v1 = vld [vmem:[%s10801_s20 + $0x1220] ss:$12 sps:$4 sm:$0xff]   ;;  %v10203_v39 = vld [vmem:[%s10801_s20 + $0x15a8] ss:$12 sps:$4 sm:$0xff]  }
 0x2d2   : > { %v10212_v44 = vld [vmem:[%s10801_s20 + $0x1388] ss:$12 sps:$4 sm:$0xff]   ;;  %v10216_v46 = vld [vmem:[%s10801_s20 + $0x1460] ss:$12 sps:$4 sm:$0xff]  }
 0x2d3   : > { %v11500_v52 = vadd.f32 %v8833_v50, %v11462_v7  ;;  %8979 = vmatpush3.bf16.msra.mxu1 %v10159_v42  ;;  %v10178_v7 = vld [vmem:[%s10801_s20 + $0x1530] ss:$12 sps:$4 sm:$0xff]   ;;  %v10211_v42 = vld [vmem:[%s10801_s20 + $0x1448] ss:$12 sps:$4 sm:$0xff]   ;;  %v10221_v50 = vld [vmem:[%s10801_s20 + $0x1478] ss:$12 sps:$4 sm:$0xff]  }
 0x2d4   : > { %6783 = vmatpush1.bf16.msra.mxu0 %v10155_v41  ;;  %8980 = vmatprep.subr.bf16.mxu1 %v10163_v48  ;;  %v10210_v41 = vld [vmem:[%s10801_s20 + $0x15c4] ss:$12 sps:$4 sm:$0xff]   ;;  %v10215_v45 = vld [vmem:[%s10801_s20 + $0x15dc] ss:$12 sps:$4 sm:$0xff]   ;;  %v10217_v48 = vld [vmem:[%s10801_s20 + $0x13a0] ss:$12 sps:$4 sm:$0xff]  }
 0x2d5   : > { %6784 = vmatprep.subr.bf16.mxu0 %v10162_v47  ;;  %v10213_v47 = vld [vmem:[%s10801_s20 + $0x15d8] ss:$12 sps:$4 sm:$0xff]  }
 0x2d7   : > { %8981 = vmatpush3.bf16.msra.mxu1 %v10164_v53  ;;  %v10226_v53 = vld [vmem:[%s10801_s20 + $0x1490] ss:$12 sps:$4 sm:$0xff]  }
 0x2d8   : > { %6785 = vmatpush1.bf16.msra.mxu0 %v10160_v51  ;;  %8988 = vmatprep.subr.bf16.mxu1 %v10171_v55  ;;  %v10218_v51 = vld [vmem:[%s10801_s20 + $0x15f0] ss:$12 sps:$4 sm:$0xff]  }
 0x2d9   : > { %6797 = vmatprep.subr.bf16.mxu0 %v10170_v54  ;;  %v10223_v54 = vld [vmem:[%s10801_s20 + $0x1608] ss:$12 sps:$4 sm:$0xff]   ;;  %v10227_v55 = vld [vmem:[%s10801_s20 + $0x13d0] ss:$12 sps:$4 sm:$0xff]  }
 0x2da   : > { %7453 = vmatmul.mubr.bf16.vlgmr.msra.gmra.mrb[48].mxu1 %v10491_v0  ;;  %v10233_v0 = vld [vmem:[%s10801_s20 + $0x1638] ss:$12 sps:$4 sm:$0xff]  }
 0x2db   : > { %6787 = vmatmul.mubr.bf16.vlgmr.msra.gmra.mrb[0].mxu0 %v11505_v56  ;;  %8989 = vmatpush3.bf16.msra.mxu1 %v10172_v58  ;;  %v10228_v58 = vld [vmem:[%s10801_s20 + $0x1620] ss:$12 sps:$4 sm:$0xff]  }
 0x2dc   : > { %6798 = vmatpush1.bf16.msra.mxu0 %v10168_v57  ;;  %8990 = vmatprep.subr.bf16.mxu1 %v10176_v61  ;;  %v10231_v57 = vld [vmem:[%s10801_s20 + $0x14a8] ss:$12 sps:$4 sm:$0xff]  }
 0x2dd   : > { %6799 = vmatprep.subr.bf16.mxu0 %v10175_v60  ;;  %7493 = vmatprep.mubr.bf16.mxu1 %v10492_v9  ;;  %v10232_v60 = vld [vmem:[%s10801_s20 + $0x13e8] ss:$12 sps:$4 sm:$0xff]  }
 0x2de   : > { %6829 = vmatprep.mubr.bf16.mxu0 %v11512_v63  ;;  %v10235_v61 = vld [vmem:[%s10801_s20 + $0x163c] ss:$12 sps:$4 sm:$0xff]  }
 0x2df   : > { %8991 = vmatpush3.bf16.msra.mxu1 %v10177_v1  ;;  %v10237_v1 = vld [vmem:[%s10801_s20 + $0x1400] ss:$12 sps:$4 sm:$0xff]  }
 0x2e0   : > { %6800 = vmatpush1.bf16.msra.mxu0 %v10173_v62  ;;  %8992 = vmatprep.subr.bf16.mxu1 %v10181_v6  ;;  %v10236_v62 = vld [vmem:[%s10801_s20 + $0x14c0] ss:$12 sps:$4 sm:$0xff]   ;;  %v10241_v6 = vld [vmem:[%s10801_s20 + $0x14d8] ss:$12 sps:$4 sm:$0xff]  }
 0x2e1   : > { %6801 = vmatprep.subr.bf16.mxu0 %v10180_v5  ;;  %v10240_v5 = vld [vmem:[%s10801_s20 + $0x1654] ss:$12 sps:$4 sm:$0xff]  }
 0x2e3   : > { %8993 = vmatpush3.bf16.msra.mxu1 %v10182_v10 }
 0x2e4   : > { %6802 = vmatpush1.bf16.msra.mxu0 %v10178_v7  ;;  %8994 = vmatprep.subr.bf16.mxu1 %v10186_v13  ;;  %v10238_v13 = vld [vmem:[%s10801_s20 + $0x1650] ss:$12 sps:$4 sm:$0xff]  }
 0x2e5   : > { %6803 = vmatprep.subr.bf16.mxu0 %v10185_v11 }
 0x2e7   : > { %8995 = vmatpush3.bf16.msra.mxu1 %v10187_v15 }
 0x2e8   : > { %6804 = vmatpush1.bf16.msra.mxu0 %v10183_v14  ;;  %8996 = vmatprep.subr.bf16.mxu1 %v10191_v17  ;;  %v10242_v14 = vld [vmem:[%s10801_s20 + $0x1418] ss:$12 sps:$4 sm:$0xff]   ;;  %v10246_v17 = vld [vmem:[%s10801_s20 + $0x14f0] ss:$12 sps:$4 sm:$0xff]  }
 0x2e9   : > { %6805 = vmatprep.subr.bf16.mxu0 %v10190_v16  ;;  %v10245_v16 = vld [vmem:[%s10801_s20 + $0x166c] ss:$12 sps:$4 sm:$0xff]  }
 0x2eb   : > { %8997 = vmatpush3.bf16.msra.mxu1 %v10192_v19 }
 0x2ec   : > { %6806 = vmatpush1.bf16.msra.mxu0 %v10188_v18  ;;  %8998 = vmatprep.subr.bf16.mxu1 %v10196_v21  ;;  %v10243_v21 = vld [vmem:[%s10801_s20 + $0x1668] ss:$12 sps:$4 sm:$0xff]  }
 0x2ed   : > { %6807 = vmatprep.subr.bf16.mxu0 %v10195_v20  ;;  %v8850_v26 = vpop.f32.mrb[24].mxu1 }
 0x2ee   : > { %v8851_v30 = vpop.f32.mrb[25].mxu1 }
 0x2ef   : > { %v8852_v31 = vadd.f32 %v8851_v30, %v8850_v26  ;;  %v8853_v32 = vpop.f32.mrb[26].mxu1  ;;  %8999 = vmatpush3.bf16.msra.mxu1 %v10197_v23  ;;  %v10253_v23 = vld [vmem:[%s10801_s20 + $0x1684] ss:$12 sps:$4 sm:$0xff]   ;;  %v10251_v26 = vld [vmem:[%s10801_s20 + $0x1680] ss:$12 sps:$4 sm:$0xff]  }
 0x2f0   : > { %6808 = vmatpush1.bf16.msra.mxu0 %v10193_v22  ;;  %v8854_v33 = vpop.f32.mrb[27].mxu1  ;;  %9000 = vmatprep.subr.bf16.mxu1 %v10201_v25  ;;  %v10247_v22 = vld [vmem:[%s10801_s20 + $0x1430] ss:$12 sps:$4 sm:$0xff]   ;;  %v10259_v30 = vld [vmem:[%s10801_s20 + $0x15e0] ss:$12 sps:$4 sm:$0xff]  }
 0x2f1   : > { %6809 = vmatprep.subr.bf16.mxu0 %v10200_v24  ;;  %v11540_v37 = vadd.f32 %v8852_v31, %v11496_v49  ;;  %v8855_v38 = vadd.f32 %v8854_v33, %v8853_v32  ;;  %v10220_v49 = vld [vmem:[%s10801_s20 + $0x15f4] ss:$12 sps:$4 sm:$0xff]   ;;  %v11595_v31 = vld [vmem:[#allocation2 + $0x7c] ss:$144 sps:$4 sm:$0xff]   ;;  %v10256_v32 = vld [vmem:[%s10801_s20 + $0x1698] ss:$12 sps:$4 sm:$0xff]  }
 0x2f2   : > { %v10254_v24 = vld [vmem:[%s10801_s20 + $0x15c8] ss:$12 sps:$4 sm:$0xff]   ;;  %v11589_v25 = vld [vmem:[#allocation2 + $0x70] ss:$144 sps:$4 sm:$0xff]  }
 0x2f3   : > { %v11544_v40 = vadd.f32 %v8855_v38, %v11500_v52  ;;  %9001 = vmatpush3.bf16.msra.mxu1 %v10202_v29  ;;  %v10225_v52 = vld [vmem:[%s10801_s20 + $0x160c] ss:$12 sps:$4 sm:$0xff]   ;;  %v10258_v29 = vld [vmem:[%s10801_s20 + $0x169c] ss:$12 sps:$4 sm:$0xff]  }
 0x2f4   : > { %6810 = vmatpush1.bf16.msra.mxu0 %v10198_v27  ;;  %9002 = vmatprep.subr.bf16.mxu1 %v10206_v36  ;;  %v10255_v27 = vld [vmem:[%s10801_s20 + $0x1508] ss:$12 sps:$4 sm:$0xff]   ;;  %v10260_v33 = vld [vmem:[%s10801_s20 + $0x1520] ss:$12 sps:$4 sm:$0xff]   ;;  %v10264_v36 = vld [vmem:[%s10801_s20 + $0x15f8] ss:$12 sps:$4 sm:$0xff]  }
 0x2f5   : > { %6811 = vmatprep.subr.bf16.mxu0 %v10205_v35  ;;  %v10263_v35 = vld [vmem:[%s10801_s20 + $0x16b4] ss:$12 sps:$4 sm:$0xff]   ;;  %v10268_v38 = vld [vmem:[%s10801_s20 + $0x16cc] ss:$12 sps:$4 sm:$0xff]  }
 0x2f7   : > { %9003 = vmatpush3.bf16.msra.mxu1 %v10207_v3  ;;  %v10273_v3 = vld [vmem:[%s10801_s20 + $0x16e4] ss:$12 sps:$4 sm:$0xff]  }
 0x2f8   : > { %6812 = vmatpush1.bf16.msra.mxu0 %v10203_v39  ;;  %9010 = vmatprep.subr.bf16.mxu1 %v10211_v42  ;;  %v10269_v39 = vld [vmem:[%s10801_s20 + $0x1610] ss:$12 sps:$4 sm:$0xff]   ;;  %v10271_v42 = vld [vmem:[%s10801_s20 + $0x16e0] ss:$12 sps:$4 sm:$0xff]  }
 0x2f9   : > { %6813 = vmatprep.subr.bf16.mxu0 %v10210_v41  ;;  %v10274_v41 = vld [vmem:[%s10801_s20 + $0x1628] ss:$12 sps:$4 sm:$0xff]  }
 0x2fa   : > { %7494 = vmatmul.mubr.bf16.vlgmr.msra.gmra.mrb[52].mxu1 %v11423_v28  ;;  %v10222_v28 = vld [vmem:[%s10801_s20 + $0x13b8] ss:$12 sps:$4 sm:$0xff]  }
 0x2fb   : > { %9011 = vmatpush3.bf16.msra.mxu1 %v10212_v44  ;;  %7534 = vmatprep.mubr.bf16.mxu1 %v11430_v34  ;;  %v10230_v34 = vld [vmem:[%s10801_s20 + $0x1624] ss:$12 sps:$4 sm:$0xff]   ;;  %v10278_v44 = vld [vmem:[%s10801_s20 + $0x16fc] ss:$12 sps:$4 sm:$0xff]  }
 0x2fc   : > { %6814 = vmatpush1.bf16.msra.mxu0 %v10208_v43  ;;  %9012 = vmatprep.subr.bf16.mxu1 %v10216_v46  ;;  %v10275_v43 = vld [vmem:[%s10801_s20 + $0x1568] ss:$12 sps:$4 sm:$0xff]   ;;  %v10276_v46 = vld [vmem:[%s10801_s20 + $0x16f8] ss:$12 sps:$4 sm:$0xff]  }
 0x2fd   : > { %6815 = vmatprep.subr.bf16.mxu0 %v10215_v45  ;;  %v10279_v45 = vld [vmem:[%s10801_s20 + $0x1640] ss:$12 sps:$4 sm:$0xff]  }
 0x2ff   : > { %9013 = vmatpush3.bf16.msra.mxu1 %v10217_v48  ;;  %v10283_v48 = vld [vmem:[%s10801_s20 + $0x1714] ss:$12 sps:$4 sm:$0xff]  }
 0x300   : > { %6816 = vmatpush1.bf16.msra.mxu0 %v10213_v47  ;;  %9014 = vmatprep.subr.bf16.mxu1 %v10221_v50  ;;  %v10280_v47 = vld [vmem:[%s10801_s20 + $0x1580] ss:$12 sps:$4 sm:$0xff]  }
 0x301   : > { %6817 = vmatprep.subr.bf16.mxu0 %v10220_v49  ;;  %v10284_v49 = vld [vmem:[%s10801_s20 + $0x1658] ss:$12 sps:$4 sm:$0xff]  }
 0x303   : > { %9015 = vmatpush3.bf16.msra.mxu1 %v10222_v28 }
 0x304   : > { %6818 = vmatpush1.bf16.msra.mxu0 %v10218_v51  ;;  %9016 = vmatprep.subr.bf16.mxu1 %v10226_v53  ;;  %v10281_v53 = vld [vmem:[%s10801_s20 + $0x1710] ss:$12 sps:$4 sm:$0xff]  }
 0x305   : > { %6819 = vmatprep.subr.bf16.mxu0 %v10225_v52 }
 0x307   : > { %9017 = vmatpush3.bf16.msra.mxu1 %v10227_v55 }
 0x308   : > { %6820 = vmatpush1.bf16.msra.mxu0 %v10223_v54  ;;  %9018 = vmatprep.subr.bf16.mxu1 %v10231_v57  ;;  %v10285_v54 = vld [vmem:[%s10801_s20 + $0x1598] ss:$12 sps:$4 sm:$0xff]   ;;  %v10289_v57 = vld [vmem:[%s10801_s20 + $0x1670] ss:$12 sps:$4 sm:$0xff]  }
 0x309   : > { %6821 = vmatprep.subr.bf16.mxu0 %v10230_v34  ;;  %v10288_v34 = vld [vmem:[%s10801_s20 + $0x172c] ss:$12 sps:$4 sm:$0xff]  }
 0x30b   : > { %9019 = vmatpush3.bf16.msra.mxu1 %v10232_v60 }
 0x30c   : > { %6822 = vmatpush1.bf16.msra.mxu0 %v10228_v58  ;;  %9020 = vmatprep.subr.bf16.mxu1 %v10236_v62  ;;  %v10286_v62 = vld [vmem:[%s10801_s20 + $0x1728] ss:$12 sps:$4 sm:$0xff]  }
 0x30d   : > { %6823 = vmatprep.subr.bf16.mxu0 %v10235_v61  ;;  %v8872_v7 = vpop.f32.mrb[28].mxu1 }
 0x30e   : > { %v8873_v9 = vpop.f32.mrb[29].mxu1 }
 0x30f   : > { %v8874_v10 = vadd.f32 %v8873_v9, %v8872_v7  ;;  %v8875_v11 = vpop.f32.mrb[30].mxu1  ;;  %9021 = vmatpush3.bf16.msra.mxu1 %v10237_v1  ;;  %v10293_v1 = vld [vmem:[%s10801_s20 + $0x1744] ss:$12 sps:$4 sm:$0xff]   ;;  %v10295_v7 = vld [vmem:[%s10801_s20 + $0x1688] ss:$12 sps:$4 sm:$0xff]  }
 0x310   : > { %6824 = vmatpush1.bf16.msra.mxu0 %v10233_v0  ;;  %v8876_v15 = vpop.f32.mrb[31].mxu1  ;;  %9022 = vmatprep.subr.bf16.mxu1 %v10241_v6  ;;  %v10290_v0 = vld [vmem:[%s10801_s20 + $0x15b0] ss:$12 sps:$4 sm:$0xff]   ;;  %v10291_v6 = vld [vmem:[%s10801_s20 + $0x1740] ss:$12 sps:$4 sm:$0xff]  }
 0x311   : > { %6825 = vmatprep.subr.bf16.mxu0 %v10240_v5  ;;  %v11580_v18 = vadd.f32 %v8874_v10, %v11540_v37  ;;  %v8877_v19 = vadd.f32 %v8876_v15, %v8875_v11  ;;  %v10265_v37 = vld [vmem:[%s10801_s20 + $0x1538] ss:$12 sps:$4 sm:$0xff]   ;;  %v10294_v5 = vld [vmem:[%s10801_s20 + $0x1748] ss:$12 sps:$4 sm:$0xff]   ;;  %v10299_v10 = vld [vmem:[%s10801_s20 + $0x1760] ss:$12 sps:$4 sm:$0xff]  }
 0x312   : > { %v10298_v9 = vld [vmem:[%s10801_s20 + $0x175c] ss:$12 sps:$4 sm:$0xff]   ;;  %v10296_v11 = vld [vmem:[%s10801_s20 + $0x1758] ss:$12 sps:$4 sm:$0xff]  }
 0x313   : > { %v11583_v20 = vadd.f32 %v8877_v19, %v11544_v40  ;;  %9023 = vmatpush3.bf16.msra.mxu1 %v10242_v14  ;;  %v10266_v40 = vld [vmem:[%s10801_s20 + $0x16c8] ss:$12 sps:$4 sm:$0xff]   ;;  %v10304_v15 = vld [vmem:[%s10801_s20 + $0x1778] ss:$12 sps:$4 sm:$0xff]   ;;  %v10309_v19 = vld [vmem:[%s10801_s20 + $0x1790] ss:$12 sps:$4 sm:$0xff]  }
 0x314   : > { %6826 = vmatpush1.bf16.msra.mxu0 %v10238_v13  ;;  %9024 = vmatprep.subr.bf16.mxu1 %v10246_v17  ;;  %v10300_v13 = vld [vmem:[%s10801_s20 + $0x16a0] ss:$12 sps:$4 sm:$0xff]   ;;  %v10305_v17 = vld [vmem:[%s10801_s20 + $0x16b8] ss:$12 sps:$4 sm:$0xff]  }
 0x315   : > { %6827 = vmatprep.subr.bf16.mxu0 %v10245_v16  ;;  %v10303_v14 = vld [vmem:[%s10801_s20 + $0x1774] ss:$12 sps:$4 sm:$0xff]   ;;  %v10301_v16 = vld [vmem:[%s10801_s20 + $0x1770] ss:$12 sps:$4 sm:$0xff]  }
 0x317   : > { %9025 = vmatpush3.bf16.msra.mxu1 %v10247_v22  ;;  %v10313_v22 = vld [vmem:[%s10801_s20 + $0x17a4] ss:$12 sps:$4 sm:$0xff]  }
 0x318   : > { %6828 = vmatpush1.bf16.msra.mxu0 %v10243_v21  ;;  %9032 = vmatprep.subr.bf16.mxu1 %v10254_v24  ;;  %v10310_v21 = vld [vmem:[%s10801_s20 + $0x16d0] ss:$12 sps:$4 sm:$0xff]   ;;  %v10311_v24 = vld [vmem:[%s10801_s20 + $0x17a0] ss:$12 sps:$4 sm:$0xff]  }
 0x319   : > { %6840 = vmatprep.subr.bf16.mxu0 %v10253_v23  ;;  %v10314_v23 = vld [vmem:[%s10801_s20 + $0x17a8] ss:$12 sps:$4 sm:$0xff]  }
 0x31a   : > { %7535 = vmatmul.mubr.bf16.vlgmr.msra.gmra.mrb[56].mxu1 %v11505_v56  ;;  %v10261_v56 = vld [vmem:[%s10801_s20 + $0x16b0] ss:$12 sps:$4 sm:$0xff]  }
 0x31b   : > { %6830 = vmatmul.mubr.bf16.vlgmr.msra.gmra.mrb[0].mxu0 %v11589_v25  ;;  %9033 = vmatpush3.bf16.msra.mxu1 %v10255_v27  ;;  %v10319_v27 = vld [vmem:[%s10801_s20 + $0x17c0] ss:$12 sps:$4 sm:$0xff]  }
 0x31c   : > { %6841 = vmatpush1.bf16.msra.mxu0 %v10251_v26  ;;  %9034 = vmatprep.subr.bf16.mxu1 %v10259_v30  ;;  %v10318_v26 = vld [vmem:[%s10801_s20 + $0x17bc] ss:$12 sps:$4 sm:$0xff]   ;;  %v10320_v30 = vld [vmem:[%s10801_s20 + $0x1700] ss:$12 sps:$4 sm:$0xff]  }
 0x31d   : > { %6842 = vmatprep.subr.bf16.mxu0 %v10258_v29  ;;  %7575 = vmatprep.mubr.bf16.mxu1 %v11512_v63  ;;  %v10270_v63 = vld [vmem:[%s10801_s20 + $0x1550] ss:$12 sps:$4 sm:$0xff]   ;;  %v10316_v29 = vld [vmem:[%s10801_s20 + $0x17b8] ss:$12 sps:$4 sm:$0xff]  }
 0x31e   : > { %6872 = vmatprep.mubr.bf16.mxu0 %v11595_v31 }
 0x31f   : > { %9035 = vmatpush3.bf16.msra.mxu1 %v10260_v33 }
 0x320   : > { %6843 = vmatpush1.bf16.msra.mxu0 %v10256_v32  ;;  %9036 = vmatprep.subr.bf16.mxu1 %v10264_v36  ;;  %v10324_v32 = vld [vmem:[%s10801_s20 + $0x17d8] ss:$12 sps:$4 sm:$0xff]  }
 0x321   : > { %6844 = vmatprep.subr.bf16.mxu0 %v10263_v35 }
 0x323   : > { %9037 = vmatpush3.bf16.msra.mxu1 %v10265_v37  ;;  %v10321_v37 = vld [vmem:[%s10801_s20 + $0x17d0] ss:$12 sps:$4 sm:$0xff]  }
 0x324   : > { %6845 = vmatpush1.bf16.msra.mxu0 %v10261_v56  ;;  %9038 = vmatprep.subr.bf16.mxu1 %v10269_v39 }
 0x325   : > { %6846 = vmatprep.subr.bf16.mxu0 %v10268_v38  ;;  %v10325_v38 = vld [vmem:[%s10801_s20 + $0x1718] ss:$12 sps:$4 sm:$0xff]  }
 0x327   : > { %9039 = vmatpush3.bf16.msra.mxu1 %v10270_v63  ;;  %v10329_v63 = vld [vmem:[%s10801_s20 + $0x17f0] ss:$12 sps:$4 sm:$0xff]  }
 0x328   : > { %6847 = vmatpush1.bf16.msra.mxu0 %v10266_v40  ;;  %9040 = vmatprep.subr.bf16.mxu1 %v10274_v41  ;;  %v10328_v40 = vld [vmem:[%s10801_s20 + $0x17ec] ss:$12 sps:$4 sm:$0xff]  }
 0x329   : > { %6848 = vmatprep.subr.bf16.mxu0 %v10273_v3 }
 0x32b   : > { %9041 = vmatpush3.bf16.msra.mxu1 %v10275_v43  ;;  %v10326_v43 = vld [vmem:[%s10801_s20 + $0x17e8] ss:$12 sps:$4 sm:$0xff]  }
 0x32c   : > { %6849 = vmatpush1.bf16.msra.mxu0 %v10271_v42  ;;  %9042 = vmatprep.subr.bf16.mxu1 %v10279_v45  ;;  %v10336_v45 = vld [vmem:[%s10801_s20 + $0x1804] ss:$12 sps:$4 sm:$0xff]  }
 0x32d   : > { %6850 = vmatprep.subr.bf16.mxu0 %v10278_v44  ;;  %v8894_v50 = vpop.f32.mrb[32].mxu1  ;;  %v10330_v44 = vld [vmem:[%s10801_s20 + $0x1730] ss:$12 sps:$4 sm:$0xff]  }
 0x32e   : > { %v8895_v51 = vpop.f32.mrb[33].mxu1 }
 0x32f   : > { %v8896_v28 = vadd.f32 %v8895_v51, %v8894_v50  ;;  %v8897_v52 = vpop.f32.mrb[34].mxu1  ;;  %9043 = vmatpush3.bf16.msra.mxu1 %v10280_v47  ;;  %v10331_v47 = vld [vmem:[#allocation2 + $0x78] ss:$144 sps:$4 sm:$0xff]   ;;  %v10342_v51 = vld [vmem:[%s10801_s20 + $0x18e0] ss:$12 sps:$4 sm:$0xff]  }
 0x330   : > { %6851 = vmatpush1.bf16.msra.mxu0 %v10276_v46  ;;  %v8898_v55 = vpop.f32.mrb[35].mxu1  ;;  %9044 = vmatprep.subr.bf16.mxu1 %v10284_v49  ;;  %v10337_v46 = vld [vmem:[%s10801_s20 + $0x18c8] ss:$12 sps:$4 sm:$0xff]  }
 0x331   : > { %6852 = vmatprep.subr.bf16.mxu0 %v10283_v48  ;;  %v11626_v58 = vadd.f32 %v8896_v28, %v11580_v18  ;;  %v8899_v60 = vadd.f32 %v8898_v55, %v8897_v52  ;;  %v10308_v18 = vld [vmem:[%s10801_s20 + $0x178c] ss:$12 sps:$4 sm:$0xff]   ;;  %v10338_v49 = vld [vmem:[%s10801_s20 + $0x1808] ss:$12 sps:$4 sm:$0xff]  }
 0x332   : > { %v10334_v48 = vld [vmem:[%s10801_s20 + $0x1800] ss:$12 sps:$4 sm:$0xff]   ;;  %v10341_v50 = vld [vmem:[%s10801_s20 + $0x181c] ss:$12 sps:$4 sm:$0xff]   ;;  %v10376_v28 = vld [vmem:[#allocation2 + $0x84] ss:$144 sps:$4 sm:$0xff]  }
 0x333   : > { %v11629_v61 = vadd.f32 %v8899_v60, %v11583_v20  ;;  %9045 = vmatpush3.bf16.msra.mxu1 %v10285_v54  ;;  %v10306_v20 = vld [vmem:[%s10801_s20 + $0x1788] ss:$12 sps:$4 sm:$0xff]   ;;  %v10339_v52 = vld [vmem:[%s10801_s20 + $0x1818] ss:$12 sps:$4 sm:$0xff]   ;;  %v10352_v60 = vld [vmem:[%s10801_s20 + $0x1910] ss:$12 sps:$4 sm:$0xff]  }
 0x334   : > { %6853 = vmatpush1.bf16.msra.mxu0 %v10281_v53  ;;  %9046 = vmatprep.subr.bf16.mxu1 %v10289_v57  ;;  %v10343_v53 = vld [vmem:[%s10801_s20 + $0x1820] ss:$12 sps:$4 sm:$0xff]   ;;  %v10347_v55 = vld [vmem:[%s10801_s20 + $0x18f8] ss:$12 sps:$4 sm:$0xff]  }
 0x335   : > { %6854 = vmatprep.subr.bf16.mxu0 %v10288_v34  ;;  %v10346_v54 = vld [vmem:[%s10801_s20 + $0x1834] ss:$12 sps:$4 sm:$0xff]   ;;  %v10344_v34 = vld [vmem:[%s10801_s20 + $0x1830] ss:$12 sps:$4 sm:$0xff]   ;;  %v10348_v57 = vld [vmem:[%s10801_s20 + $0x1838] ss:$12 sps:$4 sm:$0xff]  }
 0x337   : > { %9047 = vmatpush3.bf16.msra.mxu1 %v10290_v0  ;;  %v10356_v0 = vld [vmem:[%s10801_s20 + $0x1864] ss:$12 sps:$4 sm:$0xff]  }
 0x338   : > { %6855 = vmatpush1.bf16.msra.mxu0 %v10286_v62  ;;  %9054 = vmatprep.subr.bf16.mxu1 %v10294_v5  ;;  %v10353_v62 = vld [vmem:[%s10801_s20 + $0x1850] ss:$12 sps:$4 sm:$0xff]   ;;  %v10354_v5 = vld [vmem:[%s10801_s20 + $0x1860] ss:$12 sps:$4 sm:$0xff]  }
 0x339   : > { %6856 = vmatprep.subr.bf16.mxu0 %v10293_v1  ;;  %v10357_v1 = vld [vmem:[%s10801_s20 + $0x1928] ss:$12 sps:$4 sm:$0xff]  }
 0x33a   : > { %7576 = vmatmul.mubr.bf16.vlgmr.msra.gmra.mrb[60].mxu1 %v11589_v25  ;;  %v10315_v25 = vld [vmem:[%s10801_s20 + $0x16e8] ss:$12 sps:$4 sm:$0xff]  }
 0x33b   : > { %9055 = vmatpush3.bf16.msra.mxu1 %v10295_v7  ;;  %7616 = vmatprep.mubr.bf16.mxu1 %v11595_v31  ;;  %v10323_v31 = vld [vmem:[%s10801_s20 + $0x17d4] ss:$12 sps:$4 sm:$0xff]   ;;  %v10361_v7 = vld [vmem:[%s10801_s20 + $0x187c] ss:$12 sps:$4 sm:$0xff]  }
 0x33c   : > { %6857 = vmatpush1.bf16.msra.mxu0 %v10291_v6  ;;  %9056 = vmatprep.subr.bf16.mxu1 %v10299_v10  ;;  %v10358_v6 = vld [vmem:[%s10801_s20 + $0x1868] ss:$12 sps:$4 sm:$0xff]   ;;  %v10359_v10 = vld [vmem:[%s10801_s20 + $0x1878] ss:$12 sps:$4 sm:$0xff]  }
 0x33d   : > { %6858 = vmatprep.subr.bf16.mxu0 %v10298_v9  ;;  %v10362_v9 = vld [vmem:[%s10801_s20 + $0x1940] ss:$12 sps:$4 sm:$0xff]  }
 0x33f   : > { %9057 = vmatpush3.bf16.msra.mxu1 %v10300_v13  ;;  %v10366_v13 = vld [vmem:[%s10801_s20 + $0x1894] ss:$12 sps:$4 sm:$0xff]  }
 0x340   : > { %6859 = vmatpush1.bf16.msra.mxu0 %v10296_v11  ;;  %9058 = vmatprep.subr.bf16.mxu1 %v10304_v15  ;;  %v10363_v11 = vld [vmem:[%s10801_s20 + $0x1880] ss:$12 sps:$4 sm:$0xff]  }
 0x341   : > { %6860 = vmatprep.subr.bf16.mxu0 %v10303_v14  ;;  %v10367_v14 = vld [vmem:[%s10801_s20 + $0x1958] ss:$12 sps:$4 sm:$0xff]  }
 0x343   : > { %9059 = vmatpush3.bf16.msra.mxu1 %v10305_v17 }
 0x344   : > { %6861 = vmatpush1.bf16.msra.mxu0 %v10301_v16  ;;  %9060 = vmatprep.subr.bf16.mxu1 %v10309_v19  ;;  %v10364_v19 = vld [vmem:[%s10801_s20 + $0x1890] ss:$12 sps:$4 sm:$0xff]  }
 0x345   : > { %6862 = vmatprep.subr.bf16.mxu0 %v10308_v18 }
 0x347   : > { %9061 = vmatpush3.bf16.msra.mxu1 %v10310_v21 }
 0x348   : > { %6863 = vmatpush1.bf16.msra.mxu0 %v10306_v20  ;;  %9062 = vmatprep.subr.bf16.mxu1 %v10314_v23  ;;  %v10368_v20 = vld [vmem:[%s10801_s20 + $0x1898] ss:$12 sps:$4 sm:$0xff]   ;;  %v10372_v23 = vld [vmem:[%s10801_s20 + $0x1970] ss:$12 sps:$4 sm:$0xff]  }
 0x349   : > { %6864 = vmatprep.subr.bf16.mxu0 %v10313_v22  ;;  %v10371_v22 = vld [vmem:[%s10801_s20 + $0x18ac] ss:$12 sps:$4 sm:$0xff]  }
 0x34b   : > { %9063 = vmatpush3.bf16.msra.mxu1 %v10315_v25 }
 0x34c   : > { %6865 = vmatpush1.bf16.msra.mxu0 %v10311_v24  ;;  %9064 = vmatprep.subr.bf16.mxu1 %v10319_v27  ;;  %v10369_v27 = vld [vmem:[%s10801_s20 + $0x18a8] ss:$12 sps:$4 sm:$0xff]  }
 0x34d   : > { %6866 = vmatprep.subr.bf16.mxu0 %v10318_v26  ;;  %v8916_v33 = vpop.f32.mrb[36].mxu1 }
 0x34e   : > { %v8917_v35 = vpop.f32.mrb[37].mxu1 }
 0x34f   : > { %v8918_v36 = vadd.f32 %v8917_v35, %v8916_v33  ;;  %v8919_v56 = vpop.f32.mrb[38].mxu1  ;;  %9065 = vmatpush3.bf16.msra.mxu1 %v10320_v30  ;;  %v10379_v30 = vld [vmem:[%s10801_s20 + $0x18c4] ss:$12 sps:$4 sm:$0xff]   ;;  %v10377_v33 = vld [vmem:[%s10801_s20 + $0x18c0] ss:$12 sps:$4 sm:$0xff]  }
 0x350   : > { %6867 = vmatpush1.bf16.msra.mxu0 %v10316_v29  ;;  %v8920_v39 = vpop.f32.mrb[39].mxu1  ;;  %9066 = vmatprep.subr.bf16.mxu1 %v10324_v32  ;;  %v10373_v29 = vld [vmem:[%s10801_s20 + $0x18b0] ss:$12 sps:$4 sm:$0xff]   ;;  %v10381_v35 = vld [vmem:[%s10801_s20 + $0x1988] ss:$12 sps:$4 sm:$0xff]  }
 0x351   : > { %6868 = vmatprep.subr.bf16.mxu0 %v10323_v31  ;;  %v11666_v3 = vadd.f32 %v8918_v36, %v11626_v58  ;;  %v8921_v41 = vadd.f32 %v8920_v39, %v8919_v56  ;;  %v10351_v58 = vld [vmem:[%s10801_s20 + $0x184c] ss:$12 sps:$4 sm:$0xff]   ;;  %v10380_v31 = vld [vmem:[%s10801_s20 + $0x1a48] ss:$12 sps:$4 sm:$0xff]   ;;  %v11713_v32 = vld [vmem:[#allocation2 + $0x80] ss:$144 sps:$4 sm:$0xff]  }
 0x352   : > { %v10384_v36 = vld [vmem:[%s10801_s20 + $0x18dc] ss:$12 sps:$4 sm:$0xff]   ;;  %v10385_v56 = vld [vmem:[%s10801_s20 + $0x1a60] ss:$12 sps:$4 sm:$0xff]  }
 0x353   : > { %v11669_v42 = vadd.f32 %v8921_v41, %v11629_v61  ;;  %9067 = vmatpush3.bf16.msra.mxu1 %v10325_v38  ;;  %v10349_v61 = vld [vmem:[%s10801_s20 + $0x1848] ss:$12 sps:$4 sm:$0xff]   ;;  %v10382_v38 = vld [vmem:[%s10801_s20 + $0x18d8] ss:$12 sps:$4 sm:$0xff]   ;;  %v10386_v39 = vld [vmem:[%s10801_s20 + $0x19a0] ss:$12 sps:$4 sm:$0xff]  }
 0x354   : > { %6869 = vmatpush1.bf16.msra.mxu0 %v10321_v37  ;;  %9068 = vmatprep.subr.bf16.mxu1 %v10329_v63  ;;  %v11719_v37 = vld [vmem:[#allocation2 + $0x8c] ss:$144 sps:$4 sm:$0xff]   ;;  %v10390_v63 = vld [vmem:[%s10801_s20 + $0x1a78] ss:$12 sps:$4 sm:$0xff]  }
 0x355   : > { %6870 = vmatprep.subr.bf16.mxu0 %v10328_v40  ;;  %v10389_v40 = vld [vmem:[%s10801_s20 + $0x18f4] ss:$12 sps:$4 sm:$0xff]   ;;  %v10391_v41 = vld [vmem:[%s10801_s20 + $0x19b8] ss:$12 sps:$4 sm:$0xff]  }
 0x357   : > { %9069 = vmatpush3.bf16.msra.mxu1 %v10330_v44  ;;  %v10392_v44 = vld [vmem:[%s10801_s20 + $0x1908] ss:$12 sps:$4 sm:$0xff]  }
 0x358   : > { %6871 = vmatpush1.bf16.msra.mxu0 %v10326_v43  ;;  %9076 = vmatprep.subr.bf16.mxu1 %v10337_v46  ;;  %v10395_v43 = vld [vmem:[%s10801_s20 + $0x1a90] ss:$12 sps:$4 sm:$0xff]  }
 0x359   : > { %6883 = vmatprep.subr.bf16.mxu0 %v10336_v45  ;;  %v10396_v45 = vld [vmem:[%s10801_s20 + $0x19d0] ss:$12 sps:$4 sm:$0xff]  }
 0x35a   : > { %7617 = vmatmul.mubr.bf16.vlgmr.msra.gmra.mrb[64].mxu1 %v10331_v47  ;;  %v10399_v46 = vld [vmem:[%s10801_s20 + $0x1924] ss:$12 sps:$4 sm:$0xff]  }
 0x35b   : > { %6873 = vmatmul.mubr.bf16.vlgmr.msra.gmra.mrb[0].mxu0 %v10331_v47  ;;  %9077 = vmatpush3.bf16.msra.mxu1 %v10338_v49  ;;  %v10400_v47 = vld [vmem:[%s10801_s20 + $0x1aa8] ss:$12 sps:$4 sm:$0xff]  }
 0x35c   : > { %6884 = vmatpush1.bf16.msra.mxu0 %v10334_v48  ;;  %9078 = vmatprep.subr.bf16.mxu1 %v10342_v51  ;;  %v10397_v48 = vld [vmem:[%s10801_s20 + $0x1920] ss:$12 sps:$4 sm:$0xff]   ;;  %v10401_v49 = vld [vmem:[%s10801_s20 + $0x19e8] ss:$12 sps:$4 sm:$0xff]  }
 0x35d   : > { %6885 = vmatprep.subr.bf16.mxu0 %v10341_v50  ;;  %7657 = vmatprep.mubr.bf16.mxu1 %v10376_v28  ;;  %v10404_v50 = vld [vmem:[%s10801_s20 + $0x193c] ss:$12 sps:$4 sm:$0xff]   ;;  %v10405_v51 = vld [vmem:[%s10801_s20 + $0x1ac0] ss:$12 sps:$4 sm:$0xff]  }
 0x35e   : > { %6915 = vmatprep.mubr.bf16.mxu0 %v10376_v28  ;;  %v10402_v28 = vld [vmem:[%s10801_s20 + $0x1938] ss:$12 sps:$4 sm:$0xff]  }
 0x35f   : > { %9079 = vmatpush3.bf16.msra.mxu1 %v10343_v53  ;;  %v10409_v53 = vld [vmem:[%s10801_s20 + $0x1954] ss:$12 sps:$4 sm:$0xff]  }
 0x360   : > { %6886 = vmatpush1.bf16.msra.mxu0 %v10339_v52  ;;  %9080 = vmatprep.subr.bf16.mxu1 %v10347_v55  ;;  %v10406_v52 = vld [vmem:[%s10801_s20 + $0x1a00] ss:$12 sps:$4 sm:$0xff]  }
 0x361   : > { %6887 = vmatprep.subr.bf16.mxu0 %v10346_v54  ;;  %v10410_v54 = vld [vmem:[%s10801_s20 + $0x1ad8] ss:$12 sps:$4 sm:$0xff]  }
 0x363   : > { %9081 = vmatpush3.bf16.msra.mxu1 %v10348_v57 }
 0x364   : > { %6888 = vmatpush1.bf16.msra.mxu0 %v10344_v34  ;;  %9082 = vmatprep.subr.bf16.mxu1 %v10352_v60  ;;  %v10407_v60 = vld [vmem:[%s10801_s20 + $0x1950] ss:$12 sps:$4 sm:$0xff]  }
 0x365   : > { %6889 = vmatprep.subr.bf16.mxu0 %v10351_v58 }
 0x367   : > { %9083 = vmatpush3.bf16.msra.mxu1 %v10353_v62 }
 0x368   : > { %6890 = vmatpush1.bf16.msra.mxu0 %v10349_v61  ;;  %9084 = vmatprep.subr.bf16.mxu1 %v10357_v1  ;;  %v10411_v61 = vld [vmem:[%s10801_s20 + $0x1a18] ss:$12 sps:$4 sm:$0xff]   ;;  %v10415_v1 = vld [vmem:[%s10801_s20 + $0x1af0] ss:$12 sps:$4 sm:$0xff]  }
 0x369   : > { %6891 = vmatprep.subr.bf16.mxu0 %v10356_v0  ;;  %v10414_v0 = vld [vmem:[%s10801_s20 + $0x196c] ss:$12 sps:$4 sm:$0xff]  }
 0x36b   : > { %9085 = vmatpush3.bf16.msra.mxu1 %v10358_v6 }
 0x36c   : > { %6892 = vmatpush1.bf16.msra.mxu0 %v10354_v5  ;;  %9086 = vmatprep.subr.bf16.mxu1 %v10362_v9  ;;  %v10412_v9 = vld [vmem:[%s10801_s20 + $0x1968] ss:$12 sps:$4 sm:$0xff]  }
 0x36d   : > { %6893 = vmatprep.subr.bf16.mxu0 %v10361_v7  ;;  %v8938_v15 = vpop.f32.mrb[40].mxu1 }
 0x36e   : > { %v8939_v16 = vpop.f32.mrb[41].mxu1 }
 0x36f   : > { %v8940_v17 = vadd.f32 %v8939_v16, %v8938_v15  ;;  %v8941_v18 = vpop.f32.mrb[42].mxu1  ;;  %9087 = vmatpush3.bf16.msra.mxu1 %v10363_v11  ;;  %v10422_v11 = vld [vmem:[%s10801_s20 + $0x1984] ss:$12 sps:$4 sm:$0xff]   ;;  %v10425_v15 = vld [vmem:[%s10801_s20 + $0x199c] ss:$12 sps:$4 sm:$0xff]  }
 0x370   : > { %6894 = vmatpush1.bf16.msra.mxu0 %v10359_v10  ;;  %v8942_v21 = vpop.f32.mrb[43].mxu1  ;;  %9088 = vmatprep.subr.bf16.mxu1 %v10367_v14  ;;  %v10416_v10 = vld [vmem:[%s10801_s20 + $0x1a30] ss:$12 sps:$4 sm:$0xff]   ;;  %v10420_v14 = vld [vmem:[%s10801_s20 + $0x1980] ss:$12 sps:$4 sm:$0xff]  }
 0x371   : > { %6895 = vmatprep.subr.bf16.mxu0 %v10366_v13  ;;  %v11704_v24 = vadd.f32 %v8940_v17, %v11666_v3  ;;  %v8943_v25 = vadd.f32 %v8942_v21, %v8941_v18  ;;  %v10387_v3 = vld [vmem:[%s10801_s20 + $0x18f0] ss:$12 sps:$4 sm:$0xff]   ;;  %v11752_v13 = vld [vmem:[#allocation2 + $0x88] ss:$144 sps:$4 sm:$0xff]   ;;  %v10428_v17 = vld [vmem:[%s10801_s20 + $0x19b4] ss:$12 sps:$4 sm:$0xff]  }
 0x372   : > { %v10423_v16 = vld [vmem:[%s10801_s20 + $0x1998] ss:$12 sps:$4 sm:$0xff]   ;;  %v10426_v18 = vld [vmem:[%s10801_s20 + $0x19b0] ss:$12 sps:$4 sm:$0xff]  }
 0x373   : > { %v11707_v26 = vadd.f32 %v8943_v25, %v11669_v42  ;;  %9089 = vmatpush3.bf16.msra.mxu1 %v10368_v20  ;;  %v10394_v42 = vld [vmem:[%s10801_s20 + $0x190c] ss:$12 sps:$4 sm:$0xff]   ;;  %v10429_v20 = vld [vmem:[%s10801_s20 + $0x19c8] ss:$12 sps:$4 sm:$0xff]   ;;  %v10434_v21 = vld [vmem:[%s10801_s20 + $0x19e4] ss:$12 sps:$4 sm:$0xff]  }
 0x374   : > { %6896 = vmatpush1.bf16.msra.mxu0 %v10364_v19  ;;  %9090 = vmatprep.subr.bf16.mxu1 %v10372_v23  ;;  %v10431_v19 = vld [vmem:[%s10801_s20 + $0x19cc] ss:$12 sps:$4 sm:$0xff]   ;;  %v10437_v23 = vld [vmem:[%s10801_s20 + $0x19fc] ss:$12 sps:$4 sm:$0xff]   ;;  %v10440_v25 = vld [vmem:[%s10801_s20 + $0x1a14] ss:$12 sps:$4 sm:$0xff]  }
 0x375   : > { %6897 = vmatprep.subr.bf16.mxu0 %v10371_v22  ;;  %v10432_v22 = vld [vmem:[%s10801_s20 + $0x19e0] ss:$12 sps:$4 sm:$0xff]  }
 0x377   : > { %9091 = vmatpush3.bf16.msra.mxu1 %v10373_v29 }
 0x378   : > { %6898 = vmatpush1.bf16.msra.mxu0 %v10369_v27  ;;  %9098 = vmatprep.subr.bf16.mxu1 %v10380_v31  ;;  %v10438_v31 = vld [vmem:[%s10801_s20 + $0x1a10] ss:$12 sps:$4 sm:$0xff]  }
 0x379   : > { %6899 = vmatprep.subr.bf16.mxu0 %v10379_v30 }
 0x37a   : > { %7658 = vmatmul.mubr.bf16.vlgmr.msra.gmra.mrb[68].mxu1 %v11713_v32 }
 0x37b   : > { %9099 = vmatpush3.bf16.msra.mxu1 %v10381_v35  ;;  %7698 = vmatprep.mubr.bf16.mxu1 %v11719_v37 }
 0x37c   : > { %6900 = vmatpush1.bf16.msra.mxu0 %v10377_v33  ;;  %9100 = vmatprep.subr.bf16.mxu1 %v10385_v56  ;;  %v10443_v33 = vld [vmem:[%s10801_s20 + $0x1a2c] ss:$12 sps:$4 sm:$0xff]  }
 0x37d   : > { %6901 = vmatprep.subr.bf16.mxu0 %v10384_v36 }
 0x37f   : > { %9101 = vmatpush3.bf16.msra.mxu1 %v10386_v39  ;;  %v10444_v39 = vld [vmem:[%s10801_s20 + $0x1a40] ss:$12 sps:$4 sm:$0xff]  }
 0x380   : > { %6902 = vmatpush1.bf16.msra.mxu0 %v10382_v38  ;;  %9102 = vmatprep.subr.bf16.mxu1 %v10390_v63  ;;  %v10446_v38 = vld [vmem:[%s10801_s20 + $0x1a44] ss:$12 sps:$4 sm:$0xff]  }
 0x381   : > { %6903 = vmatprep.subr.bf16.mxu0 %v10389_v40  ;;  %v10449_v40 = vld [vmem:[%s10801_s20 + $0x1a5c] ss:$12 sps:$4 sm:$0xff]   ;;  %v10447_v63 = vld [vmem:[%s10801_s20 + $0x1a58] ss:$12 sps:$4 sm:$0xff]  }
 0x383   : > { %9103 = vmatpush3.bf16.msra.mxu1 %v10391_v41  ;;  %v10450_v41 = vld [vmem:[%s10801_s20 + $0x1a70] ss:$12 sps:$4 sm:$0xff]  }
 0x384   : > { %6904 = vmatpush1.bf16.msra.mxu0 %v10387_v3  ;;  %9104 = vmatprep.subr.bf16.mxu1 %v10395_v43  ;;  %v10452_v3 = vld [vmem:[%s10801_s20 + $0x1a74] ss:$12 sps:$4 sm:$0xff]  }
 0x385   : > { %6905 = vmatprep.subr.bf16.mxu0 %v10394_v42  ;;  %v10455_v42 = vld [vmem:[%s10801_s20 + $0x1a8c] ss:$12 sps:$4 sm:$0xff]   ;;  %v10453_v43 = vld [vmem:[%s10801_s20 + $0x1a88] ss:$12 sps:$4 sm:$0xff]  }
 0x387   : > { %9105 = vmatpush3.bf16.msra.mxu1 %v10396_v45  ;;  %v10456_v45 = vld [vmem:[%s10801_s20 + $0x1aa0] ss:$12 sps:$4 sm:$0xff]  }
 0x388   : > { %6906 = vmatpush1.bf16.msra.mxu0 %v10392_v44  ;;  %9106 = vmatprep.subr.bf16.mxu1 %v10400_v47  ;;  %v10458_v44 = vld [vmem:[%s10801_s20 + $0x1aa4] ss:$12 sps:$4 sm:$0xff]  }
 0x389   : > { %6907 = vmatprep.subr.bf16.mxu0 %v10399_v46  ;;  %v10461_v46 = vld [vmem:[%s10801_s20 + $0x1abc] ss:$12 sps:$4 sm:$0xff]   ;;  %v10459_v47 = vld [vmem:[%s10801_s20 + $0x1ab8] ss:$12 sps:$4 sm:$0xff]  }
 0x38b   : > { %9107 = vmatpush3.bf16.msra.mxu1 %v10401_v49 }
 0x38c   : > { %6908 = vmatpush1.bf16.msra.mxu0 %v10397_v48  ;;  %9108 = vmatprep.subr.bf16.mxu1 %v10405_v51  ;;  %v10464_v48 = vld [vmem:[%s10801_s20 + $0x1ad4] ss:$12 sps:$4 sm:$0xff]  }
 0x38d   : > { %6909 = vmatprep.subr.bf16.mxu0 %v10404_v50  ;;  %v8960_v55 = vpop.f32.mrb[44].mxu1 }
 0x38e   : > { %v8961_v34 = vpop.f32.mrb[45].mxu1 }
 0x38f   : > { %v8962_v57 = vadd.f32 %v8961_v34, %v8960_v55  ;;  %v8963_v58 = vpop.f32.mrb[46].mxu1  ;;  %9109 = vmatpush3.bf16.msra.mxu1 %v10406_v52  ;;  %v10462_v52 = vld [vmem:[%s10801_s20 + $0x1ad0] ss:$12 sps:$4 sm:$0xff]  }
 0x390   : > { %6910 = vmatpush1.bf16.msra.mxu0 %v10402_v28  ;;  %v8964_v62 = vpop.f32.mrb[47].mxu1  ;;  %9110 = vmatprep.subr.bf16.mxu1 %v10410_v54  ;;  %v10467_v54 = vld [vmem:[%s10801_s20 + $0x1aec] ss:$12 sps:$4 sm:$0xff]  }
 0x391   : > { %6911 = vmatprep.subr.bf16.mxu0 %v10409_v53  ;;  %v7414_v5 = vadd.f32 %v8962_v57, %v11704_v24  ;;  %v8965_v6 = vadd.f32 %v8964_v62, %v8963_v58  ;;  %v10435_v24 = vld [vmem:[%s10801_s20 + $0x19f8] ss:$12 sps:$4 sm:$0xff]   ;;  %v10465_v58 = vld [vmem:[%s10801_s20 + $0x1ae8] ss:$12 sps:$4 sm:$0xff]  }
 0x393   : > { %v7417_v7 = vadd.f32 %v8965_v6, %v11707_v26  ;;  %9111 = vmatpush3.bf16.msra.mxu1 %v10411_v61 }
 0x394   : > { %6912 = vmatpush1.bf16.msra.mxu0 %v10407_v60  ;;  %9112 = vmatprep.subr.bf16.mxu1 %v10415_v1 }
 0x395   : > { %6913 = vmatprep.subr.bf16.mxu0 %v10414_v0 }
 0x397   : > { %9113 = vmatpush3.bf16.msra.mxu1 %v10416_v10 }
 0x398   : > { %6914 = vmatpush1.bf16.msra.mxu0 %v10412_v9 }
 0x399   : > { %6926 = vmatprep.subr.bf16.mxu0 %v10422_v11 }
 0x39a   : > { %7699 = vmatmul.mubr.bf16.vlgmr.msra.gmra.mrb[72].mxu1 %v11752_v13 }
 0x39b   : > { %6916 = vmatmul.mubr.bf16.vlgmr.msra.gmra.mrb[0].mxu0 %v11713_v32 }
 0x39c   : > { %6927 = vmatpush1.bf16.msra.mxu0 %v10420_v14  ;;  %6958 = vmatprep.mubr.bf16.mxu0 %v11719_v37  ;;  %v10441_v37 = vld [vmem:[%s10801_s20 + $0x1a28] ss:$12 sps:$4 sm:$0xff]  }
 0x39d   : > { %6928 = vmatprep.subr.bf16.mxu0 %v10425_v15 }
 0x3a0   : > { %6929 = vmatpush1.bf16.msra.mxu0 %v10423_v16 }
 0x3a1   : > { %6930 = vmatprep.subr.bf16.mxu0 %v10428_v17 }
 0x3a4   : > { %6931 = vmatpush1.bf16.msra.mxu0 %v10426_v18 }
 0x3a5   : > { %6932 = vmatprep.subr.bf16.mxu0 %v10431_v19 }
 0x3a8   : > { %6933 = vmatpush1.bf16.msra.mxu0 %v10429_v20 }
 0x3a9   : > { %6934 = vmatprep.subr.bf16.mxu0 %v10434_v21 }
 0x3ac   : > { %6935 = vmatpush1.bf16.msra.mxu0 %v10432_v22 }
 0x3ad   : > { %6936 = vmatprep.subr.bf16.mxu0 %v10437_v23  ;;  %v8982_v26 = vpop.f32.mrb[48].mxu1 }
 0x3ae   : > { %v8983_v27 = vpop.f32.mrb[49].mxu1 }
 0x3af   : > { %v8984_v29 = vadd.f32 %v8983_v27, %v8982_v26  ;;  %v8985_v30 = vpop.f32.mrb[50].mxu1 }
 0x3b0   : > { %6937 = vmatpush1.bf16.msra.mxu0 %v10435_v24  ;;  %v8986_v32 = vpop.f32.mrb[51].mxu1 }
 0x3b1   : > { %6938 = vmatprep.subr.bf16.mxu0 %v10440_v25  ;;  %v7455_v35 = vadd.f32 %v8984_v29, %v7414_v5  ;;  %v8987_v36 = vadd.f32 %v8986_v32, %v8985_v30 }
 0x3b3   : > { %v7458_v56 = vadd.f32 %v8987_v36, %v7417_v7 }
 0x3b4   : > { %6939 = vmatpush1.bf16.msra.mxu0 %v10438_v31 }
 0x3b5   : > { %6940 = vmatprep.subr.bf16.mxu0 %v10443_v33 }
 0x3b8   : > { %6941 = vmatpush1.bf16.msra.mxu0 %v10441_v37 }
 0x3b9   : > { %6942 = vmatprep.subr.bf16.mxu0 %v10446_v38 }
 0x3bc   : > { %6943 = vmatpush1.bf16.msra.mxu0 %v10444_v39 }
 0x3bd   : > { %6944 = vmatprep.subr.bf16.mxu0 %v10449_v40 }
 0x3c0   : > { %6945 = vmatpush1.bf16.msra.mxu0 %v10447_v63 }
 0x3c1   : > { %6946 = vmatprep.subr.bf16.mxu0 %v10452_v3 }
 0x3c4   : > { %6947 = vmatpush1.bf16.msra.mxu0 %v10450_v41  ;;  %v9120_v41 = vadd.f32 %v11289_v2, %v11281_v59 }
 0x3c5   : > { %6948 = vmatprep.subr.bf16.mxu0 %v10455_v42  ;;  %v9122_v42 = vadd.f32 %v11293_v4, %v11281_v59 }
 0x3c8   : > { %6949 = vmatpush1.bf16.msra.mxu0 %v10453_v43 }
 0x3c9   : > { %6950 = vmatprep.subr.bf16.mxu0 %v10458_v44 }
 0x3cc   : > { %6951 = vmatpush1.bf16.msra.mxu0 %v10456_v45 }
 0x3cd   : > { %6952 = vmatprep.subr.bf16.mxu0 %v10461_v46  ;;  %v9004_v49 = vpop.f32.mrb[52].mxu1 }
 0x3ce   : > { %v9005_v50 = vpop.f32.mrb[53].mxu1 }
 0x3cf   : > { %v9006_v51 = vadd.f32 %v9005_v50, %v9004_v49  ;;  %v9007_v28 = vpop.f32.mrb[54].mxu1 }
 0x3d0   : > { %6953 = vmatpush1.bf16.msra.mxu0 %v10459_v47  ;;  %v9008_v53 = vpop.f32.mrb[55].mxu1 }
 0x3d1   : > { %6954 = vmatprep.subr.bf16.mxu0 %v10464_v48  ;;  %v7496_v55 = vadd.f32 %v9006_v51, %v7455_v35  ;;  %v9009_v34 = vadd.f32 %v9008_v53, %v9007_v28 }
 0x3d3   : > { %v7499_v57 = vadd.f32 %v9009_v34, %v7458_v56 }
 0x3d4   : > { %6955 = vmatpush1.bf16.msra.mxu0 %v10462_v52 }
 0x3d5   : > { %6956 = vmatprep.subr.bf16.mxu0 %v10467_v54 }
 0x3d8   : > { %6957 = vmatpush1.bf16.msra.mxu0 %v10465_v58 }
 0x3db   : > { %6959 = vmatmul.mubr.bf16.vlgmr.msra.gmra.mrb[0].mxu0 %v11752_v13 }
 0x3ed   : > { %v9026_v60 = vpop.f32.mrb[56].mxu1 }
 0x3ee   : > { %v9027_v61 = vpop.f32.mrb[57].mxu1 }
 0x3ef   : > { %v9028_v62 = vadd.f32 %v9027_v61, %v9026_v60  ;;  %v9029_v0 = vpop.f32.mrb[58].mxu1 }
 0x3f0   : > { %v9030_v1 = vpop.f32.mrb[59].mxu1 }
 0x3f1   : > { %v7537_v5 = vadd.f32 %v9028_v62, %v7496_v55  ;;  %v9031_v6 = vadd.f32 %v9030_v1, %v9029_v0 }
 0x3f3   : > { %v7540_v7 = vadd.f32 %v9031_v6, %v7499_v57 }
 0x40d   : > { %v9048_v9 = vpop.f32.mrb[60].mxu1 }
 0x40e   : > { %v9049_v10 = vpop.f32.mrb[61].mxu1 }
 0x40f   : > { %v9050_v11 = vadd.f32 %v9049_v10, %v9048_v9  ;;  %v9051_v14 = vpop.f32.mrb[62].mxu1 }
 0x410   : > { %v9052_v15 = vpop.f32.mrb[63].mxu1 }
 0x411   : > { %v7578_v16 = vadd.f32 %v9050_v11, %v7537_v5  ;;  %v9053_v17 = vadd.f32 %v9052_v15, %v9051_v14 }
 0x413   : > { %v7581_v18 = vadd.f32 %v9053_v17, %v7540_v7 }
 0x42d   : > { %v9070_v19 = vpop.f32.mrb[64].mxu1 }
 0x42e   : > { %v9071_v20 = vpop.f32.mrb[65].mxu1 }
 0x42f   : > { %v9072_v13 = vadd.f32 %v9071_v20, %v9070_v19  ;;  %v9073_v21 = vpop.f32.mrb[66].mxu1 }
 0x430   : > { %v9074_v22 = vpop.f32.mrb[67].mxu1 }
 0x431   : > { %v7619_v23 = vadd.f32 %v9072_v13, %v7578_v16  ;;  %v9075_v24 = vadd.f32 %v9074_v22, %v9073_v21 }
 0x433   : > { %v7622_v25 = vadd.f32 %v9075_v24, %v7581_v18 }
 0x44d   : > { %v9092_v26 = vpop.f32.mrb[68].mxu1 }
 0x44e   : > { %v9093_v27 = vpop.f32.mrb[69].mxu1 }
 0x44f   : > { %v9094_v29 = vadd.f32 %v9093_v27, %v9092_v26  ;;  %v9095_v30 = vpop.f32.mrb[70].mxu1 }
 0x450   : > { %v9096_v31 = vpop.f32.mrb[71].mxu1 }
 0x451   : > { %v7660_v32 = vadd.f32 %v9094_v29, %v7619_v23  ;;  %v9097_v33 = vadd.f32 %v9096_v31, %v9095_v30 }
 0x453   : > { %v7663_v35 = vadd.f32 %v9097_v33, %v7622_v25 }
 0x46d   : > { %v9114_v36 = vpop.f32.mrb[72].mxu1 }
 0x46e   : > { %v9115_v56 = vpop.f32.mrb[73].mxu1 }
 0x46f   : > { %v9116_v37 = vadd.f32 %v9115_v56, %v9114_v36  ;;  %v9117_v38 = vpop.f32.mrb[74].mxu1 }
 0x470   : > { %v9118_v39 = vpop.f32.mrb[75].mxu1 }
 0x471   : > { %v7701_v40 = vadd.f32 %v9116_v37, %v7660_v32  ;;  %v9119_v63 = vadd.f32 %v9118_v39, %v9117_v38 }
 0x473   : > { %7709 = vst [vmem:[%s203_s29 + $0x10] sm:$0xff] %v7701_v40  ;;  %v7704_v3 = vadd.f32 %v9119_v63, %v7663_v35 }
 0x475   : > { %7712 = vst [vmem:[%s203_s29 + $0x28] sm:$0xff] %v7704_v3 }
 0x4ae   : > { %v6960_v43 = vpop.f32.mrb[0].mxu0 }
 0x4af   : > { %v9121_v44 = vadd.f32 %v9120_v41, %v6960_v43  ;;  %v6962_v45 = vpop.f32.mrb[1].mxu0 }
 0x4b0   : > { %v9123_v46 = vadd.f32 %v9122_v42, %v6962_v45  ;;  %v6964_v47 = vpop.f32.mrb[2].mxu0 }
 0x4b1   : > { %7707 = vst [vmem:[%s203_s29] sm:$0xff] %v9121_v44  ;;  %v9125_v48 = vadd.f32 %v11298_v8, %v6964_v47  ;;  %v6966_v2 = vpop.f32.mrb[3].mxu0 }
 0x4b2   : > { %7708 = vst [vmem:[%s203_s29 + $0x8] sm:$0xff] %v9123_v46  ;;  %v9127_v59 = vadd.f32 %v11303_v12, %v6966_v2 }
 0x4b3   : > { %7710 = vst [vmem:[%s203_s29 + $0x18] sm:$0xff] %v9125_v48 }
 0x4b4   : > { %7711 = vst [vmem:[%s203_s29 + $0x20] sm:$0xff] %v9127_v59 }
 0x4b5   : > { %10564 = shalt.err (!%p10561_p11)
}
 0x4b6   : > { %s10565_s19 = scalar_lea.hbm %s11801_s6, 768  ;;  %s10569_s26 = scalar_lea.hbm %s11849_s3, 1536 }
 0x4b7   : > { %p10566_p13 = scmp.ne.s32.totalorder %s11801_s6, %s10565_s19  ;;  %p10570_p12 = scmp.lt.u32.totalorder %s11801_s6, %s11849_s3 }
 0x4b8   : > { %p10571_p3 = scmp.lt.u32.totalorder %s10569_s26, %s10565_s19  ;;  %p10573_p8 = scmp.lt.u32.totalorder %s10565_s19, %s11801_s6 }
 0x4b9   : > { %p10567_p2 = pnand %p10566_p13, %p11867_p9 }
 0x4ba   : > { %p10572_p0 = por %p10571_p3, %p10570_p12 }
 0x4bb   : > { %p10568_p6 = pneg %p10567_p2 }
 0x4bc   : > { %p10574_p10 = por %p10573_p8, %p10572_p0 }
 0x4be   : > { %p10575_p1 = pnand %p10574_p10, %p10568_p6 }
 0x4c0   : > { %10578 = shalt.err (!%p10575_p1)
}
 0x4c1   : > { %s10632_s22 = smov 384   ;;  %s10633_s29 = smov 768  }
 0x4c2   : > { %s10634_s30 = smov 24  }
 0x4c3   : > { %9201 = dma.vmem_to_hbm [thread:$0]  (%p11867_p9), %s11795_s27, 768, %s11801_s6, %s7714_s7, %s10632_s22, %s10633_s29, %s10634_s30  }
 0x4c4 PF: > { %s7742_s16 = sand.u32 1, %s10609_s12   ;;  %p11868_p4 = scmp.ne.s32.totalorder %s11857_s25, 0 }
 0x4c5   : > { %p11869_p7 = scmp.ge.s32.totalorder %s10621_s15, 2  ;;  %s7743_s5 = scalar_lea.sflag [#allocation4], %s7742_s16 }
 0x4c7   : > { %p9212_p5 = pnand %p11869_p7, %p11868_p4 }
 0x4c9   : > { %10604 = dma.done.wait (!%p9212_p5), %s7743_s5, 768  }
 0x4ca   : > { %10606 = vsyncadd (!%p9212_p5), %s7743_s5, 4294966528  ;;  %p17_p11 = scmp.ge.s32.totalorder %s10680_s18, 4   ;;  %s11870_s12 = smov %s10613_s13 }
 0x4cb   : > { %s11871_s13 = smov %s10617_s14  ;;  %s11872_s14 = smov %s10692_s21 }
 0x4cc   : > { %s11873_s15 = smov %s10680_s18  ;;  %19 = sbr.rel (!%p17_p11) target bundleno = 6 (0x6), region = 82 }
 0x4d3   :  { %7748 = vsyncpa [#allocation3], 1 }
 0x4d4   :  { %7750 = vsyncpa [#allocation3 + $0x1], 1 }
 0x4d5   :  { %7751 = vsyncpa [#allocation6], 1 }
 0x4d6   :  { %7753 = vsyncpa [#allocation6 + $0x1], 1 }
 0x4d7   :  { %7754 = vsyncpa [#allocation4], 1 }
 0x4d8   :  { %7756 = vsyncpa [#allocation4 + $0x1], 1 }

</bundles_post_ra>
